<compile_context>
chip_gen: v7x
topology: tpu7x:2x2x1
jax: 0.10.0
libtpu: 0.0.40
codegen_flags: <defaults>
</compile_context>

<pallas_src>
import functools

import jax
import jax.numpy as jnp
from jax.experimental import pallas as pl
from jax.experimental.pallas import tpu as pltpu

K = 7
PAD = K // 2


def _sa_kernel(x_ref, w_ref, o_ref, *, nb, h, w):
    # x_ref: (NB, C, H*W) VMEM ; w_ref: (2*K*K,) f32 SMEM ; o_ref: (NB, C, H*W)
    hw = h * w
    x = x_ref[...]                                     # input dtype, no upcast

    # Channel pooling -> (NB, H*W) maps in f32 (tiny: O(H*W) per batch elem).
    avg = jnp.mean(x, axis=1).astype(jnp.float32)
    mx = jnp.max(x, axis=1).astype(jnp.float32)

    # Stack all pooled maps into one native 8-sublane tile:
    # rows [0, NB) = avg maps, rows [NB, 2*NB) = max maps, remaining rows zero.
    parts = [avg, mx]
    if 2 * nb < 8:
        parts.append(jnp.zeros((8 - 2 * nb, hw), jnp.float32))
    stacked = jnp.concatenate(parts, axis=0)           # (8, H*W) f32

    # Per-sublane selectors: which rows get the avg-weight vs the max-weight.
    sub = jax.lax.broadcasted_iota(jnp.int32, (8, 1), 0)
    e_avg = (sub < nb).astype(jnp.float32)
    e_max = ((sub >= nb) & (sub < 2 * nb)).astype(jnp.float32)

    # Flat-frame pixel coordinates: lane i -> (y, x) = (i // W, i % W).
    lane = jax.lax.broadcasted_iota(jnp.int32, (1, hw), 1)
    col = lane % w

    # Precompute boundary masks (hoisted out of the tap loop).
    # row_ok[dy]: 0 <= y + (dy - PAD) < H, expressed on the flat index.
    # col_ok[dx]: 0 <= x + (dx - PAD) < W  (also kills the within-row wrap of
    # the flattened roll; row_ok kills the frame-edge wrap).
    row_ok = [(lane >= -(dy - PAD) * w) & (lane < (h - (dy - PAD)) * w)
              for dy in range(K)]
    col_ok = [(col >= -(dx - PAD)) & (col < w - (dx - PAD)) for dx in range(K)]

    acc = jnp.zeros((8, hw), jnp.float32)
    for dy in range(K):
        ddy = dy - PAD
        for dx in range(K):
            ddx = dx - PAD
            ok = row_ok[dy] & col_ok[dx]               # (1, H*W) bool

            k = dy * K + dx
            w_avg = w_ref[k]                           # weight[0, 0, dy, dx]
            w_max = w_ref[K * K + k]                   # weight[0, 1, dy, dx]
            wcol = w_avg * e_avg + w_max * e_max       # (8, 1) f32

            shift = ddy * w + ddx                      # neighbour offset, flat
            amt = (-shift) % hw                        # jnp.roll convention
            shifted = stacked if amt == 0 else pltpu.roll(stacked, amt, axis=1)
            acc = acc + jnp.where(ok, shifted * wcol, 0.0)

    # Per-batch conv result = (avg rows) + (max rows); sigmoid -> attention.
    conv = acc[0:nb, :] + acc[nb:2 * nb, :]            # (NB, H*W) f32
    att = jax.nn.sigmoid(conv).astype(x.dtype)         # single tiny cast

    # Broadcast multiply in the input dtype; lane-dense store.
    o_ref[...] = (x * att[:, None, :]).astype(o_ref.dtype)


def _pick_batch_block(n, bytes_per_batch):
    # Fold a few batch elements per grid step when they are tiny; 2*NB pooled
    # rows must fit the 8 sublanes of the stacked tile.
    for nb in (4, 3, 2):
        if n % nb == 0 and nb * bytes_per_batch <= (4 << 20):
            return nb
    return 1


def sa_module(x, conv_weight):
    """x: (N, C, H, W); conv_weight: (1, 2, K, K) -> (N, C, H, W)."""
    n, c, h, w = x.shape
    hw = h * w
    w_flat = conv_weight.reshape(-1).astype(jnp.float32)    # (2*K*K,) for SMEM

    nb = _pick_batch_block(n, c * hw * x.dtype.itemsize)
    x_flat = x.reshape(n, c, hw)                             # lane-dense layout

    kernel = functools.partial(_sa_kernel, nb=nb, h=h, w=w)
    out_flat = pl.pallas_call(
        kernel,
        out_shape=jax.ShapeDtypeStruct((n, c, hw), x.dtype),
        grid=(n // nb,),
        in_specs=[
            pl.BlockSpec((nb, c, hw), lambda i: (i, 0, 0)),
            pl.BlockSpec(memory_space=pltpu.MemorySpace.SMEM),
        ],
        out_specs=pl.BlockSpec((nb, c, hw), lambda i: (i, 0, 0)),
        compiler_params=pltpu.CompilerParams(
            dimension_semantics=("parallel",)),
    )(x_flat, w_flat)
    return out_flat.reshape(n, c, h, w)


def sa_module_ref(x, conv_weight):
    """Pure-JAX reference mirroring the PyTorch forward."""
    xf = x.astype(jnp.float32)
    avg = jnp.mean(xf, axis=1, keepdims=True)
    mx = jnp.max(xf, axis=1, keepdims=True)
    concat = jnp.concatenate([avg, mx], axis=1)              # (N, 2, H, W)
    conv = jax.lax.conv_general_dilated(
        concat, conv_weight.astype(jnp.float32),
        window_strides=(1, 1), padding=((PAD, PAD), (PAD, PAD)),
        dimension_numbers=("NCHW", "OIHW", "NCHW"))
    return (xf * jax.nn.sigmoid(conv)).astype(x.dtype)


if __name__ == "__main__":
    key = jax.random.PRNGKey(0)
    kx, kw = jax.random.split(key)

    # Small shapes consistent with the module (forward works for any C).
    N, C, H, W = 2, 4, 16, 16
    x = jax.random.normal(kx, (N, C, H, W), dtype=jnp.float32)

    # Deterministic synthetic conv weight, shape (out=1, in=2, K, K), no bias.
    conv_weight = 0.1 * jax.random.normal(kw, (1, 2, K, K), dtype=jnp.float32)

    out = sa_module(x, conv_weight)
    out = jax.block_until_ready(out)

    ref = sa_module_ref(x, conv_weight)
    assert out.shape == (N, C, H, W)
    assert jnp.allclose(out, ref, atol=1e-5, rtol=1e-5), "mismatch vs JAX reference"

    print("KERNEL_OK")
</pallas_src>

<mosaic_0001>
module attributes {stable_mosaic.version = 11 : i64} {
  func.func @_sa_kernel(%arg0: i32, %arg1: memref<2x4x256xf32, #tpu.memory_space<vmem>>, %arg2: memref<98xf32, #tpu.memory_space<smem>>, %arg3: memref<2x4x256xf32, #tpu.memory_space<vmem>>) attributes {dimension_semantics = [#tpu.dimension_semantics<parallel>], iteration_bounds = array<i64: 1>, scalar_prefetch = 0 : i64, scratch_operands = 0 : i64, tpu.core_type = #tpu.core_type<tc>, window_params = [{transform_indices = @transform_0, window_bounds = array<i64: 2, 4, 256>}, {transform_indices = @transform_1, window_bounds = array<i64: 98>}, {transform_indices = @transform_2, window_bounds = array<i64: 2, 4, 256>}]} {
    %c0 = arith.constant 0 : index
    %c0_0 = arith.constant 0 : index
    %c0_1 = arith.constant 0 : index
    %0 = vector.load %arg1[%c0, %c0_0, %c0_1] : memref<2x4x256xf32, #tpu.memory_space<vmem>>, vector<2x4x256xf32>
    %cst = arith.constant dense<0.000000e+00> : vector<2x256xf32>
    %1 = vector.multi_reduction <add>, %0, %cst [1] : vector<2x4x256xf32> to vector<2x256xf32>
    %cst_2 = arith.constant 4.000000e+00 : f32
    %2 = vector.broadcast %cst_2 : f32 to vector<2x256xf32>
    %3 = arith.divf %1, %2 : vector<2x256xf32>
    %cst_3 = arith.constant dense<0xFF800000> : vector<2x256xf32>
    %4 = vector.multi_reduction <maximumf>, %0, %cst_3 [1] : vector<2x4x256xf32> to vector<2x256xf32>
    %cst_4 = arith.constant 0.000000e+00 : f32
    %5 = vector.broadcast %cst_4 : f32 to vector<4x256xf32>
    %6 = tpu.concatenate %3, %4, %5 in 0 : vector<2x256xf32>, vector<2x256xf32>, vector<4x256xf32> -> vector<8x256xf32>
    %7 = tpu.iota {dimensions = array<i32: 0>} : vector<8x1xi32>
    %c2_i32 = arith.constant 2 : i32
    %8 = vector.broadcast %c2_i32 : i32 to vector<8x1xi32>
    %9 = arith.cmpi slt, %7, %8 : vector<8x1xi32>
    %10 = arith.extui %9 : vector<8x1xi1> to vector<8x1xi32>
    %11 = arith.sitofp %10 : vector<8x1xi32> to vector<8x1xf32>
    %c2_i32_5 = arith.constant 2 : i32
    %12 = vector.broadcast %c2_i32_5 : i32 to vector<8x1xi32>
    %13 = arith.cmpi sge, %7, %12 : vector<8x1xi32>
    %c4_i32 = arith.constant 4 : i32
    %14 = vector.broadcast %c4_i32 : i32 to vector<8x1xi32>
    %15 = arith.cmpi slt, %7, %14 : vector<8x1xi32>
    %16 = arith.andi %13, %15 : vector<8x1xi1>
    %17 = arith.extui %16 : vector<8x1xi1> to vector<8x1xi32>
    %18 = arith.sitofp %17 : vector<8x1xi32> to vector<8x1xf32>
    %19 = tpu.iota {dimensions = array<i32: 1>} : vector<1x256xi32>
    %c16_i32 = arith.constant 16 : i32
    %c0_i32 = arith.constant 0 : i32
    %20 = arith.cmpi eq, %c16_i32, %c0_i32 : i32
    %c1_i32 = arith.constant 1 : i32
    %21 = arith.select %20, %c1_i32, %c16_i32 : i32
    %22 = vector.broadcast %21 : i32 to vector<1x256xi32>
    %23 = arith.remsi %19, %22 : vector<1x256xi32>
    %c0_i32_6 = arith.constant 0 : i32
    %24 = vector.broadcast %c0_i32_6 : i32 to vector<1x256xi32>
    %25 = arith.cmpi ne, %23, %24 : vector<1x256xi32>
    %c0_i32_7 = arith.constant 0 : i32
    %26 = vector.broadcast %c0_i32_7 : i32 to vector<1x256xi32>
    %27 = arith.cmpi slt, %23, %26 : vector<1x256xi32>
    %c0_i32_8 = arith.constant 0 : i32
    %28 = arith.cmpi slt, %21, %c0_i32_8 : i32
    %29 = vector.broadcast %28 : i1 to vector<1x256xi1>
    %30 = vector.broadcast %29 : vector<1x256xi1> to vector<1x256xi1>
    %31 = arith.xori %27, %30 : vector<1x256xi1>
    %32 = arith.andi %31, %25 : vector<1x256xi1>
    %33 = vector.broadcast %21 : i32 to vector<1x256xi32>
    %34 = arith.addi %23, %33 : vector<1x256xi32>
    %35 = arith.select %32, %34, %23 : vector<1x256xi1>, vector<1x256xi32>
    %c48_i32 = arith.constant 48 : i32
    %36 = vector.broadcast %c48_i32 : i32 to vector<1x256xi32>
    %37 = arith.cmpi sge, %19, %36 : vector<1x256xi32>
    %c304_i32 = arith.constant 304 : i32
    %38 = vector.broadcast %c304_i32 : i32 to vector<1x256xi32>
    %39 = arith.cmpi slt, %19, %38 : vector<1x256xi32>
    %40 = arith.andi %37, %39 : vector<1x256xi1>
    %c32_i32 = arith.constant 32 : i32
    %41 = vector.broadcast %c32_i32 : i32 to vector<1x256xi32>
    %42 = arith.cmpi sge, %19, %41 : vector<1x256xi32>
    %c288_i32 = arith.constant 288 : i32
    %43 = vector.broadcast %c288_i32 : i32 to vector<1x256xi32>
    %44 = arith.cmpi slt, %19, %43 : vector<1x256xi32>
    %45 = arith.andi %42, %44 : vector<1x256xi1>
    %c16_i32_9 = arith.constant 16 : i32
    %46 = vector.broadcast %c16_i32_9 : i32 to vector<1x256xi32>
    %47 = arith.cmpi sge, %19, %46 : vector<1x256xi32>
    %c272_i32 = arith.constant 272 : i32
    %48 = vector.broadcast %c272_i32 : i32 to vector<1x256xi32>
    %49 = arith.cmpi slt, %19, %48 : vector<1x256xi32>
    %50 = arith.andi %47, %49 : vector<1x256xi1>
    %c0_i32_10 = arith.constant 0 : i32
    %51 = vector.broadcast %c0_i32_10 : i32 to vector<1x256xi32>
    %52 = arith.cmpi sge, %19, %51 : vector<1x256xi32>
    %c256_i32 = arith.constant 256 : i32
    %53 = vector.broadcast %c256_i32 : i32 to vector<1x256xi32>
    %54 = arith.cmpi slt, %19, %53 : vector<1x256xi32>
    %55 = arith.andi %52, %54 : vector<1x256xi1>
    %c-16_i32 = arith.constant -16 : i32
    %56 = vector.broadcast %c-16_i32 : i32 to vector<1x256xi32>
    %57 = arith.cmpi sge, %19, %56 : vector<1x256xi32>
    %c240_i32 = arith.constant 240 : i32
    %58 = vector.broadcast %c240_i32 : i32 to vector<1x256xi32>
    %59 = arith.cmpi slt, %19, %58 : vector<1x256xi32>
    %60 = arith.andi %57, %59 : vector<1x256xi1>
    %c-32_i32 = arith.constant -32 : i32
    %61 = vector.broadcast %c-32_i32 : i32 to vector<1x256xi32>
    %62 = arith.cmpi sge, %19, %61 : vector<1x256xi32>
    %c224_i32 = arith.constant 224 : i32
    %63 = vector.broadcast %c224_i32 : i32 to vector<1x256xi32>
    %64 = arith.cmpi slt, %19, %63 : vector<1x256xi32>
    %65 = arith.andi %62, %64 : vector<1x256xi1>
    %c-48_i32 = arith.constant -48 : i32
    %66 = vector.broadcast %c-48_i32 : i32 to vector<1x256xi32>
    %67 = arith.cmpi sge, %19, %66 : vector<1x256xi32>
    %c208_i32 = arith.constant 208 : i32
    %68 = vector.broadcast %c208_i32 : i32 to vector<1x256xi32>
    %69 = arith.cmpi slt, %19, %68 : vector<1x256xi32>
    %70 = arith.andi %67, %69 : vector<1x256xi1>
    %c3_i32 = arith.constant 3 : i32
    %71 = vector.broadcast %c3_i32 : i32 to vector<1x256xi32>
    %72 = arith.cmpi sge, %35, %71 : vector<1x256xi32>
    %c19_i32 = arith.constant 19 : i32
    %73 = vector.broadcast %c19_i32 : i32 to vector<1x256xi32>
    %74 = arith.cmpi slt, %35, %73 : vector<1x256xi32>
    %75 = arith.andi %72, %74 : vector<1x256xi1>
    %c2_i32_11 = arith.constant 2 : i32
    %76 = vector.broadcast %c2_i32_11 : i32 to vector<1x256xi32>
    %77 = arith.cmpi sge, %35, %76 : vector<1x256xi32>
    %c18_i32 = arith.constant 18 : i32
    %78 = vector.broadcast %c18_i32 : i32 to vector<1x256xi32>
    %79 = arith.cmpi slt, %35, %78 : vector<1x256xi32>
    %80 = arith.andi %77, %79 : vector<1x256xi1>
    %c1_i32_12 = arith.constant 1 : i32
    %81 = vector.broadcast %c1_i32_12 : i32 to vector<1x256xi32>
    %82 = arith.cmpi sge, %35, %81 : vector<1x256xi32>
    %c17_i32 = arith.constant 17 : i32
    %83 = vector.broadcast %c17_i32 : i32 to vector<1x256xi32>
    %84 = arith.cmpi slt, %35, %83 : vector<1x256xi32>
    %85 = arith.andi %82, %84 : vector<1x256xi1>
    %c0_i32_13 = arith.constant 0 : i32
    %86 = vector.broadcast %c0_i32_13 : i32 to vector<1x256xi32>
    %87 = arith.cmpi sge, %35, %86 : vector<1x256xi32>
    %c16_i32_14 = arith.constant 16 : i32
    %88 = vector.broadcast %c16_i32_14 : i32 to vector<1x256xi32>
    %89 = arith.cmpi slt, %35, %88 : vector<1x256xi32>
    %90 = arith.andi %87, %89 : vector<1x256xi1>
    %c-1_i32 = arith.constant -1 : i32
    %91 = vector.broadcast %c-1_i32 : i32 to vector<1x256xi32>
    %92 = arith.cmpi sge, %35, %91 : vector<1x256xi32>
    %c15_i32 = arith.constant 15 : i32
    %93 = vector.broadcast %c15_i32 : i32 to vector<1x256xi32>
    %94 = arith.cmpi slt, %35, %93 : vector<1x256xi32>
    %95 = arith.andi %92, %94 : vector<1x256xi1>
    %c-2_i32 = arith.constant -2 : i32
    %96 = vector.broadcast %c-2_i32 : i32 to vector<1x256xi32>
    %97 = arith.cmpi sge, %35, %96 : vector<1x256xi32>
    %c14_i32 = arith.constant 14 : i32
    %98 = vector.broadcast %c14_i32 : i32 to vector<1x256xi32>
    %99 = arith.cmpi slt, %35, %98 : vector<1x256xi32>
    %100 = arith.andi %97, %99 : vector<1x256xi1>
    %c-3_i32 = arith.constant -3 : i32
    %101 = vector.broadcast %c-3_i32 : i32 to vector<1x256xi32>
    %102 = arith.cmpi sge, %35, %101 : vector<1x256xi32>
    %c13_i32 = arith.constant 13 : i32
    %103 = vector.broadcast %c13_i32 : i32 to vector<1x256xi32>
    %104 = arith.cmpi slt, %35, %103 : vector<1x256xi32>
    %105 = arith.andi %102, %104 : vector<1x256xi1>
    %cst_15 = arith.constant 0.000000e+00 : f32
    %106 = vector.broadcast %cst_15 : f32 to vector<8x256xf32>
    %107 = arith.andi %40, %75 : vector<1x256xi1>
    %c0_16 = arith.constant 0 : index
    %108 = memref.load %arg2[%c0_16] : memref<98xf32, #tpu.memory_space<smem>>
    %c49 = arith.constant 49 : index
    %109 = memref.load %arg2[%c49] : memref<98xf32, #tpu.memory_space<smem>>
    %110 = vector.broadcast %108 : f32 to vector<8x1xf32>
    %111 = arith.mulf %110, %11 : vector<8x1xf32>
    %112 = vector.broadcast %109 : f32 to vector<8x1xf32>
    %113 = arith.mulf %112, %18 : vector<8x1xf32>
    %114 = arith.addf %111, %113 : vector<8x1xf32>
    %c51_i32 = arith.constant 51 : i32
    %115 = tpu.dynamic_rotate %6 by %c51_i32 dim 1 : vector<8x256xf32>, i32 -> vector<8x256xf32>
    %116 = vector.broadcast %114 : vector<8x1xf32> to vector<8x256xf32>
    %117 = arith.mulf %115, %116 : vector<8x256xf32>
    %cst_17 = arith.constant 0.000000e+00 : f32
    %118 = vector.shape_cast %107 : vector<1x256xi1> to vector<1x256xi1>
    %119 = vector.broadcast %118 : vector<1x256xi1> to vector<8x256xi1>
    %120 = vector.broadcast %cst_17 : f32 to vector<8x256xf32>
    %121 = arith.select %119, %117, %120 : vector<8x256xi1>, vector<8x256xf32>
    %122 = arith.addf %106, %121 : vector<8x256xf32>
    %123 = arith.andi %40, %80 : vector<1x256xi1>
    %c1 = arith.constant 1 : index
    %124 = memref.load %arg2[%c1] : memref<98xf32, #tpu.memory_space<smem>>
    %c50 = arith.constant 50 : index
    %125 = memref.load %arg2[%c50] : memref<98xf32, #tpu.memory_space<smem>>
    %126 = vector.broadcast %124 : f32 to vector<8x1xf32>
    %127 = arith.mulf %126, %11 : vector<8x1xf32>
    %128 = vector.broadcast %125 : f32 to vector<8x1xf32>
    %129 = arith.mulf %128, %18 : vector<8x1xf32>
    %130 = arith.addf %127, %129 : vector<8x1xf32>
    %c50_i32 = arith.constant 50 : i32
    %131 = tpu.dynamic_rotate %6 by %c50_i32 dim 1 : vector<8x256xf32>, i32 -> vector<8x256xf32>
    %132 = vector.broadcast %130 : vector<8x1xf32> to vector<8x256xf32>
    %133 = arith.mulf %131, %132 : vector<8x256xf32>
    %cst_18 = arith.constant 0.000000e+00 : f32
    %134 = vector.shape_cast %123 : vector<1x256xi1> to vector<1x256xi1>
    %135 = vector.broadcast %134 : vector<1x256xi1> to vector<8x256xi1>
    %136 = vector.broadcast %cst_18 : f32 to vector<8x256xf32>
    %137 = arith.select %135, %133, %136 : vector<8x256xi1>, vector<8x256xf32>
    %138 = arith.addf %122, %137 : vector<8x256xf32>
    %139 = arith.andi %40, %85 : vector<1x256xi1>
    %c2 = arith.constant 2 : index
    %140 = memref.load %arg2[%c2] : memref<98xf32, #tpu.memory_space<smem>>
    %c51 = arith.constant 51 : index
    %141 = memref.load %arg2[%c51] : memref<98xf32, #tpu.memory_space<smem>>
    %142 = vector.broadcast %140 : f32 to vector<8x1xf32>
    %143 = arith.mulf %142, %11 : vector<8x1xf32>
    %144 = vector.broadcast %141 : f32 to vector<8x1xf32>
    %145 = arith.mulf %144, %18 : vector<8x1xf32>
    %146 = arith.addf %143, %145 : vector<8x1xf32>
    %c49_i32 = arith.constant 49 : i32
    %147 = tpu.dynamic_rotate %6 by %c49_i32 dim 1 : vector<8x256xf32>, i32 -> vector<8x256xf32>
    %148 = vector.broadcast %146 : vector<8x1xf32> to vector<8x256xf32>
    %149 = arith.mulf %147, %148 : vector<8x256xf32>
    %cst_19 = arith.constant 0.000000e+00 : f32
    %150 = vector.shape_cast %139 : vector<1x256xi1> to vector<1x256xi1>
    %151 = vector.broadcast %150 : vector<1x256xi1> to vector<8x256xi1>
    %152 = vector.broadcast %cst_19 : f32 to vector<8x256xf32>
    %153 = arith.select %151, %149, %152 : vector<8x256xi1>, vector<8x256xf32>
    %154 = arith.addf %138, %153 : vector<8x256xf32>
    %155 = arith.andi %40, %90 : vector<1x256xi1>
    %c3 = arith.constant 3 : index
    %156 = memref.load %arg2[%c3] : memref<98xf32, #tpu.memory_space<smem>>
    %c52 = arith.constant 52 : index
    %157 = memref.load %arg2[%c52] : memref<98xf32, #tpu.memory_space<smem>>
    %158 = vector.broadcast %156 : f32 to vector<8x1xf32>
    %159 = arith.mulf %158, %11 : vector<8x1xf32>
    %160 = vector.broadcast %157 : f32 to vector<8x1xf32>
    %161 = arith.mulf %160, %18 : vector<8x1xf32>
    %162 = arith.addf %159, %161 : vector<8x1xf32>
    %c48_i32_20 = arith.constant 48 : i32
    %163 = tpu.dynamic_rotate %6 by %c48_i32_20 dim 1 : vector<8x256xf32>, i32 -> vector<8x256xf32>
    %164 = vector.broadcast %162 : vector<8x1xf32> to vector<8x256xf32>
    %165 = arith.mulf %163, %164 : vector<8x256xf32>
    %cst_21 = arith.constant 0.000000e+00 : f32
    %166 = vector.shape_cast %155 : vector<1x256xi1> to vector<1x256xi1>
    %167 = vector.broadcast %166 : vector<1x256xi1> to vector<8x256xi1>
    %168 = vector.broadcast %cst_21 : f32 to vector<8x256xf32>
    %169 = arith.select %167, %165, %168 : vector<8x256xi1>, vector<8x256xf32>
    %170 = arith.addf %154, %169 : vector<8x256xf32>
    %171 = arith.andi %40, %95 : vector<1x256xi1>
    %c4 = arith.constant 4 : index
    %172 = memref.load %arg2[%c4] : memref<98xf32, #tpu.memory_space<smem>>
    %c53 = arith.constant 53 : index
    %173 = memref.load %arg2[%c53] : memref<98xf32, #tpu.memory_space<smem>>
    %174 = vector.broadcast %172 : f32 to vector<8x1xf32>
    %175 = arith.mulf %174, %11 : vector<8x1xf32>
    %176 = vector.broadcast %173 : f32 to vector<8x1xf32>
    %177 = arith.mulf %176, %18 : vector<8x1xf32>
    %178 = arith.addf %175, %177 : vector<8x1xf32>
    %c47_i32 = arith.constant 47 : i32
    %179 = tpu.dynamic_rotate %6 by %c47_i32 dim 1 : vector<8x256xf32>, i32 -> vector<8x256xf32>
    %180 = vector.broadcast %178 : vector<8x1xf32> to vector<8x256xf32>
    %181 = arith.mulf %179, %180 : vector<8x256xf32>
    %cst_22 = arith.constant 0.000000e+00 : f32
    %182 = vector.shape_cast %171 : vector<1x256xi1> to vector<1x256xi1>
    %183 = vector.broadcast %182 : vector<1x256xi1> to vector<8x256xi1>
    %184 = vector.broadcast %cst_22 : f32 to vector<8x256xf32>
    %185 = arith.select %183, %181, %184 : vector<8x256xi1>, vector<8x256xf32>
    %186 = arith.addf %170, %185 : vector<8x256xf32>
    %187 = arith.andi %40, %100 : vector<1x256xi1>
    %c5 = arith.constant 5 : index
    %188 = memref.load %arg2[%c5] : memref<98xf32, #tpu.memory_space<smem>>
    %c54 = arith.constant 54 : index
    %189 = memref.load %arg2[%c54] : memref<98xf32, #tpu.memory_space<smem>>
    %190 = vector.broadcast %188 : f32 to vector<8x1xf32>
    %191 = arith.mulf %190, %11 : vector<8x1xf32>
    %192 = vector.broadcast %189 : f32 to vector<8x1xf32>
    %193 = arith.mulf %192, %18 : vector<8x1xf32>
    %194 = arith.addf %191, %193 : vector<8x1xf32>
    %c46_i32 = arith.constant 46 : i32
    %195 = tpu.dynamic_rotate %6 by %c46_i32 dim 1 : vector<8x256xf32>, i32 -> vector<8x256xf32>
    %196 = vector.broadcast %194 : vector<8x1xf32> to vector<8x256xf32>
    %197 = arith.mulf %195, %196 : vector<8x256xf32>
    %cst_23 = arith.constant 0.000000e+00 : f32
    %198 = vector.shape_cast %187 : vector<1x256xi1> to vector<1x256xi1>
    %199 = vector.broadcast %198 : vector<1x256xi1> to vector<8x256xi1>
    %200 = vector.broadcast %cst_23 : f32 to vector<8x256xf32>
    %201 = arith.select %199, %197, %200 : vector<8x256xi1>, vector<8x256xf32>
    %202 = arith.addf %186, %201 : vector<8x256xf32>
    %203 = arith.andi %40, %105 : vector<1x256xi1>
    %c6 = arith.constant 6 : index
    %204 = memref.load %arg2[%c6] : memref<98xf32, #tpu.memory_space<smem>>
    %c55 = arith.constant 55 : index
    %205 = memref.load %arg2[%c55] : memref<98xf32, #tpu.memory_space<smem>>
    %206 = vector.broadcast %204 : f32 to vector<8x1xf32>
    %207 = arith.mulf %206, %11 : vector<8x1xf32>
    %208 = vector.broadcast %205 : f32 to vector<8x1xf32>
    %209 = arith.mulf %208, %18 : vector<8x1xf32>
    %210 = arith.addf %207, %209 : vector<8x1xf32>
    %c45_i32 = arith.constant 45 : i32
    %211 = tpu.dynamic_rotate %6 by %c45_i32 dim 1 : vector<8x256xf32>, i32 -> vector<8x256xf32>
    %212 = vector.broadcast %210 : vector<8x1xf32> to vector<8x256xf32>
    %213 = arith.mulf %211, %212 : vector<8x256xf32>
    %cst_24 = arith.constant 0.000000e+00 : f32
    %214 = vector.shape_cast %203 : vector<1x256xi1> to vector<1x256xi1>
    %215 = vector.broadcast %214 : vector<1x256xi1> to vector<8x256xi1>
    %216 = vector.broadcast %cst_24 : f32 to vector<8x256xf32>
    %217 = arith.select %215, %213, %216 : vector<8x256xi1>, vector<8x256xf32>
    %218 = arith.addf %202, %217 : vector<8x256xf32>
    %219 = arith.andi %45, %75 : vector<1x256xi1>
    %c7 = arith.constant 7 : index
    %220 = memref.load %arg2[%c7] : memref<98xf32, #tpu.memory_space<smem>>
    %c56 = arith.constant 56 : index
    %221 = memref.load %arg2[%c56] : memref<98xf32, #tpu.memory_space<smem>>
    %222 = vector.broadcast %220 : f32 to vector<8x1xf32>
    %223 = arith.mulf %222, %11 : vector<8x1xf32>
    %224 = vector.broadcast %221 : f32 to vector<8x1xf32>
    %225 = arith.mulf %224, %18 : vector<8x1xf32>
    %226 = arith.addf %223, %225 : vector<8x1xf32>
    %c35_i32 = arith.constant 35 : i32
    %227 = tpu.dynamic_rotate %6 by %c35_i32 dim 1 : vector<8x256xf32>, i32 -> vector<8x256xf32>
    %228 = vector.broadcast %226 : vector<8x1xf32> to vector<8x256xf32>
    %229 = arith.mulf %227, %228 : vector<8x256xf32>
    %cst_25 = arith.constant 0.000000e+00 : f32
    %230 = vector.shape_cast %219 : vector<1x256xi1> to vector<1x256xi1>
    %231 = vector.broadcast %230 : vector<1x256xi1> to vector<8x256xi1>
    %232 = vector.broadcast %cst_25 : f32 to vector<8x256xf32>
    %233 = arith.select %231, %229, %232 : vector<8x256xi1>, vector<8x256xf32>
    %234 = arith.addf %218, %233 : vector<8x256xf32>
    %235 = arith.andi %45, %80 : vector<1x256xi1>
    %c8 = arith.constant 8 : index
    %236 = memref.load %arg2[%c8] : memref<98xf32, #tpu.memory_space<smem>>
    %c57 = arith.constant 57 : index
    %237 = memref.load %arg2[%c57] : memref<98xf32, #tpu.memory_space<smem>>
    %238 = vector.broadcast %236 : f32 to vector<8x1xf32>
    %239 = arith.mulf %238, %11 : vector<8x1xf32>
    %240 = vector.broadcast %237 : f32 to vector<8x1xf32>
    %241 = arith.mulf %240, %18 : vector<8x1xf32>
    %242 = arith.addf %239, %241 : vector<8x1xf32>
    %c34_i32 = arith.constant 34 : i32
    %243 = tpu.dynamic_rotate %6 by %c34_i32 dim 1 : vector<8x256xf32>, i32 -> vector<8x256xf32>
    %244 = vector.broadcast %242 : vector<8x1xf32> to vector<8x256xf32>
    %245 = arith.mulf %243, %244 : vector<8x256xf32>
    %cst_26 = arith.constant 0.000000e+00 : f32
    %246 = vector.shape_cast %235 : vector<1x256xi1> to vector<1x256xi1>
    %247 = vector.broadcast %246 : vector<1x256xi1> to vector<8x256xi1>
    %248 = vector.broadcast %cst_26 : f32 to vector<8x256xf32>
    %249 = arith.select %247, %245, %248 : vector<8x256xi1>, vector<8x256xf32>
    %250 = arith.addf %234, %249 : vector<8x256xf32>
    %251 = arith.andi %45, %85 : vector<1x256xi1>
    %c9 = arith.constant 9 : index
    %252 = memref.load %arg2[%c9] : memref<98xf32, #tpu.memory_space<smem>>
    %c58 = arith.constant 58 : index
    %253 = memref.load %arg2[%c58] : memref<98xf32, #tpu.memory_space<smem>>
    %254 = vector.broadcast %252 : f32 to vector<8x1xf32>
    %255 = arith.mulf %254, %11 : vector<8x1xf32>
    %256 = vector.broadcast %253 : f32 to vector<8x1xf32>
    %257 = arith.mulf %256, %18 : vector<8x1xf32>
    %258 = arith.addf %255, %257 : vector<8x1xf32>
    %c33_i32 = arith.constant 33 : i32
    %259 = tpu.dynamic_rotate %6 by %c33_i32 dim 1 : vector<8x256xf32>, i32 -> vector<8x256xf32>
    %260 = vector.broadcast %258 : vector<8x1xf32> to vector<8x256xf32>
    %261 = arith.mulf %259, %260 : vector<8x256xf32>
    %cst_27 = arith.constant 0.000000e+00 : f32
    %262 = vector.shape_cast %251 : vector<1x256xi1> to vector<1x256xi1>
    %263 = vector.broadcast %262 : vector<1x256xi1> to vector<8x256xi1>
    %264 = vector.broadcast %cst_27 : f32 to vector<8x256xf32>
    %265 = arith.select %263, %261, %264 : vector<8x256xi1>, vector<8x256xf32>
    %266 = arith.addf %250, %265 : vector<8x256xf32>
    %267 = arith.andi %45, %90 : vector<1x256xi1>
    %c10 = arith.constant 10 : index
    %268 = memref.load %arg2[%c10] : memref<98xf32, #tpu.memory_space<smem>>
    %c59 = arith.constant 59 : index
    %269 = memref.load %arg2[%c59] : memref<98xf32, #tpu.memory_space<smem>>
    %270 = vector.broadcast %268 : f32 to vector<8x1xf32>
    %271 = arith.mulf %270, %11 : vector<8x1xf32>
    %272 = vector.broadcast %269 : f32 to vector<8x1xf32>
    %273 = arith.mulf %272, %18 : vector<8x1xf32>
    %274 = arith.addf %271, %273 : vector<8x1xf32>
    %c32_i32_28 = arith.constant 32 : i32
    %275 = tpu.dynamic_rotate %6 by %c32_i32_28 dim 1 : vector<8x256xf32>, i32 -> vector<8x256xf32>
    %276 = vector.broadcast %274 : vector<8x1xf32> to vector<8x256xf32>
    %277 = arith.mulf %275, %276 : vector<8x256xf32>
    %cst_29 = arith.constant 0.000000e+00 : f32
    %278 = vector.shape_cast %267 : vector<1x256xi1> to vector<1x256xi1>
    %279 = vector.broadcast %278 : vector<1x256xi1> to vector<8x256xi1>
    %280 = vector.broadcast %cst_29 : f32 to vector<8x256xf32>
    %281 = arith.select %279, %277, %280 : vector<8x256xi1>, vector<8x256xf32>
    %282 = arith.addf %266, %281 : vector<8x256xf32>
    %283 = arith.andi %45, %95 : vector<1x256xi1>
    %c11 = arith.constant 11 : index
    %284 = memref.load %arg2[%c11] : memref<98xf32, #tpu.memory_space<smem>>
    %c60 = arith.constant 60 : index
    %285 = memref.load %arg2[%c60] : memref<98xf32, #tpu.memory_space<smem>>
    %286 = vector.broadcast %284 : f32 to vector<8x1xf32>
    %287 = arith.mulf %286, %11 : vector<8x1xf32>
    %288 = vector.broadcast %285 : f32 to vector<8x1xf32>
    %289 = arith.mulf %288, %18 : vector<8x1xf32>
    %290 = arith.addf %287, %289 : vector<8x1xf32>
    %c31_i32 = arith.constant 31 : i32
    %291 = tpu.dynamic_rotate %6 by %c31_i32 dim 1 : vector<8x256xf32>, i32 -> vector<8x256xf32>
    %292 = vector.broadcast %290 : vector<8x1xf32> to vector<8x256xf32>
    %293 = arith.mulf %291, %292 : vector<8x256xf32>
    %cst_30 = arith.constant 0.000000e+00 : f32
    %294 = vector.shape_cast %283 : vector<1x256xi1> to vector<1x256xi1>
    %295 = vector.broadcast %294 : vector<1x256xi1> to vector<8x256xi1>
    %296 = vector.broadcast %cst_30 : f32 to vector<8x256xf32>
    %297 = arith.select %295, %293, %296 : vector<8x256xi1>, vector<8x256xf32>
    %298 = arith.addf %282, %297 : vector<8x256xf32>
    %299 = arith.andi %45, %100 : vector<1x256xi1>
    %c12 = arith.constant 12 : index
    %300 = memref.load %arg2[%c12] : memref<98xf32, #tpu.memory_space<smem>>
    %c61 = arith.constant 61 : index
    %301 = memref.load %arg2[%c61] : memref<98xf32, #tpu.memory_space<smem>>
    %302 = vector.broadcast %300 : f32 to vector<8x1xf32>
    %303 = arith.mulf %302, %11 : vector<8x1xf32>
    %304 = vector.broadcast %301 : f32 to vector<8x1xf32>
    %305 = arith.mulf %304, %18 : vector<8x1xf32>
    %306 = arith.addf %303, %305 : vector<8x1xf32>
    %c30_i32 = arith.constant 30 : i32
    %307 = tpu.dynamic_rotate %6 by %c30_i32 dim 1 : vector<8x256xf32>, i32 -> vector<8x256xf32>
    %308 = vector.broadcast %306 : vector<8x1xf32> to vector<8x256xf32>
    %309 = arith.mulf %307, %308 : vector<8x256xf32>
    %cst_31 = arith.constant 0.000000e+00 : f32
    %310 = vector.shape_cast %299 : vector<1x256xi1> to vector<1x256xi1>
    %311 = vector.broadcast %310 : vector<1x256xi1> to vector<8x256xi1>
    %312 = vector.broadcast %cst_31 : f32 to vector<8x256xf32>
    %313 = arith.select %311, %309, %312 : vector<8x256xi1>, vector<8x256xf32>
    %314 = arith.addf %298, %313 : vector<8x256xf32>
    %315 = arith.andi %45, %105 : vector<1x256xi1>
    %c13 = arith.constant 13 : index
    %316 = memref.load %arg2[%c13] : memref<98xf32, #tpu.memory_space<smem>>
    %c62 = arith.constant 62 : index
    %317 = memref.load %arg2[%c62] : memref<98xf32, #tpu.memory_space<smem>>
    %318 = vector.broadcast %316 : f32 to vector<8x1xf32>
    %319 = arith.mulf %318, %11 : vector<8x1xf32>
    %320 = vector.broadcast %317 : f32 to vector<8x1xf32>
    %321 = arith.mulf %320, %18 : vector<8x1xf32>
    %322 = arith.addf %319, %321 : vector<8x1xf32>
    %c29_i32 = arith.constant 29 : i32
    %323 = tpu.dynamic_rotate %6 by %c29_i32 dim 1 : vector<8x256xf32>, i32 -> vector<8x256xf32>
    %324 = vector.broadcast %322 : vector<8x1xf32> to vector<8x256xf32>
    %325 = arith.mulf %323, %324 : vector<8x256xf32>
    %cst_32 = arith.constant 0.000000e+00 : f32
    %326 = vector.shape_cast %315 : vector<1x256xi1> to vector<1x256xi1>
    %327 = vector.broadcast %326 : vector<1x256xi1> to vector<8x256xi1>
    %328 = vector.broadcast %cst_32 : f32 to vector<8x256xf32>
    %329 = arith.select %327, %325, %328 : vector<8x256xi1>, vector<8x256xf32>
    %330 = arith.addf %314, %329 : vector<8x256xf32>
    %331 = arith.andi %50, %75 : vector<1x256xi1>
    %c14 = arith.constant 14 : index
    %332 = memref.load %arg2[%c14] : memref<98xf32, #tpu.memory_space<smem>>
    %c63 = arith.constant 63 : index
    %333 = memref.load %arg2[%c63] : memref<98xf32, #tpu.memory_space<smem>>
    %334 = vector.broadcast %332 : f32 to vector<8x1xf32>
    %335 = arith.mulf %334, %11 : vector<8x1xf32>
    %336 = vector.broadcast %333 : f32 to vector<8x1xf32>
    %337 = arith.mulf %336, %18 : vector<8x1xf32>
    %338 = arith.addf %335, %337 : vector<8x1xf32>
    %c19_i32_33 = arith.constant 19 : i32
    %339 = tpu.dynamic_rotate %6 by %c19_i32_33 dim 1 : vector<8x256xf32>, i32 -> vector<8x256xf32>
    %340 = vector.broadcast %338 : vector<8x1xf32> to vector<8x256xf32>
    %341 = arith.mulf %339, %340 : vector<8x256xf32>
    %cst_34 = arith.constant 0.000000e+00 : f32
    %342 = vector.shape_cast %331 : vector<1x256xi1> to vector<1x256xi1>
    %343 = vector.broadcast %342 : vector<1x256xi1> to vector<8x256xi1>
    %344 = vector.broadcast %cst_34 : f32 to vector<8x256xf32>
    %345 = arith.select %343, %341, %344 : vector<8x256xi1>, vector<8x256xf32>
    %346 = arith.addf %330, %345 : vector<8x256xf32>
    %347 = arith.andi %50, %80 : vector<1x256xi1>
    %c15 = arith.constant 15 : index
    %348 = memref.load %arg2[%c15] : memref<98xf32, #tpu.memory_space<smem>>
    %c64 = arith.constant 64 : index
    %349 = memref.load %arg2[%c64] : memref<98xf32, #tpu.memory_space<smem>>
    %350 = vector.broadcast %348 : f32 to vector<8x1xf32>
    %351 = arith.mulf %350, %11 : vector<8x1xf32>
    %352 = vector.broadcast %349 : f32 to vector<8x1xf32>
    %353 = arith.mulf %352, %18 : vector<8x1xf32>
    %354 = arith.addf %351, %353 : vector<8x1xf32>
    %c18_i32_35 = arith.constant 18 : i32
    %355 = tpu.dynamic_rotate %6 by %c18_i32_35 dim 1 : vector<8x256xf32>, i32 -> vector<8x256xf32>
    %356 = vector.broadcast %354 : vector<8x1xf32> to vector<8x256xf32>
    %357 = arith.mulf %355, %356 : vector<8x256xf32>
    %cst_36 = arith.constant 0.000000e+00 : f32
    %358 = vector.shape_cast %347 : vector<1x256xi1> to vector<1x256xi1>
    %359 = vector.broadcast %358 : vector<1x256xi1> to vector<8x256xi1>
    %360 = vector.broadcast %cst_36 : f32 to vector<8x256xf32>
    %361 = arith.select %359, %357, %360 : vector<8x256xi1>, vector<8x256xf32>
    %362 = arith.addf %346, %361 : vector<8x256xf32>
    %363 = arith.andi %50, %85 : vector<1x256xi1>
    %c16 = arith.constant 16 : index
    %364 = memref.load %arg2[%c16] : memref<98xf32, #tpu.memory_space<smem>>
    %c65 = arith.constant 65 : index
    %365 = memref.load %arg2[%c65] : memref<98xf32, #tpu.memory_space<smem>>
    %366 = vector.broadcast %364 : f32 to vector<8x1xf32>
    %367 = arith.mulf %366, %11 : vector<8x1xf32>
    %368 = vector.broadcast %365 : f32 to vector<8x1xf32>
    %369 = arith.mulf %368, %18 : vector<8x1xf32>
    %370 = arith.addf %367, %369 : vector<8x1xf32>
    %c17_i32_37 = arith.constant 17 : i32
    %371 = tpu.dynamic_rotate %6 by %c17_i32_37 dim 1 : vector<8x256xf32>, i32 -> vector<8x256xf32>
    %372 = vector.broadcast %370 : vector<8x1xf32> to vector<8x256xf32>
    %373 = arith.mulf %371, %372 : vector<8x256xf32>
    %cst_38 = arith.constant 0.000000e+00 : f32
    %374 = vector.shape_cast %363 : vector<1x256xi1> to vector<1x256xi1>
    %375 = vector.broadcast %374 : vector<1x256xi1> to vector<8x256xi1>
    %376 = vector.broadcast %cst_38 : f32 to vector<8x256xf32>
    %377 = arith.select %375, %373, %376 : vector<8x256xi1>, vector<8x256xf32>
    %378 = arith.addf %362, %377 : vector<8x256xf32>
    %379 = arith.andi %50, %90 : vector<1x256xi1>
    %c17 = arith.constant 17 : index
    %380 = memref.load %arg2[%c17] : memref<98xf32, #tpu.memory_space<smem>>
    %c66 = arith.constant 66 : index
    %381 = memref.load %arg2[%c66] : memref<98xf32, #tpu.memory_space<smem>>
    %382 = vector.broadcast %380 : f32 to vector<8x1xf32>
    %383 = arith.mulf %382, %11 : vector<8x1xf32>
    %384 = vector.broadcast %381 : f32 to vector<8x1xf32>
    %385 = arith.mulf %384, %18 : vector<8x1xf32>
    %386 = arith.addf %383, %385 : vector<8x1xf32>
    %c16_i32_39 = arith.constant 16 : i32
    %387 = tpu.dynamic_rotate %6 by %c16_i32_39 dim 1 : vector<8x256xf32>, i32 -> vector<8x256xf32>
    %388 = vector.broadcast %386 : vector<8x1xf32> to vector<8x256xf32>
    %389 = arith.mulf %387, %388 : vector<8x256xf32>
    %cst_40 = arith.constant 0.000000e+00 : f32
    %390 = vector.shape_cast %379 : vector<1x256xi1> to vector<1x256xi1>
    %391 = vector.broadcast %390 : vector<1x256xi1> to vector<8x256xi1>
    %392 = vector.broadcast %cst_40 : f32 to vector<8x256xf32>
    %393 = arith.select %391, %389, %392 : vector<8x256xi1>, vector<8x256xf32>
    %394 = arith.addf %378, %393 : vector<8x256xf32>
    %395 = arith.andi %50, %95 : vector<1x256xi1>
    %c18 = arith.constant 18 : index
    %396 = memref.load %arg2[%c18] : memref<98xf32, #tpu.memory_space<smem>>
    %c67 = arith.constant 67 : index
    %397 = memref.load %arg2[%c67] : memref<98xf32, #tpu.memory_space<smem>>
    %398 = vector.broadcast %396 : f32 to vector<8x1xf32>
    %399 = arith.mulf %398, %11 : vector<8x1xf32>
    %400 = vector.broadcast %397 : f32 to vector<8x1xf32>
    %401 = arith.mulf %400, %18 : vector<8x1xf32>
    %402 = arith.addf %399, %401 : vector<8x1xf32>
    %c15_i32_41 = arith.constant 15 : i32
    %403 = tpu.dynamic_rotate %6 by %c15_i32_41 dim 1 : vector<8x256xf32>, i32 -> vector<8x256xf32>
    %404 = vector.broadcast %402 : vector<8x1xf32> to vector<8x256xf32>
    %405 = arith.mulf %403, %404 : vector<8x256xf32>
    %cst_42 = arith.constant 0.000000e+00 : f32
    %406 = vector.shape_cast %395 : vector<1x256xi1> to vector<1x256xi1>
    %407 = vector.broadcast %406 : vector<1x256xi1> to vector<8x256xi1>
    %408 = vector.broadcast %cst_42 : f32 to vector<8x256xf32>
    %409 = arith.select %407, %405, %408 : vector<8x256xi1>, vector<8x256xf32>
    %410 = arith.addf %394, %409 : vector<8x256xf32>
    %411 = arith.andi %50, %100 : vector<1x256xi1>
    %c19 = arith.constant 19 : index
    %412 = memref.load %arg2[%c19] : memref<98xf32, #tpu.memory_space<smem>>
    %c68 = arith.constant 68 : index
    %413 = memref.load %arg2[%c68] : memref<98xf32, #tpu.memory_space<smem>>
    %414 = vector.broadcast %412 : f32 to vector<8x1xf32>
    %415 = arith.mulf %414, %11 : vector<8x1xf32>
    %416 = vector.broadcast %413 : f32 to vector<8x1xf32>
    %417 = arith.mulf %416, %18 : vector<8x1xf32>
    %418 = arith.addf %415, %417 : vector<8x1xf32>
    %c14_i32_43 = arith.constant 14 : i32
    %419 = tpu.dynamic_rotate %6 by %c14_i32_43 dim 1 : vector<8x256xf32>, i32 -> vector<8x256xf32>
    %420 = vector.broadcast %418 : vector<8x1xf32> to vector<8x256xf32>
    %421 = arith.mulf %419, %420 : vector<8x256xf32>
    %cst_44 = arith.constant 0.000000e+00 : f32
    %422 = vector.shape_cast %411 : vector<1x256xi1> to vector<1x256xi1>
    %423 = vector.broadcast %422 : vector<1x256xi1> to vector<8x256xi1>
    %424 = vector.broadcast %cst_44 : f32 to vector<8x256xf32>
    %425 = arith.select %423, %421, %424 : vector<8x256xi1>, vector<8x256xf32>
    %426 = arith.addf %410, %425 : vector<8x256xf32>
    %427 = arith.andi %50, %105 : vector<1x256xi1>
    %c20 = arith.constant 20 : index
    %428 = memref.load %arg2[%c20] : memref<98xf32, #tpu.memory_space<smem>>
    %c69 = arith.constant 69 : index
    %429 = memref.load %arg2[%c69] : memref<98xf32, #tpu.memory_space<smem>>
    %430 = vector.broadcast %428 : f32 to vector<8x1xf32>
    %431 = arith.mulf %430, %11 : vector<8x1xf32>
    %432 = vector.broadcast %429 : f32 to vector<8x1xf32>
    %433 = arith.mulf %432, %18 : vector<8x1xf32>
    %434 = arith.addf %431, %433 : vector<8x1xf32>
    %c13_i32_45 = arith.constant 13 : i32
    %435 = tpu.dynamic_rotate %6 by %c13_i32_45 dim 1 : vector<8x256xf32>, i32 -> vector<8x256xf32>
    %436 = vector.broadcast %434 : vector<8x1xf32> to vector<8x256xf32>
    %437 = arith.mulf %435, %436 : vector<8x256xf32>
    %cst_46 = arith.constant 0.000000e+00 : f32
    %438 = vector.shape_cast %427 : vector<1x256xi1> to vector<1x256xi1>
    %439 = vector.broadcast %438 : vector<1x256xi1> to vector<8x256xi1>
    %440 = vector.broadcast %cst_46 : f32 to vector<8x256xf32>
    %441 = arith.select %439, %437, %440 : vector<8x256xi1>, vector<8x256xf32>
    %442 = arith.addf %426, %441 : vector<8x256xf32>
    %443 = arith.andi %55, %75 : vector<1x256xi1>
    %c21 = arith.constant 21 : index
    %444 = memref.load %arg2[%c21] : memref<98xf32, #tpu.memory_space<smem>>
    %c70 = arith.constant 70 : index
    %445 = memref.load %arg2[%c70] : memref<98xf32, #tpu.memory_space<smem>>
    %446 = vector.broadcast %444 : f32 to vector<8x1xf32>
    %447 = arith.mulf %446, %11 : vector<8x1xf32>
    %448 = vector.broadcast %445 : f32 to vector<8x1xf32>
    %449 = arith.mulf %448, %18 : vector<8x1xf32>
    %450 = arith.addf %447, %449 : vector<8x1xf32>
    %c3_i32_47 = arith.constant 3 : i32
    %451 = tpu.dynamic_rotate %6 by %c3_i32_47 dim 1 : vector<8x256xf32>, i32 -> vector<8x256xf32>
    %452 = vector.broadcast %450 : vector<8x1xf32> to vector<8x256xf32>
    %453 = arith.mulf %451, %452 : vector<8x256xf32>
    %cst_48 = arith.constant 0.000000e+00 : f32
    %454 = vector.shape_cast %443 : vector<1x256xi1> to vector<1x256xi1>
    %455 = vector.broadcast %454 : vector<1x256xi1> to vector<8x256xi1>
    %456 = vector.broadcast %cst_48 : f32 to vector<8x256xf32>
    %457 = arith.select %455, %453, %456 : vector<8x256xi1>, vector<8x256xf32>
    %458 = arith.addf %442, %457 : vector<8x256xf32>
    %459 = arith.andi %55, %80 : vector<1x256xi1>
    %c22 = arith.constant 22 : index
    %460 = memref.load %arg2[%c22] : memref<98xf32, #tpu.memory_space<smem>>
    %c71 = arith.constant 71 : index
    %461 = memref.load %arg2[%c71] : memref<98xf32, #tpu.memory_space<smem>>
    %462 = vector.broadcast %460 : f32 to vector<8x1xf32>
    %463 = arith.mulf %462, %11 : vector<8x1xf32>
    %464 = vector.broadcast %461 : f32 to vector<8x1xf32>
    %465 = arith.mulf %464, %18 : vector<8x1xf32>
    %466 = arith.addf %463, %465 : vector<8x1xf32>
    %c2_i32_49 = arith.constant 2 : i32
    %467 = tpu.dynamic_rotate %6 by %c2_i32_49 dim 1 : vector<8x256xf32>, i32 -> vector<8x256xf32>
    %468 = vector.broadcast %466 : vector<8x1xf32> to vector<8x256xf32>
    %469 = arith.mulf %467, %468 : vector<8x256xf32>
    %cst_50 = arith.constant 0.000000e+00 : f32
    %470 = vector.shape_cast %459 : vector<1x256xi1> to vector<1x256xi1>
    %471 = vector.broadcast %470 : vector<1x256xi1> to vector<8x256xi1>
    %472 = vector.broadcast %cst_50 : f32 to vector<8x256xf32>
    %473 = arith.select %471, %469, %472 : vector<8x256xi1>, vector<8x256xf32>
    %474 = arith.addf %458, %473 : vector<8x256xf32>
    %475 = arith.andi %55, %85 : vector<1x256xi1>
    %c23 = arith.constant 23 : index
    %476 = memref.load %arg2[%c23] : memref<98xf32, #tpu.memory_space<smem>>
    %c72 = arith.constant 72 : index
    %477 = memref.load %arg2[%c72] : memref<98xf32, #tpu.memory_space<smem>>
    %478 = vector.broadcast %476 : f32 to vector<8x1xf32>
    %479 = arith.mulf %478, %11 : vector<8x1xf32>
    %480 = vector.broadcast %477 : f32 to vector<8x1xf32>
    %481 = arith.mulf %480, %18 : vector<8x1xf32>
    %482 = arith.addf %479, %481 : vector<8x1xf32>
    %c1_i32_51 = arith.constant 1 : i32
    %483 = tpu.dynamic_rotate %6 by %c1_i32_51 dim 1 : vector<8x256xf32>, i32 -> vector<8x256xf32>
    %484 = vector.broadcast %482 : vector<8x1xf32> to vector<8x256xf32>
    %485 = arith.mulf %483, %484 : vector<8x256xf32>
    %cst_52 = arith.constant 0.000000e+00 : f32
    %486 = vector.shape_cast %475 : vector<1x256xi1> to vector<1x256xi1>
    %487 = vector.broadcast %486 : vector<1x256xi1> to vector<8x256xi1>
    %488 = vector.broadcast %cst_52 : f32 to vector<8x256xf32>
    %489 = arith.select %487, %485, %488 : vector<8x256xi1>, vector<8x256xf32>
    %490 = arith.addf %474, %489 : vector<8x256xf32>
    %491 = arith.andi %55, %90 : vector<1x256xi1>
    %c24 = arith.constant 24 : index
    %492 = memref.load %arg2[%c24] : memref<98xf32, #tpu.memory_space<smem>>
    %c73 = arith.constant 73 : index
    %493 = memref.load %arg2[%c73] : memref<98xf32, #tpu.memory_space<smem>>
    %494 = vector.broadcast %492 : f32 to vector<8x1xf32>
    %495 = arith.mulf %494, %11 : vector<8x1xf32>
    %496 = vector.broadcast %493 : f32 to vector<8x1xf32>
    %497 = arith.mulf %496, %18 : vector<8x1xf32>
    %498 = arith.addf %495, %497 : vector<8x1xf32>
    %499 = vector.broadcast %498 : vector<8x1xf32> to vector<8x256xf32>
    %500 = arith.mulf %6, %499 : vector<8x256xf32>
    %cst_53 = arith.constant 0.000000e+00 : f32
    %501 = vector.shape_cast %491 : vector<1x256xi1> to vector<1x256xi1>
    %502 = vector.broadcast %501 : vector<1x256xi1> to vector<8x256xi1>
    %503 = vector.broadcast %cst_53 : f32 to vector<8x256xf32>
    %504 = arith.select %502, %500, %503 : vector<8x256xi1>, vector<8x256xf32>
    %505 = arith.addf %490, %504 : vector<8x256xf32>
    %506 = arith.andi %55, %95 : vector<1x256xi1>
    %c25 = arith.constant 25 : index
    %507 = memref.load %arg2[%c25] : memref<98xf32, #tpu.memory_space<smem>>
    %c74 = arith.constant 74 : index
    %508 = memref.load %arg2[%c74] : memref<98xf32, #tpu.memory_space<smem>>
    %509 = vector.broadcast %507 : f32 to vector<8x1xf32>
    %510 = arith.mulf %509, %11 : vector<8x1xf32>
    %511 = vector.broadcast %508 : f32 to vector<8x1xf32>
    %512 = arith.mulf %511, %18 : vector<8x1xf32>
    %513 = arith.addf %510, %512 : vector<8x1xf32>
    %c255_i32 = arith.constant 255 : i32
    %514 = tpu.dynamic_rotate %6 by %c255_i32 dim 1 : vector<8x256xf32>, i32 -> vector<8x256xf32>
    %515 = vector.broadcast %513 : vector<8x1xf32> to vector<8x256xf32>
    %516 = arith.mulf %514, %515 : vector<8x256xf32>
    %cst_54 = arith.constant 0.000000e+00 : f32
    %517 = vector.shape_cast %506 : vector<1x256xi1> to vector<1x256xi1>
    %518 = vector.broadcast %517 : vector<1x256xi1> to vector<8x256xi1>
    %519 = vector.broadcast %cst_54 : f32 to vector<8x256xf32>
    %520 = arith.select %518, %516, %519 : vector<8x256xi1>, vector<8x256xf32>
    %521 = arith.addf %505, %520 : vector<8x256xf32>
    %522 = arith.andi %55, %100 : vector<1x256xi1>
    %c26 = arith.constant 26 : index
    %523 = memref.load %arg2[%c26] : memref<98xf32, #tpu.memory_space<smem>>
    %c75 = arith.constant 75 : index
    %524 = memref.load %arg2[%c75] : memref<98xf32, #tpu.memory_space<smem>>
    %525 = vector.broadcast %523 : f32 to vector<8x1xf32>
    %526 = arith.mulf %525, %11 : vector<8x1xf32>
    %527 = vector.broadcast %524 : f32 to vector<8x1xf32>
    %528 = arith.mulf %527, %18 : vector<8x1xf32>
    %529 = arith.addf %526, %528 : vector<8x1xf32>
    %c254_i32 = arith.constant 254 : i32
    %530 = tpu.dynamic_rotate %6 by %c254_i32 dim 1 : vector<8x256xf32>, i32 -> vector<8x256xf32>
    %531 = vector.broadcast %529 : vector<8x1xf32> to vector<8x256xf32>
    %532 = arith.mulf %530, %531 : vector<8x256xf32>
    %cst_55 = arith.constant 0.000000e+00 : f32
    %533 = vector.shape_cast %522 : vector<1x256xi1> to vector<1x256xi1>
    %534 = vector.broadcast %533 : vector<1x256xi1> to vector<8x256xi1>
    %535 = vector.broadcast %cst_55 : f32 to vector<8x256xf32>
    %536 = arith.select %534, %532, %535 : vector<8x256xi1>, vector<8x256xf32>
    %537 = arith.addf %521, %536 : vector<8x256xf32>
    %538 = arith.andi %55, %105 : vector<1x256xi1>
    %c27 = arith.constant 27 : index
    %539 = memref.load %arg2[%c27] : memref<98xf32, #tpu.memory_space<smem>>
    %c76 = arith.constant 76 : index
    %540 = memref.load %arg2[%c76] : memref<98xf32, #tpu.memory_space<smem>>
    %541 = vector.broadcast %539 : f32 to vector<8x1xf32>
    %542 = arith.mulf %541, %11 : vector<8x1xf32>
    %543 = vector.broadcast %540 : f32 to vector<8x1xf32>
    %544 = arith.mulf %543, %18 : vector<8x1xf32>
    %545 = arith.addf %542, %544 : vector<8x1xf32>
    %c253_i32 = arith.constant 253 : i32
    %546 = tpu.dynamic_rotate %6 by %c253_i32 dim 1 : vector<8x256xf32>, i32 -> vector<8x256xf32>
    %547 = vector.broadcast %545 : vector<8x1xf32> to vector<8x256xf32>
    %548 = arith.mulf %546, %547 : vector<8x256xf32>
    %cst_56 = arith.constant 0.000000e+00 : f32
    %549 = vector.shape_cast %538 : vector<1x256xi1> to vector<1x256xi1>
    %550 = vector.broadcast %549 : vector<1x256xi1> to vector<8x256xi1>
    %551 = vector.broadcast %cst_56 : f32 to vector<8x256xf32>
    %552 = arith.select %550, %548, %551 : vector<8x256xi1>, vector<8x256xf32>
    %553 = arith.addf %537, %552 : vector<8x256xf32>
    %554 = arith.andi %60, %75 : vector<1x256xi1>
    %c28 = arith.constant 28 : index
    %555 = memref.load %arg2[%c28] : memref<98xf32, #tpu.memory_space<smem>>
    %c77 = arith.constant 77 : index
    %556 = memref.load %arg2[%c77] : memref<98xf32, #tpu.memory_space<smem>>
    %557 = vector.broadcast %555 : f32 to vector<8x1xf32>
    %558 = arith.mulf %557, %11 : vector<8x1xf32>
    %559 = vector.broadcast %556 : f32 to vector<8x1xf32>
    %560 = arith.mulf %559, %18 : vector<8x1xf32>
    %561 = arith.addf %558, %560 : vector<8x1xf32>
    %c243_i32 = arith.constant 243 : i32
    %562 = tpu.dynamic_rotate %6 by %c243_i32 dim 1 : vector<8x256xf32>, i32 -> vector<8x256xf32>
    %563 = vector.broadcast %561 : vector<8x1xf32> to vector<8x256xf32>
    %564 = arith.mulf %562, %563 : vector<8x256xf32>
    %cst_57 = arith.constant 0.000000e+00 : f32
    %565 = vector.shape_cast %554 : vector<1x256xi1> to vector<1x256xi1>
    %566 = vector.broadcast %565 : vector<1x256xi1> to vector<8x256xi1>
    %567 = vector.broadcast %cst_57 : f32 to vector<8x256xf32>
    %568 = arith.select %566, %564, %567 : vector<8x256xi1>, vector<8x256xf32>
    %569 = arith.addf %553, %568 : vector<8x256xf32>
    %570 = arith.andi %60, %80 : vector<1x256xi1>
    %c29 = arith.constant 29 : index
    %571 = memref.load %arg2[%c29] : memref<98xf32, #tpu.memory_space<smem>>
    %c78 = arith.constant 78 : index
    %572 = memref.load %arg2[%c78] : memref<98xf32, #tpu.memory_space<smem>>
    %573 = vector.broadcast %571 : f32 to vector<8x1xf32>
    %574 = arith.mulf %573, %11 : vector<8x1xf32>
    %575 = vector.broadcast %572 : f32 to vector<8x1xf32>
    %576 = arith.mulf %575, %18 : vector<8x1xf32>
    %577 = arith.addf %574, %576 : vector<8x1xf32>
    %c242_i32 = arith.constant 242 : i32
    %578 = tpu.dynamic_rotate %6 by %c242_i32 dim 1 : vector<8x256xf32>, i32 -> vector<8x256xf32>
    %579 = vector.broadcast %577 : vector<8x1xf32> to vector<8x256xf32>
    %580 = arith.mulf %578, %579 : vector<8x256xf32>
    %cst_58 = arith.constant 0.000000e+00 : f32
    %581 = vector.shape_cast %570 : vector<1x256xi1> to vector<1x256xi1>
    %582 = vector.broadcast %581 : vector<1x256xi1> to vector<8x256xi1>
    %583 = vector.broadcast %cst_58 : f32 to vector<8x256xf32>
    %584 = arith.select %582, %580, %583 : vector<8x256xi1>, vector<8x256xf32>
    %585 = arith.addf %569, %584 : vector<8x256xf32>
    %586 = arith.andi %60, %85 : vector<1x256xi1>
    %c30 = arith.constant 30 : index
    %587 = memref.load %arg2[%c30] : memref<98xf32, #tpu.memory_space<smem>>
    %c79 = arith.constant 79 : index
    %588 = memref.load %arg2[%c79] : memref<98xf32, #tpu.memory_space<smem>>
    %589 = vector.broadcast %587 : f32 to vector<8x1xf32>
    %590 = arith.mulf %589, %11 : vector<8x1xf32>
    %591 = vector.broadcast %588 : f32 to vector<8x1xf32>
    %592 = arith.mulf %591, %18 : vector<8x1xf32>
    %593 = arith.addf %590, %592 : vector<8x1xf32>
    %c241_i32 = arith.constant 241 : i32
    %594 = tpu.dynamic_rotate %6 by %c241_i32 dim 1 : vector<8x256xf32>, i32 -> vector<8x256xf32>
    %595 = vector.broadcast %593 : vector<8x1xf32> to vector<8x256xf32>
    %596 = arith.mulf %594, %595 : vector<8x256xf32>
    %cst_59 = arith.constant 0.000000e+00 : f32
    %597 = vector.shape_cast %586 : vector<1x256xi1> to vector<1x256xi1>
    %598 = vector.broadcast %597 : vector<1x256xi1> to vector<8x256xi1>
    %599 = vector.broadcast %cst_59 : f32 to vector<8x256xf32>
    %600 = arith.select %598, %596, %599 : vector<8x256xi1>, vector<8x256xf32>
    %601 = arith.addf %585, %600 : vector<8x256xf32>
    %602 = arith.andi %60, %90 : vector<1x256xi1>
    %c31 = arith.constant 31 : index
    %603 = memref.load %arg2[%c31] : memref<98xf32, #tpu.memory_space<smem>>
    %c80 = arith.constant 80 : index
    %604 = memref.load %arg2[%c80] : memref<98xf32, #tpu.memory_space<smem>>
    %605 = vector.broadcast %603 : f32 to vector<8x1xf32>
    %606 = arith.mulf %605, %11 : vector<8x1xf32>
    %607 = vector.broadcast %604 : f32 to vector<8x1xf32>
    %608 = arith.mulf %607, %18 : vector<8x1xf32>
    %609 = arith.addf %606, %608 : vector<8x1xf32>
    %c240_i32_60 = arith.constant 240 : i32
    %610 = tpu.dynamic_rotate %6 by %c240_i32_60 dim 1 : vector<8x256xf32>, i32 -> vector<8x256xf32>
    %611 = vector.broadcast %609 : vector<8x1xf32> to vector<8x256xf32>
    %612 = arith.mulf %610, %611 : vector<8x256xf32>
    %cst_61 = arith.constant 0.000000e+00 : f32
    %613 = vector.shape_cast %602 : vector<1x256xi1> to vector<1x256xi1>
    %614 = vector.broadcast %613 : vector<1x256xi1> to vector<8x256xi1>
    %615 = vector.broadcast %cst_61 : f32 to vector<8x256xf32>
    %616 = arith.select %614, %612, %615 : vector<8x256xi1>, vector<8x256xf32>
    %617 = arith.addf %601, %616 : vector<8x256xf32>
    %618 = arith.andi %60, %95 : vector<1x256xi1>
    %c32 = arith.constant 32 : index
    %619 = memref.load %arg2[%c32] : memref<98xf32, #tpu.memory_space<smem>>
    %c81 = arith.constant 81 : index
    %620 = memref.load %arg2[%c81] : memref<98xf32, #tpu.memory_space<smem>>
    %621 = vector.broadcast %619 : f32 to vector<8x1xf32>
    %622 = arith.mulf %621, %11 : vector<8x1xf32>
    %623 = vector.broadcast %620 : f32 to vector<8x1xf32>
    %624 = arith.mulf %623, %18 : vector<8x1xf32>
    %625 = arith.addf %622, %624 : vector<8x1xf32>
    %c239_i32 = arith.constant 239 : i32
    %626 = tpu.dynamic_rotate %6 by %c239_i32 dim 1 : vector<8x256xf32>, i32 -> vector<8x256xf32>
    %627 = vector.broadcast %625 : vector<8x1xf32> to vector<8x256xf32>
    %628 = arith.mulf %626, %627 : vector<8x256xf32>
    %cst_62 = arith.constant 0.000000e+00 : f32
    %629 = vector.shape_cast %618 : vector<1x256xi1> to vector<1x256xi1>
    %630 = vector.broadcast %629 : vector<1x256xi1> to vector<8x256xi1>
    %631 = vector.broadcast %cst_62 : f32 to vector<8x256xf32>
    %632 = arith.select %630, %628, %631 : vector<8x256xi1>, vector<8x256xf32>
    %633 = arith.addf %617, %632 : vector<8x256xf32>
    %634 = arith.andi %60, %100 : vector<1x256xi1>
    %c33 = arith.constant 33 : index
    %635 = memref.load %arg2[%c33] : memref<98xf32, #tpu.memory_space<smem>>
    %c82 = arith.constant 82 : index
    %636 = memref.load %arg2[%c82] : memref<98xf32, #tpu.memory_space<smem>>
    %637 = vector.broadcast %635 : f32 to vector<8x1xf32>
    %638 = arith.mulf %637, %11 : vector<8x1xf32>
    %639 = vector.broadcast %636 : f32 to vector<8x1xf32>
    %640 = arith.mulf %639, %18 : vector<8x1xf32>
    %641 = arith.addf %638, %640 : vector<8x1xf32>
    %c238_i32 = arith.constant 238 : i32
    %642 = tpu.dynamic_rotate %6 by %c238_i32 dim 1 : vector<8x256xf32>, i32 -> vector<8x256xf32>
    %643 = vector.broadcast %641 : vector<8x1xf32> to vector<8x256xf32>
    %644 = arith.mulf %642, %643 : vector<8x256xf32>
    %cst_63 = arith.constant 0.000000e+00 : f32
    %645 = vector.shape_cast %634 : vector<1x256xi1> to vector<1x256xi1>
    %646 = vector.broadcast %645 : vector<1x256xi1> to vector<8x256xi1>
    %647 = vector.broadcast %cst_63 : f32 to vector<8x256xf32>
    %648 = arith.select %646, %644, %647 : vector<8x256xi1>, vector<8x256xf32>
    %649 = arith.addf %633, %648 : vector<8x256xf32>
    %650 = arith.andi %60, %105 : vector<1x256xi1>
    %c34 = arith.constant 34 : index
    %651 = memref.load %arg2[%c34] : memref<98xf32, #tpu.memory_space<smem>>
    %c83 = arith.constant 83 : index
    %652 = memref.load %arg2[%c83] : memref<98xf32, #tpu.memory_space<smem>>
    %653 = vector.broadcast %651 : f32 to vector<8x1xf32>
    %654 = arith.mulf %653, %11 : vector<8x1xf32>
    %655 = vector.broadcast %652 : f32 to vector<8x1xf32>
    %656 = arith.mulf %655, %18 : vector<8x1xf32>
    %657 = arith.addf %654, %656 : vector<8x1xf32>
    %c237_i32 = arith.constant 237 : i32
    %658 = tpu.dynamic_rotate %6 by %c237_i32 dim 1 : vector<8x256xf32>, i32 -> vector<8x256xf32>
    %659 = vector.broadcast %657 : vector<8x1xf32> to vector<8x256xf32>
    %660 = arith.mulf %658, %659 : vector<8x256xf32>
    %cst_64 = arith.constant 0.000000e+00 : f32
    %661 = vector.shape_cast %650 : vector<1x256xi1> to vector<1x256xi1>
    %662 = vector.broadcast %661 : vector<1x256xi1> to vector<8x256xi1>
    %663 = vector.broadcast %cst_64 : f32 to vector<8x256xf32>
    %664 = arith.select %662, %660, %663 : vector<8x256xi1>, vector<8x256xf32>
    %665 = arith.addf %649, %664 : vector<8x256xf32>
    %666 = arith.andi %65, %75 : vector<1x256xi1>
    %c35 = arith.constant 35 : index
    %667 = memref.load %arg2[%c35] : memref<98xf32, #tpu.memory_space<smem>>
    %c84 = arith.constant 84 : index
    %668 = memref.load %arg2[%c84] : memref<98xf32, #tpu.memory_space<smem>>
    %669 = vector.broadcast %667 : f32 to vector<8x1xf32>
    %670 = arith.mulf %669, %11 : vector<8x1xf32>
    %671 = vector.broadcast %668 : f32 to vector<8x1xf32>
    %672 = arith.mulf %671, %18 : vector<8x1xf32>
    %673 = arith.addf %670, %672 : vector<8x1xf32>
    %c227_i32 = arith.constant 227 : i32
    %674 = tpu.dynamic_rotate %6 by %c227_i32 dim 1 : vector<8x256xf32>, i32 -> vector<8x256xf32>
    %675 = vector.broadcast %673 : vector<8x1xf32> to vector<8x256xf32>
    %676 = arith.mulf %674, %675 : vector<8x256xf32>
    %cst_65 = arith.constant 0.000000e+00 : f32
    %677 = vector.shape_cast %666 : vector<1x256xi1> to vector<1x256xi1>
    %678 = vector.broadcast %677 : vector<1x256xi1> to vector<8x256xi1>
    %679 = vector.broadcast %cst_65 : f32 to vector<8x256xf32>
    %680 = arith.select %678, %676, %679 : vector<8x256xi1>, vector<8x256xf32>
    %681 = arith.addf %665, %680 : vector<8x256xf32>
    %682 = arith.andi %65, %80 : vector<1x256xi1>
    %c36 = arith.constant 36 : index
    %683 = memref.load %arg2[%c36] : memref<98xf32, #tpu.memory_space<smem>>
    %c85 = arith.constant 85 : index
    %684 = memref.load %arg2[%c85] : memref<98xf32, #tpu.memory_space<smem>>
    %685 = vector.broadcast %683 : f32 to vector<8x1xf32>
    %686 = arith.mulf %685, %11 : vector<8x1xf32>
    %687 = vector.broadcast %684 : f32 to vector<8x1xf32>
    %688 = arith.mulf %687, %18 : vector<8x1xf32>
    %689 = arith.addf %686, %688 : vector<8x1xf32>
    %c226_i32 = arith.constant 226 : i32
    %690 = tpu.dynamic_rotate %6 by %c226_i32 dim 1 : vector<8x256xf32>, i32 -> vector<8x256xf32>
    %691 = vector.broadcast %689 : vector<8x1xf32> to vector<8x256xf32>
    %692 = arith.mulf %690, %691 : vector<8x256xf32>
    %cst_66 = arith.constant 0.000000e+00 : f32
    %693 = vector.shape_cast %682 : vector<1x256xi1> to vector<1x256xi1>
    %694 = vector.broadcast %693 : vector<1x256xi1> to vector<8x256xi1>
    %695 = vector.broadcast %cst_66 : f32 to vector<8x256xf32>
    %696 = arith.select %694, %692, %695 : vector<8x256xi1>, vector<8x256xf32>
    %697 = arith.addf %681, %696 : vector<8x256xf32>
    %698 = arith.andi %65, %85 : vector<1x256xi1>
    %c37 = arith.constant 37 : index
    %699 = memref.load %arg2[%c37] : memref<98xf32, #tpu.memory_space<smem>>
    %c86 = arith.constant 86 : index
    %700 = memref.load %arg2[%c86] : memref<98xf32, #tpu.memory_space<smem>>
    %701 = vector.broadcast %699 : f32 to vector<8x1xf32>
    %702 = arith.mulf %701, %11 : vector<8x1xf32>
    %703 = vector.broadcast %700 : f32 to vector<8x1xf32>
    %704 = arith.mulf %703, %18 : vector<8x1xf32>
    %705 = arith.addf %702, %704 : vector<8x1xf32>
    %c225_i32 = arith.constant 225 : i32
    %706 = tpu.dynamic_rotate %6 by %c225_i32 dim 1 : vector<8x256xf32>, i32 -> vector<8x256xf32>
    %707 = vector.broadcast %705 : vector<8x1xf32> to vector<8x256xf32>
    %708 = arith.mulf %706, %707 : vector<8x256xf32>
    %cst_67 = arith.constant 0.000000e+00 : f32
    %709 = vector.shape_cast %698 : vector<1x256xi1> to vector<1x256xi1>
    %710 = vector.broadcast %709 : vector<1x256xi1> to vector<8x256xi1>
    %711 = vector.broadcast %cst_67 : f32 to vector<8x256xf32>
    %712 = arith.select %710, %708, %711 : vector<8x256xi1>, vector<8x256xf32>
    %713 = arith.addf %697, %712 : vector<8x256xf32>
    %714 = arith.andi %65, %90 : vector<1x256xi1>
    %c38 = arith.constant 38 : index
    %715 = memref.load %arg2[%c38] : memref<98xf32, #tpu.memory_space<smem>>
    %c87 = arith.constant 87 : index
    %716 = memref.load %arg2[%c87] : memref<98xf32, #tpu.memory_space<smem>>
    %717 = vector.broadcast %715 : f32 to vector<8x1xf32>
    %718 = arith.mulf %717, %11 : vector<8x1xf32>
    %719 = vector.broadcast %716 : f32 to vector<8x1xf32>
    %720 = arith.mulf %719, %18 : vector<8x1xf32>
    %721 = arith.addf %718, %720 : vector<8x1xf32>
    %c224_i32_68 = arith.constant 224 : i32
    %722 = tpu.dynamic_rotate %6 by %c224_i32_68 dim 1 : vector<8x256xf32>, i32 -> vector<8x256xf32>
    %723 = vector.broadcast %721 : vector<8x1xf32> to vector<8x256xf32>
    %724 = arith.mulf %722, %723 : vector<8x256xf32>
    %cst_69 = arith.constant 0.000000e+00 : f32
    %725 = vector.shape_cast %714 : vector<1x256xi1> to vector<1x256xi1>
    %726 = vector.broadcast %725 : vector<1x256xi1> to vector<8x256xi1>
    %727 = vector.broadcast %cst_69 : f32 to vector<8x256xf32>
    %728 = arith.select %726, %724, %727 : vector<8x256xi1>, vector<8x256xf32>
    %729 = arith.addf %713, %728 : vector<8x256xf32>
    %730 = arith.andi %65, %95 : vector<1x256xi1>
    %c39 = arith.constant 39 : index
    %731 = memref.load %arg2[%c39] : memref<98xf32, #tpu.memory_space<smem>>
    %c88 = arith.constant 88 : index
    %732 = memref.load %arg2[%c88] : memref<98xf32, #tpu.memory_space<smem>>
    %733 = vector.broadcast %731 : f32 to vector<8x1xf32>
    %734 = arith.mulf %733, %11 : vector<8x1xf32>
    %735 = vector.broadcast %732 : f32 to vector<8x1xf32>
    %736 = arith.mulf %735, %18 : vector<8x1xf32>
    %737 = arith.addf %734, %736 : vector<8x1xf32>
    %c223_i32 = arith.constant 223 : i32
    %738 = tpu.dynamic_rotate %6 by %c223_i32 dim 1 : vector<8x256xf32>, i32 -> vector<8x256xf32>
    %739 = vector.broadcast %737 : vector<8x1xf32> to vector<8x256xf32>
    %740 = arith.mulf %738, %739 : vector<8x256xf32>
    %cst_70 = arith.constant 0.000000e+00 : f32
    %741 = vector.shape_cast %730 : vector<1x256xi1> to vector<1x256xi1>
    %742 = vector.broadcast %741 : vector<1x256xi1> to vector<8x256xi1>
    %743 = vector.broadcast %cst_70 : f32 to vector<8x256xf32>
    %744 = arith.select %742, %740, %743 : vector<8x256xi1>, vector<8x256xf32>
    %745 = arith.addf %729, %744 : vector<8x256xf32>
    %746 = arith.andi %65, %100 : vector<1x256xi1>
    %c40 = arith.constant 40 : index
    %747 = memref.load %arg2[%c40] : memref<98xf32, #tpu.memory_space<smem>>
    %c89 = arith.constant 89 : index
    %748 = memref.load %arg2[%c89] : memref<98xf32, #tpu.memory_space<smem>>
    %749 = vector.broadcast %747 : f32 to vector<8x1xf32>
    %750 = arith.mulf %749, %11 : vector<8x1xf32>
    %751 = vector.broadcast %748 : f32 to vector<8x1xf32>
    %752 = arith.mulf %751, %18 : vector<8x1xf32>
    %753 = arith.addf %750, %752 : vector<8x1xf32>
    %c222_i32 = arith.constant 222 : i32
    %754 = tpu.dynamic_rotate %6 by %c222_i32 dim 1 : vector<8x256xf32>, i32 -> vector<8x256xf32>
    %755 = vector.broadcast %753 : vector<8x1xf32> to vector<8x256xf32>
    %756 = arith.mulf %754, %755 : vector<8x256xf32>
    %cst_71 = arith.constant 0.000000e+00 : f32
    %757 = vector.shape_cast %746 : vector<1x256xi1> to vector<1x256xi1>
    %758 = vector.broadcast %757 : vector<1x256xi1> to vector<8x256xi1>
    %759 = vector.broadcast %cst_71 : f32 to vector<8x256xf32>
    %760 = arith.select %758, %756, %759 : vector<8x256xi1>, vector<8x256xf32>
    %761 = arith.addf %745, %760 : vector<8x256xf32>
    %762 = arith.andi %65, %105 : vector<1x256xi1>
    %c41 = arith.constant 41 : index
    %763 = memref.load %arg2[%c41] : memref<98xf32, #tpu.memory_space<smem>>
    %c90 = arith.constant 90 : index
    %764 = memref.load %arg2[%c90] : memref<98xf32, #tpu.memory_space<smem>>
    %765 = vector.broadcast %763 : f32 to vector<8x1xf32>
    %766 = arith.mulf %765, %11 : vector<8x1xf32>
    %767 = vector.broadcast %764 : f32 to vector<8x1xf32>
    %768 = arith.mulf %767, %18 : vector<8x1xf32>
    %769 = arith.addf %766, %768 : vector<8x1xf32>
    %c221_i32 = arith.constant 221 : i32
    %770 = tpu.dynamic_rotate %6 by %c221_i32 dim 1 : vector<8x256xf32>, i32 -> vector<8x256xf32>
    %771 = vector.broadcast %769 : vector<8x1xf32> to vector<8x256xf32>
    %772 = arith.mulf %770, %771 : vector<8x256xf32>
    %cst_72 = arith.constant 0.000000e+00 : f32
    %773 = vector.shape_cast %762 : vector<1x256xi1> to vector<1x256xi1>
    %774 = vector.broadcast %773 : vector<1x256xi1> to vector<8x256xi1>
    %775 = vector.broadcast %cst_72 : f32 to vector<8x256xf32>
    %776 = arith.select %774, %772, %775 : vector<8x256xi1>, vector<8x256xf32>
    %777 = arith.addf %761, %776 : vector<8x256xf32>
    %778 = arith.andi %70, %75 : vector<1x256xi1>
    %c42 = arith.constant 42 : index
    %779 = memref.load %arg2[%c42] : memref<98xf32, #tpu.memory_space<smem>>
    %c91 = arith.constant 91 : index
    %780 = memref.load %arg2[%c91] : memref<98xf32, #tpu.memory_space<smem>>
    %781 = vector.broadcast %779 : f32 to vector<8x1xf32>
    %782 = arith.mulf %781, %11 : vector<8x1xf32>
    %783 = vector.broadcast %780 : f32 to vector<8x1xf32>
    %784 = arith.mulf %783, %18 : vector<8x1xf32>
    %785 = arith.addf %782, %784 : vector<8x1xf32>
    %c211_i32 = arith.constant 211 : i32
    %786 = tpu.dynamic_rotate %6 by %c211_i32 dim 1 : vector<8x256xf32>, i32 -> vector<8x256xf32>
    %787 = vector.broadcast %785 : vector<8x1xf32> to vector<8x256xf32>
    %788 = arith.mulf %786, %787 : vector<8x256xf32>
    %cst_73 = arith.constant 0.000000e+00 : f32
    %789 = vector.shape_cast %778 : vector<1x256xi1> to vector<1x256xi1>
    %790 = vector.broadcast %789 : vector<1x256xi1> to vector<8x256xi1>
    %791 = vector.broadcast %cst_73 : f32 to vector<8x256xf32>
    %792 = arith.select %790, %788, %791 : vector<8x256xi1>, vector<8x256xf32>
    %793 = arith.addf %777, %792 : vector<8x256xf32>
    %794 = arith.andi %70, %80 : vector<1x256xi1>
    %c43 = arith.constant 43 : index
    %795 = memref.load %arg2[%c43] : memref<98xf32, #tpu.memory_space<smem>>
    %c92 = arith.constant 92 : index
    %796 = memref.load %arg2[%c92] : memref<98xf32, #tpu.memory_space<smem>>
    %797 = vector.broadcast %795 : f32 to vector<8x1xf32>
    %798 = arith.mulf %797, %11 : vector<8x1xf32>
    %799 = vector.broadcast %796 : f32 to vector<8x1xf32>
    %800 = arith.mulf %799, %18 : vector<8x1xf32>
    %801 = arith.addf %798, %800 : vector<8x1xf32>
    %c210_i32 = arith.constant 210 : i32
    %802 = tpu.dynamic_rotate %6 by %c210_i32 dim 1 : vector<8x256xf32>, i32 -> vector<8x256xf32>
    %803 = vector.broadcast %801 : vector<8x1xf32> to vector<8x256xf32>
    %804 = arith.mulf %802, %803 : vector<8x256xf32>
    %cst_74 = arith.constant 0.000000e+00 : f32
    %805 = vector.shape_cast %794 : vector<1x256xi1> to vector<1x256xi1>
    %806 = vector.broadcast %805 : vector<1x256xi1> to vector<8x256xi1>
    %807 = vector.broadcast %cst_74 : f32 to vector<8x256xf32>
    %808 = arith.select %806, %804, %807 : vector<8x256xi1>, vector<8x256xf32>
    %809 = arith.addf %793, %808 : vector<8x256xf32>
    %810 = arith.andi %70, %85 : vector<1x256xi1>
    %c44 = arith.constant 44 : index
    %811 = memref.load %arg2[%c44] : memref<98xf32, #tpu.memory_space<smem>>
    %c93 = arith.constant 93 : index
    %812 = memref.load %arg2[%c93] : memref<98xf32, #tpu.memory_space<smem>>
    %813 = vector.broadcast %811 : f32 to vector<8x1xf32>
    %814 = arith.mulf %813, %11 : vector<8x1xf32>
    %815 = vector.broadcast %812 : f32 to vector<8x1xf32>
    %816 = arith.mulf %815, %18 : vector<8x1xf32>
    %817 = arith.addf %814, %816 : vector<8x1xf32>
    %c209_i32 = arith.constant 209 : i32
    %818 = tpu.dynamic_rotate %6 by %c209_i32 dim 1 : vector<8x256xf32>, i32 -> vector<8x256xf32>
    %819 = vector.broadcast %817 : vector<8x1xf32> to vector<8x256xf32>
    %820 = arith.mulf %818, %819 : vector<8x256xf32>
    %cst_75 = arith.constant 0.000000e+00 : f32
    %821 = vector.shape_cast %810 : vector<1x256xi1> to vector<1x256xi1>
    %822 = vector.broadcast %821 : vector<1x256xi1> to vector<8x256xi1>
    %823 = vector.broadcast %cst_75 : f32 to vector<8x256xf32>
    %824 = arith.select %822, %820, %823 : vector<8x256xi1>, vector<8x256xf32>
    %825 = arith.addf %809, %824 : vector<8x256xf32>
    %826 = arith.andi %70, %90 : vector<1x256xi1>
    %c45 = arith.constant 45 : index
    %827 = memref.load %arg2[%c45] : memref<98xf32, #tpu.memory_space<smem>>
    %c94 = arith.constant 94 : index
    %828 = memref.load %arg2[%c94] : memref<98xf32, #tpu.memory_space<smem>>
    %829 = vector.broadcast %827 : f32 to vector<8x1xf32>
    %830 = arith.mulf %829, %11 : vector<8x1xf32>
    %831 = vector.broadcast %828 : f32 to vector<8x1xf32>
    %832 = arith.mulf %831, %18 : vector<8x1xf32>
    %833 = arith.addf %830, %832 : vector<8x1xf32>
    %c208_i32_76 = arith.constant 208 : i32
    %834 = tpu.dynamic_rotate %6 by %c208_i32_76 dim 1 : vector<8x256xf32>, i32 -> vector<8x256xf32>
    %835 = vector.broadcast %833 : vector<8x1xf32> to vector<8x256xf32>
    %836 = arith.mulf %834, %835 : vector<8x256xf32>
    %cst_77 = arith.constant 0.000000e+00 : f32
    %837 = vector.shape_cast %826 : vector<1x256xi1> to vector<1x256xi1>
    %838 = vector.broadcast %837 : vector<1x256xi1> to vector<8x256xi1>
    %839 = vector.broadcast %cst_77 : f32 to vector<8x256xf32>
    %840 = arith.select %838, %836, %839 : vector<8x256xi1>, vector<8x256xf32>
    %841 = arith.addf %825, %840 : vector<8x256xf32>
    %842 = arith.andi %70, %95 : vector<1x256xi1>
    %c46 = arith.constant 46 : index
    %843 = memref.load %arg2[%c46] : memref<98xf32, #tpu.memory_space<smem>>
    %c95 = arith.constant 95 : index
    %844 = memref.load %arg2[%c95] : memref<98xf32, #tpu.memory_space<smem>>
    %845 = vector.broadcast %843 : f32 to vector<8x1xf32>
    %846 = arith.mulf %845, %11 : vector<8x1xf32>
    %847 = vector.broadcast %844 : f32 to vector<8x1xf32>
    %848 = arith.mulf %847, %18 : vector<8x1xf32>
    %849 = arith.addf %846, %848 : vector<8x1xf32>
    %c207_i32 = arith.constant 207 : i32
    %850 = tpu.dynamic_rotate %6 by %c207_i32 dim 1 : vector<8x256xf32>, i32 -> vector<8x256xf32>
    %851 = vector.broadcast %849 : vector<8x1xf32> to vector<8x256xf32>
    %852 = arith.mulf %850, %851 : vector<8x256xf32>
    %cst_78 = arith.constant 0.000000e+00 : f32
    %853 = vector.shape_cast %842 : vector<1x256xi1> to vector<1x256xi1>
    %854 = vector.broadcast %853 : vector<1x256xi1> to vector<8x256xi1>
    %855 = vector.broadcast %cst_78 : f32 to vector<8x256xf32>
    %856 = arith.select %854, %852, %855 : vector<8x256xi1>, vector<8x256xf32>
    %857 = arith.addf %841, %856 : vector<8x256xf32>
    %858 = arith.andi %70, %100 : vector<1x256xi1>
    %c47 = arith.constant 47 : index
    %859 = memref.load %arg2[%c47] : memref<98xf32, #tpu.memory_space<smem>>
    %c96 = arith.constant 96 : index
    %860 = memref.load %arg2[%c96] : memref<98xf32, #tpu.memory_space<smem>>
    %861 = vector.broadcast %859 : f32 to vector<8x1xf32>
    %862 = arith.mulf %861, %11 : vector<8x1xf32>
    %863 = vector.broadcast %860 : f32 to vector<8x1xf32>
    %864 = arith.mulf %863, %18 : vector<8x1xf32>
    %865 = arith.addf %862, %864 : vector<8x1xf32>
    %c206_i32 = arith.constant 206 : i32
    %866 = tpu.dynamic_rotate %6 by %c206_i32 dim 1 : vector<8x256xf32>, i32 -> vector<8x256xf32>
    %867 = vector.broadcast %865 : vector<8x1xf32> to vector<8x256xf32>
    %868 = arith.mulf %866, %867 : vector<8x256xf32>
    %cst_79 = arith.constant 0.000000e+00 : f32
    %869 = vector.shape_cast %858 : vector<1x256xi1> to vector<1x256xi1>
    %870 = vector.broadcast %869 : vector<1x256xi1> to vector<8x256xi1>
    %871 = vector.broadcast %cst_79 : f32 to vector<8x256xf32>
    %872 = arith.select %870, %868, %871 : vector<8x256xi1>, vector<8x256xf32>
    %873 = arith.addf %857, %872 : vector<8x256xf32>
    %874 = arith.andi %70, %105 : vector<1x256xi1>
    %c48 = arith.constant 48 : index
    %875 = memref.load %arg2[%c48] : memref<98xf32, #tpu.memory_space<smem>>
    %c97 = arith.constant 97 : index
    %876 = memref.load %arg2[%c97] : memref<98xf32, #tpu.memory_space<smem>>
    %877 = vector.broadcast %875 : f32 to vector<8x1xf32>
    %878 = arith.mulf %877, %11 : vector<8x1xf32>
    %879 = vector.broadcast %876 : f32 to vector<8x1xf32>
    %880 = arith.mulf %879, %18 : vector<8x1xf32>
    %881 = arith.addf %878, %880 : vector<8x1xf32>
    %c205_i32 = arith.constant 205 : i32
    %882 = tpu.dynamic_rotate %6 by %c205_i32 dim 1 : vector<8x256xf32>, i32 -> vector<8x256xf32>
    %883 = vector.broadcast %881 : vector<8x1xf32> to vector<8x256xf32>
    %884 = arith.mulf %882, %883 : vector<8x256xf32>
    %cst_80 = arith.constant 0.000000e+00 : f32
    %885 = vector.shape_cast %874 : vector<1x256xi1> to vector<1x256xi1>
    %886 = vector.broadcast %885 : vector<1x256xi1> to vector<8x256xi1>
    %887 = vector.broadcast %cst_80 : f32 to vector<8x256xf32>
    %888 = arith.select %886, %884, %887 : vector<8x256xi1>, vector<8x256xf32>
    %889 = arith.addf %873, %888 : vector<8x256xf32>
    %890 = vector.extract_strided_slice %889 {offsets = [0, 0], sizes = [2, 256], strides = [1, 1]} : vector<8x256xf32> to vector<2x256xf32>
    %891 = vector.extract_strided_slice %889 {offsets = [2, 0], sizes = [2, 256], strides = [1, 1]} : vector<8x256xf32> to vector<2x256xf32>
    %892 = arith.addf %890, %891 : vector<2x256xf32>
    %893 = arith.negf %892 : vector<2x256xf32>
    %894 = math.exp %893 : vector<2x256xf32>
    %cst_81 = arith.constant 1.000000e+00 : f32
    %895 = vector.broadcast %cst_81 : f32 to vector<2x256xf32>
    %896 = arith.addf %895, %894 : vector<2x256xf32>
    %897 = arith.divf %895, %896 : vector<2x256xf32>
    %898 = vector.shape_cast %897 : vector<2x256xf32> to vector<2x1x256xf32>
    %899 = vector.broadcast %898 : vector<2x1x256xf32> to vector<2x4x256xf32>
    %900 = arith.mulf %0, %899 : vector<2x4x256xf32>
    %c0_82 = arith.constant 0 : index
    %c0_83 = arith.constant 0 : index
    %c0_84 = arith.constant 0 : index
    %901 = vector.load %arg3[%c0_82, %c0_83, %c0_84] : memref<2x4x256xf32, #tpu.memory_space<vmem>>, vector<2x4x256xf32>
    tpu.vector_store %arg3[%c0_82, %c0_83, %c0_84], %900 {strides = array<i32>} : memref<2x4x256xf32, #tpu.memory_space<vmem>>, vector<2x4x256xf32>,
    return
  }
  func.func @transform_0(%arg0: i32) -> (i32, i32, i32) {
    %c0_i32 = arith.constant 0 : i32
    %c0_i32_0 = arith.constant 0 : i32
    %c0_i32_1 = arith.constant 0 : i32
    return %arg0, %c0_i32, %c0_i32_0 : i32, i32, i32
  }
  func.func @transform_1(%arg0: i32) -> i32 {
    %c0_i32 = arith.constant 0 : i32
    %c0_i32_0 = arith.constant 0 : i32
    return %c0_i32 : i32
  }
  func.func @transform_2(%arg0: i32) -> (i32, i32, i32) {
    %c0_i32 = arith.constant 0 : i32
    %c0_i32_0 = arith.constant 0 : i32
    %c0_i32_1 = arith.constant 0 : i32
    return %arg0, %c0_i32, %c0_i32_0 : i32, i32, i32
  }
}

</mosaic_0001>

<bundles_post_ra>
// kernel: tpu_custom_call.1
= control target key start
LH: loop header
LB: loop body
LE: loop exit
PB: predicated region body
PF: predicated region fallthrough
CT: control target
= control target key end

     0   :  { %7 = vsyncpa [#allocation3], 0  ;;  %s3575_s0 = inlined_call_operand.hbm [shape: f32[2,4,256], index: 0, kind: input, shape index: {}]   ;;  %s3576_s1 = inlined_call_operand.vmem [shape: f32[98], index: 1, kind: input, shape index: {}]   ;;  %s3577_s2 = inlined_call_operand.hbm [shape: f32[2,4,256], index: 2, kind: output, shape index: {}]  }
   0x1   :  { %8 = vsyncpa [#allocation5], 0 }
   0x2   :  { %9 = vsyncpa [#allocation4], 0  ;;  %s1837_s9 = smov [#allocation2]   ;;  %s28_s13 = sshll.u32 %s3576_s1, 4  ;;  %s29_s13 = int_to_ptr.vmem [resolvable:$true] %s28_s13 }
   0x3   :  { %s15_s10 = sshll.u32 %s1837_s9, 4  ;;  %s1775_s16 = scalar_lea.hbm %s3575_s0, 256  ;;  %s16_s10 = int_to_ptr.vmem [resolvable:$true] %s15_s10 }
   0x4   :  { %p1776_p0 = scmp.ne.s32.totalorder %s3575_s0, %s1775_s16  ;;  %p1779_p1 = scmp.lt.u32.totalorder %s1775_s16, %s3575_s0 }
   0x6   :  { %p1781_p2 = pnand %p1779_p1, %p1776_p0 }
   0x8   :  { %1784 = shalt.err (!%p1781_p2)
}
   0x9   :  { %s1785_s21 = scalar_lea.vmem %s16_s10, 256  ;;  %p1790_p4 = scmp.lt.s32.totalorder %s16_s10, %s16_s10 }
   0xa   :  { %p1786_p3 = scmp.ne.s32.totalorder %s16_s10, %s1785_s21  ;;  %p1791_p5 = scmp.lt.s32.totalorder %s1785_s21, %s1785_s21 }
   0xc   :  { %p1792_p6 = por %p1791_p5, %p1790_p4 }
   0xe   :  { %p1793_p7 = pnand %p1792_p6, %p1786_p3 }
  0x10   :  { %1796 = shalt.err (!%p1793_p7)
}
  0x11   :  { %s1838_s1 = smov 128   ;;  %s1839_s22 = smov 8  }
  0x12   :  { %21 = dma.hbm_to_vmem [thread:$0]  %s3575_s0, 256, %s16_s10, [#allocation3], %s1838_s1, %s1838_s1, %s1839_s22  }
  0x13   :  { %s1797_s25 = scalar_lea.vmem %s29_s13, 16  ;;  %p1802_p9 = scmp.lt.s32.totalorder %s29_s13, %s29_s13 }
  0x14   :  { %p1798_p8 = scmp.ne.s32.totalorder %s29_s13, %s1797_s25  ;;  %p1803_p10 = scmp.lt.s32.totalorder %s1797_s25, %s1797_s25 }
  0x16   :  { %p1804_p11 = por %p1803_p10, %p1802_p9 }
  0x18   :  { %p1805_p12 = pnand %p1804_p11, %p1798_p8 }
  0x1a   :  { %1808 = shalt.err (!%p1805_p12)
}
  0x1b   :  { %s1840_s26 = smov [#allocation6]  }
  0x1c   :  { %31 = dma.vmem_to_smem %s29_s13, 16, %s1840_s26, [#allocation5]  }
  0x1d   :  { %1831 = dma.done.wait [#allocation3], 256  }
  0x1e   :  { %1832 = vsyncadd [#allocation3], 4294967040 }
  0x1f   :  { %1833 = dma.done.wait [#allocation5], 16  }
  0x20   :  { %1834 = vsyncadd [#allocation5], 4294967280 }
  0x21   :  { %38 = sfence }
  0x22   :  { %v39_v0 = vld [vmem:[#allocation2] sm:$0xff]  ;;  %v40_v1 = vld [vmem:[#allocation2 + $0x8] sm:$0xff]  ;;  %vm47_vm0 = vcmask 1043456   ;;  %vm122_vm1 = vcmask 1043459   ;;  %vm113_vm2 = vcmask 1041409   ;;  %vm127_vm3 = vcmask 1041408  }
  0x23   :  { %v48_v2 = vsel %vm47_vm0, %v39_v0, 0.0  ;;  %v62_v3 = vsel %vm47_vm0, %v40_v1, 0.0  ;;  %v81_v4 = vsel %vm47_vm0, %v39_v0, -inf  ;;  %v95_v5 = vsel %vm47_vm0, %v40_v1, -inf  ;;  %s1841_s0 = smov 50   ;;  %s1842_s27 = smov 51  }
  0x24   :  { %v49_v6 = vrot.slane %v48_v2, 4  ;;  %v63_v7 = vrot.slane %v62_v3, 4  ;;  %v82_v8 = vrot.slane %v81_v4, 4  ;;  %v96_v9 = vrot.slane %v95_v5, 4  ;;  %s1843_s28 = smov 49   ;;  %s1844_s29 = smov 48  }
  0x25   :  { %v43_v10 = vcombine.high %v39_v0, %v39_v0  ;;  %v44_v11 = vcombine.high %v40_v1, %v40_v1  ;;  %s1845_s30 = smov 47   ;;  %s1846_s3 = smov 46  }
  0x26   :  { %v50_v12 = vadd.f32 %v49_v6, %v48_v2  ;;  %v64_v13 = vadd.f32 %v63_v7, %v62_v3  ;;  %v83_v14 = vmax.f32 %v81_v4, %v82_v8  ;;  %v97_v15 = vmax.f32 %v95_v5, %v96_v9  ;;  %s1847_s4 = smov 45   ;;  %s1848_s5 = smov 35  }
  0x27   :  { %v55_v16 = vsel %vm47_vm0, %v43_v10, 0.0  ;;  %v69_v17 = vsel %vm47_vm0, %v44_v11, 0.0  ;;  %v88_v18 = vsel %vm47_vm0, %v43_v10, -inf  ;;  %v102_v19 = vsel %vm47_vm0, %v44_v11, -inf  ;;  %s1849_s6 = smov 34   ;;  %s1850_s7 = smov 33  }
  0x28   :  { %v51_v20 = vrot.slane %v50_v12, 2  ;;  %v65_v21 = vrot.slane %v64_v13, 2  ;;  %v84_v22 = vrot.slane %v83_v14, 2  ;;  %v98_v23 = vrot.slane %v97_v15, 2  ;;  %s1851_s8 = smov 32   ;;  %s1852_s9 = smov 31  }
  0x29   :  { %v56_v24 = vrot.slane %v55_v16, 4  ;;  %v70_v25 = vrot.slane %v69_v17, 4  ;;  %v89_v26 = vrot.slane %v88_v18, 4  ;;  %v103_v27 = vrot.slane %v102_v19, 4  ;;  %s1853_s10 = smov 30   ;;  %s1854_s11 = smov 29  }
  0x2a   :  { %v52_v28 = vadd.f32 %v51_v20, %v50_v12  ;;  %v66_v29 = vadd.f32 %v65_v21, %v64_v13  ;;  %v85_v30 = vmax.f32 %v83_v14, %v84_v22  ;;  %v99_v31 = vmax.f32 %v97_v15, %v98_v23  ;;  %s1855_s12 = smov 19   ;;  %s1856_s13 = smov 18  }
  0x2b   :  { %v57_v32 = vadd.f32 %v56_v24, %v55_v16  ;;  %v71_v33 = vadd.f32 %v70_v25, %v69_v17  ;;  %v90_v34 = vmax.f32 %v88_v18, %v89_v26  ;;  %v104_v35 = vmax.f32 %v102_v19, %v103_v27  ;;  %s1857_s14 = smov 17   ;;  %s1858_s15 = smov 16  }
  0x2c   :  { %v53_v36 = vrot.slane %v52_v28, 1  ;;  %v67_v37 = vrot.slane %v66_v29, 1  ;;  %v86_v38 = vrot.slane %v85_v30, 1  ;;  %v100_v39 = vrot.slane %v99_v31, 1  ;;  %s1859_s16 = smov 15   ;;  %s1860_s17 = smov 14  }
  0x2d   :  { %v58_v40 = vrot.slane %v57_v32, 2  ;;  %v72_v41 = vrot.slane %v71_v33, 2  ;;  %v91_v42 = vrot.slane %v90_v34, 2  ;;  %v105_v43 = vrot.slane %v104_v35, 2  ;;  %s1861_s18 = smov 13   ;;  %s1862_s19 = smov 3  }
  0x2e   :  { %v54_v44 = vadd.f32 %v53_v36, %v52_v28  ;;  %v68_v45 = vadd.f32 %v67_v37, %v66_v29  ;;  %v87_v46 = vmax.f32 %v85_v30, %v86_v38  ;;  %v101_v47 = vmax.f32 %v99_v31, %v100_v39  ;;  %s1863_s20 = smov 2   ;;  %s1864_s21 = smov 1  }
  0x2f   :  { %v59_v48 = vadd.f32 %v58_v40, %v57_v32  ;;  %v73_v49 = vadd.f32 %v72_v41, %v71_v33  ;;  %v92_v50 = vmax.f32 %v90_v34, %v91_v42  ;;  %v106_v51 = vmax.f32 %v104_v35, %v105_v43  ;;  %s1865_s23 = smov 127   ;;  %s1866_s24 = smov 126  }
  0x30   :  { %v77_v52 = vmul.f32 0.25, %v54_v44  ;;  %v79_v53 = vmul.f32 0.25, %v68_v45  ;;  %v123_v54 = vsel %vm122_vm1, %v101_v47, %v87_v46  ;;  %v132_v8 = vlaneseq  ;;  %s1867_s25 = smov 125   ;;  %s2001_s26 = sld [smem:[#allocation6 + $0x1]] }
  0x31   :  { %v60_v55 = vrot.slane %v59_v48, 1  ;;  %v74_v56 = vrot.slane %v73_v49, 1  ;;  %v93_v57 = vrot.slane %v92_v50, 1  ;;  %v107_v58 = vrot.slane %v106_v51, 1 }
  0x32   :  { %v114_v59 = vsel %vm113_vm2, %v79_v53, %v77_v52  ;;  %v1999_v9 = vshrl.u32 %v132_v8, 7  ;;  %v2023_v10 = vand.u32 127, %v132_v8  ;;  %v1870_v13 = vmov 0.0  }
  0x33   :  { %v128_v60 = vsel %vm127_vm3, %v114_v59, %v123_v54  ;;  %v61_v61 = vadd.f32 %v60_v55, %v59_v48  ;;  %v75_v62 = vadd.f32 %v74_v56, %v73_v49  ;;  %v94_v63 = vmax.f32 %v92_v50, %v93_v57 }
  0x34   :  { %v1937_v0 = vsel %vm47_vm0, %v128_v60, 0.0  ;;  %v108_v1 = vmax.f32 %v106_v51, %v107_v58  ;;  %3602 = vst [vmem:[#allocation11_spill] sm:$0xff] %v1999_v9  ;;  %vm137_vm4 = vcmp.ge.s32.totalorder %v1999_v9, 2  ;;  %vm138_vm5 = vcmp.lt.s32.totalorder %v1999_v9, 4 }
  0x35   :  { %288 = vrot.lane.b32.xlu1 %v1937_v0, %s1841_s0  ;;  %262 = vrot.lane.b32.xlu0 %v1937_v0, %s1842_s27  ;;  %v78_v2 = vmul.f32 0.25, %v61_v61  ;;  %v80_v3 = vmul.f32 0.25, %v75_v62  ;;  %vm134_vm6 = vcmp.lt.s32.totalorder %v1999_v9, 2  ;;  %vm139_vm7 = vmand %vm137_vm4, %vm138_vm5  ;;  %v2041_v19 = vadd.s32 128, %v2023_v10 }
  0x36   :  { %v124_v4 = vsel %vm122_vm1, %v108_v1, %v94_v63  ;;  %v2028_v14 = vsel %vm134_vm6, 1.0, %v1870_v13  ;;  %v2032_v15 = vsel %vm139_vm7, 1.0, %v1870_v13  ;;  %v283_v16 = vstv %s2001_s26  ;;  %s1875_s26 = smov 109  }
  0x37   :  { %v115_v5 = vsel %vm113_vm2, %v80_v3, %v78_v2  ;;  %3603 = vst [vmem:[#allocation12_spill] sm:$0xff] %v2041_v19  ;;  %v2052_v23 = vand.u32 15, %v2023_v10  ;;  %vm292_vm8 = vcmp.lt.s32.totalorder %v2023_v10, 50  ;;  %v284_v25 = vmul.f32 %v2028_v14, %v283_v16 }
  0x38   :  { %v129_v6 = vsel %vm127_vm3, %v115_v5, %v124_v4  ;;  %vm318_vm9 = vcmp.lt.s32.totalorder %v2023_v10, 49  ;;  %v2089_v38 = vand.u32 15, %v2041_v19  ;;  %vm169_vm10 = vcmp.ge.s32.totalorder %v2023_v10, 48 }
  0x39   :  { %314 = vrot.lane.b32.xlu0 %v1937_v0, %s1843_s28  ;;  %v1946_v7 = vsel %vm47_vm0, %v129_v6, 0.0  ;;  %vm3578_vm11 = vcmp.ge.s32.totalorder %v2052_v23, 2  ;;  %vm344_vm12 = vcmp.lt.s32.totalorder %v2023_v10, 48  ;;  %vm370_vm13 = vcmp.lt.s32.totalorder %v2023_v10, 47 }
  0x3a   :  { %290 = vrot.lane.b32.xlu1 %v1946_v7, %s1841_s0  ;;  %s2003_s0 = sld [smem:[#allocation6 + $0x32]]  ;;  %vm223_vm14 = vcmp.ge.s32.totalorder %v2052_v23, 1  ;;  %vm218_vm15 = vcmp.ge.s32.totalorder %v2089_v38, 2  ;;  %vm396_vm0 = vcmp.lt.s32.totalorder %v2023_v10, 46  ;;  %vm224_vm1 = vcmp.ge.s32.totalorder %v2089_v38, 1 }
  0x3b   :  { %vm3599_vm2 = vcmp.lt.s32.totalorder %v2052_v23, 15  ;;  %vm3579_vm3 = vcmp.ge.s32.totalorder %v2052_v23, 3  ;;  %vm3592_vm4 = vcmp.ge.s32.totalorder %v2089_v38, 3  ;;  %vm266_vm5 = vcmp.lt.s32.totalorder %v2023_v10, 51 }
  0x3c   :  { %vm3600_vm6 = vcmp.lt.s32.totalorder %v2089_v38, 15  ;;  %vm3580_vm7 = vcmp.lt.s32.totalorder %v2052_v23, 14 }
  0x3d   :  { %340 = vrot.lane.b32.xlu0 %v1937_v0, %s1844_s29 }
  0x3e   :  { %316 = vrot.lane.b32.xlu1 %v1946_v7, %s1843_s28  ;;  %s2007_s28 = sld [smem:[#allocation6 + $0x33]] }
  0x40   :  { %v285_v17 = vstv %s2003_s0  ;;  %s1876_s0 = smov 99  }
  0x41   :  { %366 = vrot.lane.b32.xlu0 %v1937_v0, %s1845_s30  ;;  %v286_v26 = vmul.f32 %v2032_v15, %v285_v17 }
  0x42   :  { %342 = vrot.lane.b32.xlu1 %v1946_v7, %s1844_s29  ;;  %s1868_s29 = smov 115  }
  0x43   :  { %v2098_v41 = vadd.f32 %v286_v26, %v284_v25 }
  0x44   :  { %v311_v20 = vstv %s2007_s28  ;;  %s2249_s28 = sld [smem:[#allocation6 + $0x3c]] }
  0x45   :  { %392 = vrot.lane.b32.xlu0 %v1937_v0, %s1846_s3  ;;  %v312_v31 = vmul.f32 %v2032_v15, %v311_v20 }
  0x46   :  { %368 = vrot.lane.b32.xlu1 %v1946_v7, %s1845_s30  ;;  %s2010_s30 = sld [smem:[#allocation6 + $0x3]] }
  0x49   :  { %264 = vrot.lane.b32.xlu0 %v1946_v7, %s1842_s27  ;;  %s2005_s27 = sld [smem:[#allocation6 + $0x2]] }
  0x4a   :  { %394 = vrot.lane.b32.xlu1 %v1946_v7, %s1846_s3  ;;  %s2012_s3 = sld [smem:[#allocation6 + $0x34]] }
  0x4c   :  { %v335_v21 = vstv %s2010_s30  ;;  %s2289_s30 = sld [smem:[#allocation6 + $0xc]] }
  0x4d   :  { %418 = vrot.lane.b32.xlu0 %v1937_v0, %s1847_s4  ;;  %v336_v32 = vmul.f32 %v2028_v14, %v335_v21 }
  0x4e   :  { %420 = vrot.lane.b32.xlu1 %v1946_v7, %s1847_s4  ;;  %s2017_s4 = sld [smem:[#allocation6 + $0x4]] }
  0x4f   :  { %v309_v18 = vstv %s2005_s27  ;;  %s2247_s27 = sld [smem:[#allocation6 + $0xb]] }
  0x50   :  { %v337_v22 = vstv %s2012_s3  ;;  %v310_v30 = vmul.f32 %v2028_v14, %v309_v18  ;;  %s2291_s3 = sld [smem:[#allocation6 + $0x3d]] }
  0x51   :  { %444 = vrot.lane.b32.xlu0 %v1937_v0, %s1848_s5  ;;  %v338_v33 = vmul.f32 %v2032_v15, %v337_v22 }
  0x52   :  { %446 = vrot.lane.b32.xlu1 %v1946_v7, %s1848_s5  ;;  %s2019_s5 = sld [smem:[#allocation6 + $0x35]]  ;;  %v2100_v42 = vadd.f32 %v312_v31, %v310_v30 }
  0x53   :  { %v2102_v44 = vadd.f32 %v338_v33, %v336_v32 }
  0x54   :  { %v361_v27 = vstv %s2017_s4  ;;  %s1878_s4 = smov 97  }
  0x55   :  { %470 = vrot.lane.b32.xlu0 %v1937_v0, %s1849_s6  ;;  %v362_v36 = vmul.f32 %v2028_v14, %v361_v27 }
  0x56   :  { %472 = vrot.lane.b32.xlu1 %v1946_v7, %s1849_s6  ;;  %s1869_s6 = smov 114  }
  0x58   :  { %v363_v28 = vstv %s2019_s5  ;;  %s1879_s5 = smov 96  }
  0x59   :  { %496 = vrot.lane.b32.xlu0 %v1937_v0, %s1850_s7  ;;  %v364_v37 = vmul.f32 %v2032_v15, %v363_v28 }
  0x5a   :  { %498 = vrot.lane.b32.xlu1 %v1946_v7, %s1850_s7  ;;  %s2030_s7 = sld [smem:[#allocation6 + $0x5]] }
  0x5b   :  { %v2117_v48 = vadd.f32 %v364_v37, %v362_v36 }
  0x5d   :  { %522 = vrot.lane.b32.xlu0 %v1937_v0, %s1851_s8 }
  0x5e   :  { %524 = vrot.lane.b32.xlu1 %v1946_v7, %s1851_s8  ;;  %s2037_s8 = sld [smem:[#allocation6 + $0x36]] }
  0x60   :  { %v387_v40 = vstv %s2030_s7  ;;  %s2356_s7 = sld [smem:[#allocation6 + $0x3e]] }
  0x61   :  { %548 = vrot.lane.b32.xlu0 %v1937_v0, %s1852_s9  ;;  %v388_v49 = vmul.f32 %v2028_v14, %v387_v40 }
  0x62   :  { %550 = vrot.lane.b32.xlu1 %v1946_v7, %s1852_s9  ;;  %s1871_s9 = smov 113  }
  0x64   :  { %v389_v47 = vstv %s2037_s8  ;;  %s2360_s8 = sld [smem:[#allocation6 + $0xe]] }
  0x65   :  { %574 = vrot.lane.b32.xlu0 %v1937_v0, %s1853_s10  ;;  %v390_v58 = vmul.f32 %v2032_v15, %v389_v47 }
  0x66   :  { %576 = vrot.lane.b32.xlu1 %v1946_v7, %s1853_s10  ;;  %s2046_s10 = sld [smem:[#allocation6]] }
  0x67   :  { %v2158_v18 = vadd.f32 %v390_v58, %v388_v49 }
  0x69   :  { %600 = vrot.lane.b32.xlu0 %v1937_v0, %s1854_s11 }
  0x6a   :  { %602 = vrot.lane.b32.xlu1 %v1946_v7, %s1854_s11  ;;  %s2048_s11 = sld [smem:[#allocation6 + $0x31]] }
  0x6c   :  { %v257_v50 = vstv %s2046_s10  ;;  %s2379_s10 = sld [smem:[#allocation6 + $0x3f]] }
  0x6d   :  { %626 = vrot.lane.b32.xlu0 %v1937_v0, %s1855_s12  ;;  %v258_v63 = vmul.f32 %v2028_v14, %v257_v50 }
  0x6e   :  { %628 = vrot.lane.b32.xlu1 %v1946_v7, %s1855_s12  ;;  %s2055_s12 = sld [smem:[#allocation6 + $0x6]] }
  0x70   :  { %v259_v51 = vstv %s2048_s11  ;;  %s1881_s11 = smov 94  }
  0x71   :  { %652 = vrot.lane.b32.xlu0 %v1937_v0, %s1856_s13  ;;  %v260_v1 = vmul.f32 %v2032_v15, %v259_v51 }
  0x72   :  { %654 = vrot.lane.b32.xlu1 %v1946_v7, %s1856_s13  ;;  %s2057_s13 = sld [smem:[#allocation6 + $0x37]] }
  0x73   :  { %v261_v22 = vadd.f32 %v260_v1, %v258_v63  ;;  %v571_v1 = vstv %s2291_s3  ;;  %s2505_s3 = sld [smem:[#allocation6 + $0x45]] }
  0x74   :  { %v413_v53 = vstv %s2055_s12  ;;  %s1882_s12 = smov 93  }
  0x75   :  { %678 = vrot.lane.b32.xlu0 %v1937_v0, %s1857_s14  ;;  %v414_v2 = vmul.f32 %v2028_v14, %v413_v53 }
  0x76   :  { %680 = vrot.lane.b32.xlu1 %v1946_v7, %s1857_s14  ;;  %s2063_s14 = sld [smem:[#allocation6 + $0x7]] }
  0x78   :  { %v415_v54 = vstv %s2057_s13  ;;  %s1883_s13 = smov 83  }
  0x79   :  { %704 = vrot.lane.b32.xlu0 %v1937_v0, %s1858_s15  ;;  %v416_v3 = vmul.f32 %v2032_v15, %v415_v54 }
  0x7a   :  { %706 = vrot.lane.b32.xlu1 %v1946_v7, %s1858_s15  ;;  %s2065_s15 = sld [smem:[#allocation6 + $0x38]] }
  0x7b   :  { %v2174_v25 = vadd.f32 %v416_v3, %v414_v2 }
  0x7c   :  { %v439_v55 = vstv %s2063_s14  ;;  %s1884_s14 = smov 82  }
  0x7d   :  { %730 = vrot.lane.b32.xlu0 %v1937_v0, %s1859_s16  ;;  %v440_v4 = vmul.f32 %v2028_v14, %v439_v55 }
  0x7e   :  { %732 = vrot.lane.b32.xlu1 %v1946_v7, %s1859_s16  ;;  %s2071_s16 = sld [smem:[#allocation6 + $0x8]] }
  0x80   :  { %v441_v56 = vstv %s2065_s15  ;;  %s1885_s15 = smov 81  }
  0x81   :  { %756 = vrot.lane.b32.xlu0 %v1937_v0, %s1860_s17  ;;  %v442_v5 = vmul.f32 %v2032_v15, %v441_v56 }
  0x82   :  { %758 = vrot.lane.b32.xlu1 %v1946_v7, %s1860_s17  ;;  %s2073_s17 = sld [smem:[#allocation6 + $0x39]] }
  0x83   :  { %v2190_v31 = vadd.f32 %v442_v5, %v440_v4 }
  0x84   :  { %v465_v59 = vstv %s2071_s16  ;;  %s1886_s16 = smov 80  }
  0x85   :  { %782 = vrot.lane.b32.xlu0 %v1937_v0, %s1861_s18  ;;  %v466_v8 = vmul.f32 %v2028_v14, %v465_v59 }
  0x86   :  { %784 = vrot.lane.b32.xlu1 %v1946_v7, %s1861_s18  ;;  %s1872_s18 = smov 112  }
  0x88   :  { %v467_v60 = vstv %s2073_s17  ;;  %s1887_s17 = smov 79  }
  0x89   :  { %808 = vrot.lane.b32.xlu0 %v1937_v0, %s1862_s19 }
  0x8a   :  { %810 = vrot.lane.b32.xlu1 %v1946_v7, %s1862_s19  ;;  %s2092_s19 = sld [smem:[#allocation6 + $0x9]] }
  0x8d   :  { %834 = vrot.lane.b32.xlu0 %v1937_v0, %s1863_s20 }
  0x8e   :  { %836 = vrot.lane.b32.xlu1 %v1946_v7, %s1863_s20  ;;  %s2094_s20 = sld [smem:[#allocation6 + $0x3a]] }
  0x90   :  { %v491_v13 = vstv %s2092_s19  ;;  %s1639_s19 = sld [smem:[#allocation6 + $0x40]] }
  0x91   :  { %860 = vrot.lane.b32.xlu0 %v1937_v0, %s1864_s21  ;;  %v492_v26 = vmul.f32 %v2028_v14, %v491_v13 }
  0x92   :  { %862 = vrot.lane.b32.xlu1 %v1946_v7, %s1864_s21  ;;  %s1873_s21 = smov 111  }
  0x94   :  { %v493_v16 = vstv %s2094_s20  ;;  %s1888_s20 = smov 78  }
  0x95   :  { %905 = vrot.lane.b32.xlu0 %v1937_v0, %s1865_s23  ;;  %v494_v27 = vmul.f32 %v2032_v15, %v493_v16 }
  0x96   :  { %907 = vrot.lane.b32.xlu1 %v1946_v7, %s1865_s23  ;;  %s2127_s23 = sld [smem:[#allocation6 + $0xa]] }
  0x97   :  { %v2233_v47 = vadd.f32 %v494_v27, %v492_v26 }
  0x99   :  { %931 = vrot.lane.b32.xlu0 %v1937_v0, %s1866_s24 }
  0x9a   :  { %933 = vrot.lane.b32.xlu1 %v1946_v7, %s1866_s24  ;;  %s1874_s24 = smov 110  }
  0x9c   :  { %v517_v33 = vstv %s2127_s23  ;;  %s2481_s23 = sld [smem:[#allocation6 + $0x41]] }
  0x9d   :  { %957 = vrot.lane.b32.xlu0 %v1937_v0, %s1867_s25  ;;  %v518_v49 = vmul.f32 %v2028_v14, %v517_v33 }
  0x9e   :  { %959 = vrot.lane.b32.xlu1 %v1946_v7, %s1867_s25  ;;  %s2152_s25 = sld [smem:[#allocation6 + $0x3b]] }
  0xa1   :  { %983 = vrot.lane.b32.xlu0 %v1937_v0, %s1868_s29 }
  0xa2   :  { %985 = vrot.lane.b32.xlu1 %v1946_v7, %s1868_s29  ;;  %s1877_s29 = smov 98  }
  0xa4   :  { %v519_v50 = vstv %s2152_s25  ;;  %s2487_s25 = sld [smem:[#allocation6 + $0x42]] }
  0xa5   :  { %1009 = vrot.lane.b32.xlu0 %v1937_v0, %s1869_s6 }
  0xa6   :  { %1011 = vrot.lane.b32.xlu1 %v1946_v7, %s1869_s6  ;;  %s2354_s6 = sld [smem:[#allocation6 + $0xd]] }
  0xa7   :  { %v289_v11 = vpop.permute.xlu1 %288  ;;  %v2026_v12 = vpop.permute.xlu0 %262 }
  0xa9   :  { %1035 = vrot.lane.b32.xlu0 %v1937_v0, %s1871_s9 }
  0xaa   :  { %1037 = vrot.lane.b32.xlu1 %v1946_v7, %s1871_s9  ;;  %s1880_s9 = smov 95  }
  0xab   :  { %v315_v24 = vpop.permute.xlu0 %314 }
  0xac   :  { %v291_v29 = vpop.permute.xlu1 %290 }
  0xad   :  { %v2077_v34 = vsel %vm292_vm8, %v289_v11, %v291_v29  ;;  %v2081_v35 = vsel %vm292_vm8, %v291_v29, %v289_v11  ;;  %1061 = vrot.lane.b32.xlu0 %v1937_v0, %s1872_s18  ;;  %v468_v11 = vmul.f32 %v2032_v15, %v467_v60  ;;  %vm422_vm8 = vcmp.lt.s32.totalorder %v2023_v10, 45 }
  0xae   :  { %1063 = vrot.lane.b32.xlu1 %v1946_v7, %s1872_s18  ;;  %v296_v29 = vmul.f32 %v2077_v34, %v2098_v41  ;;  %s1638_s18 = sld [smem:[#allocation6 + $0xf]] }
  0xaf   :  { %v341_v39 = vpop.permute.xlu0 %340  ;;  %v2192_v32 = vadd.f32 %v468_v11, %v466_v8 }
  0xb0   :  { %v317_v43 = vpop.permute.xlu1 %316  ;;  %v302_v51 = vsel %vm218_vm15, %v296_v29, 0.0 }
  0xb1   :  { %v2107_v45 = vsel %vm318_vm9, %v315_v24, %v317_v43  ;;  %v2111_v46 = vsel %vm318_vm9, %v317_v43, %v315_v24  ;;  %1087 = vrot.lane.b32.xlu0 %v1937_v0, %s1873_s21  ;;  %v295_v24 = vmul.f32 %v2081_v35, %v2098_v41  ;;  %vm2204_vm9 = vmand %vm169_vm10, %vm3579_vm3  ;;  %vm175_vm3 = vcmp.ge.s32.totalorder %v2023_v10, 32 }
  0xb2   :  { %1089 = vrot.lane.b32.xlu1 %v1946_v7, %s1873_s21  ;;  %v321_v35 = vmul.f32 %v2111_v46, %v2100_v42  ;;  %v322_v36 = vmul.f32 %v2107_v45, %v2100_v42  ;;  %s2479_s21 = sld [smem:[#allocation6 + $0x10]] }
  0xb3   :  { %v367_v52 = vpop.permute.xlu0 %366 }
  0xb4   :  { %v343_v57 = vpop.permute.xlu1 %342  ;;  %v328_v63 = vsel %vm224_vm1, %v322_v36, 0.0 }
  0xb5   :  { %v2136_v61 = vsel %vm344_vm12, %v341_v39, %v343_v57  ;;  %v2140_v62 = vsel %vm344_vm12, %v343_v57, %v341_v39  ;;  %1113 = vrot.lane.b32.xlu0 %v1937_v0, %s1874_s24  ;;  %vm2183_vm12 = vmand %vm169_vm10, %vm3578_vm11  ;;  %vm474_vm11 = vcmp.lt.s32.totalorder %v2023_v10, 34 }
  0xb6   :  { %1115 = vrot.lane.b32.xlu1 %v1946_v7, %s1874_s24  ;;  %v301_v46 = vsel %vm2183_vm12, %v295_v24, 0.0  ;;  %v348_v3 = vmul.f32 %v2136_v61, %v2102_v44  ;;  %vm2285_vm12 = vmand %vm169_vm10, %vm3580_vm7  ;;  %s2485_s24 = sld [smem:[#allocation6 + $0x11]] }
  0xb7   :  { %v393_v6 = vpop.permute.xlu0 %392 }
  0xb8   :  { %v369_v17 = vpop.permute.xlu1 %368 }
  0xb9   :  { %v371_v20 = vsel %vm370_vm13, %v367_v52, %v369_v17  ;;  %v372_v21 = vsel %vm370_vm13, %v369_v17, %v367_v52  ;;  %1139 = vrot.lane.b32.xlu0 %v1937_v0, %s1875_s26  ;;  %vm3581_vm13 = vcmp.lt.s32.totalorder %v2052_v23, 13  ;;  %v347_v52 = vmul.f32 %v2140_v62, %v2102_v44 }
  0xba   :  { %1141 = vrot.lane.b32.xlu1 %v1946_v7, %s1875_s26  ;;  %v373_v56 = vmul.f32 %v372_v21, %v2117_v48  ;;  %v374_v57 = vmul.f32 %v371_v20, %v2117_v48  ;;  %vm2304_vm7 = vmand %vm169_vm10, %vm3581_vm13  ;;  %s1889_s26 = smov 77  }
  0xbb   :  { %v265_v30 = vpop.permute.xlu0 %264  ;;  %v353_v8 = vsel %vm169_vm10, %v347_v52, 0.0 }
  0xbc   :  { %v395_v37 = vpop.permute.xlu1 %394  ;;  %v267_v39 = vsel %vm266_vm5, %v2026_v12, %v265_v30  ;;  %v268_v40 = vsel %vm266_vm5, %v265_v30, %v2026_v12  ;;  %vm2226_vm5 = vmand %vm169_vm10, %vm223_vm14  ;;  %v380_v44 = vsel %vm3600_vm6, %v374_v57, 0.0 }
  0xbd   :  { %v397_v41 = vsel %vm396_vm0, %v393_v6, %v395_v37  ;;  %v398_v42 = vsel %vm396_vm0, %v395_v37, %v393_v6  ;;  %v269_v43 = vmul.f32 %v268_v40, %v261_v22  ;;  %v270_v45 = vmul.f32 %v267_v39, %v261_v22  ;;  %1165 = vrot.lane.b32.xlu0 %v1937_v0, %s1876_s0 }
  0xbe   :  { %1167 = vrot.lane.b32.xlu1 %v1946_v7, %s1876_s0  ;;  %vm3601_vm0 = vcmp.lt.s32.totalorder %v2089_v38, 13  ;;  %v327_v62 = vsel %vm2226_vm5, %v321_v35, 0.0  ;;  %v520_v6 = vmul.f32 %v2032_v15, %v519_v50  ;;  %v399_v11 = vmul.f32 %v398_v42, %v2158_v18  ;;  %s2490_s0 = sld [smem:[#allocation6 + $0x12]] }
  0xbf   :  { %v275_v53 = vsel %vm2204_vm9, %v269_v43, 0.0  ;;  %v276_v54 = vsel %vm3592_vm4, %v270_v45, 0.0  ;;  %v419_v55 = vpop.permute.xlu0 %418  ;;  %vm2259_vm9 = vmand %vm169_vm10, %vm3599_vm2  ;;  %v400_v13 = vmul.f32 %v397_v41, %v2158_v18  ;;  %vm3614_vm5 = vcmp.lt.s32.totalorder %v2023_v10, 35 }
  0xc0   :  { %v303_v58 = vadd.f32 %v301_v46, %v275_v53  ;;  %v304_v59 = vadd.f32 %v302_v51, %v276_v54  ;;  %v421_v60 = vpop.permute.xlu1 %420  ;;  %v379_v17 = vsel %vm2259_vm9, %v373_v56, 0.0  ;;  %vm3615_vm9 = vmmov %vm3614_vm5  ;;  %v405_v33 = vsel %vm2285_vm12, %v399_v11, 0.0 }
  0xc1   :  { %v423_v48 = vsel %vm422_vm8, %v419_v55, %v421_v60  ;;  %v424_v2 = vsel %vm422_vm8, %v421_v60, %v419_v55  ;;  %1191 = vrot.lane.b32.xlu0 %v1937_v0, %s1877_s29  ;;  %vm500_vm8 = vcmp.lt.s32.totalorder %v2023_v10, 33  ;;  %vm3619_vm10 = vcmp.ge.s32.totalorder %v2052_v23, 3 }
  0xc2   :  { %v329_v4 = vadd.f32 %v327_v62, %v303_v58  ;;  %v330_v5 = vadd.f32 %v328_v63, %v304_v59  ;;  %1193 = vrot.lane.b32.xlu1 %v1946_v7, %s1877_s29  ;;  %v425_v22 = vmul.f32 %v424_v2, %v2174_v25  ;;  %v426_v24 = vmul.f32 %v423_v48, %v2174_v25  ;;  %vm2322_vm13 = vmand %vm175_vm3, %vm3619_vm10  ;;  %s2497_s29 = sld [smem:[#allocation6 + $0x44]] }
  0xc3   :  { %v445_v16 = vpop.permute.xlu0 %444  ;;  %v2309_v25 = vadd.f32 %v520_v6, %v518_v49  ;;  %v543_v43 = vstv %s2247_s27  ;;  %v545_v45 = vstv %s2249_s28  ;;  %vm3622_vm12 = vcmp.ge.s32.totalorder %v2052_v23, 2  ;;  %s2492_s27 = sld [smem:[#allocation6 + $0x43]] }
  0xc4   :  { %v355_v20 = vadd.f32 %v353_v8, %v329_v4  ;;  %v356_v21 = vadd.f32 %v348_v3, %v330_v5  ;;  %v447_v18 = vpop.permute.xlu1 %446  ;;  %v431_v46 = vsel %vm2304_vm7, %v425_v22, 0.0  ;;  %vm2341_vm7 = vmand %vm175_vm3, %vm3622_vm12  ;;  %v544_v58 = vmul.f32 %v2028_v14, %v543_v43  ;;  %s2495_s28 = sld [smem:[#allocation6 + $0x13]] }
  0xc5   :  { %v449_v26 = vsel %vm3614_vm5, %v445_v16, %v447_v18  ;;  %v450_v27 = vsel %vm3615_vm9, %v447_v18, %v445_v16  ;;  %1217 = vrot.lane.b32.xlu0 %v1937_v0, %s1878_s4  ;;  %vm526_vm5 = vcmp.lt.s32.totalorder %v2023_v10, 32  ;;  %vm3618_vm9 = vcmp.lt.s32.totalorder %v2089_v38, 14 }
  0xc6   :  { %v381_v28 = vadd.f32 %v379_v17, %v355_v20  ;;  %v382_v29 = vadd.f32 %v380_v44, %v356_v21  ;;  %1219 = vrot.lane.b32.xlu1 %v1946_v7, %s1878_s4  ;;  %v406_v35 = vsel %vm3618_vm9, %v400_v13, 0.0  ;;  %v451_v36 = vmul.f32 %v450_v27, %v2190_v31  ;;  %s2507_s4 = sld [smem:[#allocation6 + $0x15]] }
  0xc7   :  { %v452_v37 = vmul.f32 %v449_v26, %v2190_v31  ;;  %v471_v34 = vpop.permute.xlu0 %470  ;;  %v432_v31 = vsel %vm3601_vm0, %v426_v24, 0.0  ;;  %v546_v59 = vmul.f32 %v2032_v15, %v545_v45  ;;  %v569_v63 = vstv %s2289_s30  ;;  %s2503_s30 = sld [smem:[#allocation6 + $0x14]] }
  0xc8   :  { %v407_v39 = vadd.f32 %v405_v33, %v381_v28  ;;  %v408_v40 = vadd.f32 %v406_v35, %v382_v29  ;;  %v473_v42 = vpop.permute.xlu1 %472  ;;  %v457_v55 = vsel %vm2322_vm13, %v451_v36, 0.0  ;;  %v570_v17 = vmul.f32 %v2028_v14, %v569_v63 }
  0xc9   :  { %v475_v12 = vsel %vm474_vm11, %v471_v34, %v473_v42  ;;  %v476_v49 = vsel %vm474_vm11, %v473_v42, %v471_v34  ;;  %1243 = vrot.lane.b32.xlu0 %v1937_v0, %s1879_s5  ;;  %v458_v56 = vsel %vm3592_vm4, %v452_v37, 0.0  ;;  %vm2370_vm11 = vmand %vm175_vm3, %vm223_vm14  ;;  %v572_v44 = vmul.f32 %v2032_v15, %v571_v1 }
  0xca   :  { %v433_v50 = vadd.f32 %v431_v46, %v407_v39  ;;  %v434_v51 = vadd.f32 %v432_v31, %v408_v40  ;;  %v477_v53 = vmul.f32 %v476_v49, %v2192_v32  ;;  %v478_v54 = vmul.f32 %v475_v12, %v2192_v32  ;;  %1245 = vrot.lane.b32.xlu1 %v1946_v7, %s1879_s5  ;;  %s2509_s5 = sld [smem:[#allocation6 + $0x46]] }
  0xcb   :  { %v497_v57 = vpop.permute.xlu0 %496  ;;  %v547_v28 = vadd.f32 %v546_v59, %v544_v58  ;;  %vm552_vm13 = vcmp.lt.s32.totalorder %v2023_v10, 31  ;;  %v573_v30 = vadd.f32 %v572_v44, %v570_v17  ;;  %v595_v33 = vstv %s2354_s6  ;;  %s2511_s6 = sld [smem:[#allocation6 + $0x16]] }
  0xcc   :  { %v459_v60 = vadd.f32 %v457_v55, %v433_v50  ;;  %v460_v62 = vadd.f32 %v458_v56, %v434_v51  ;;  %v499_v32 = vpop.permute.xlu1 %498  ;;  %v483_v48 = vsel %vm2341_vm7, %v477_v53, 0.0  ;;  %v484_v2 = vsel %vm218_vm15, %v478_v54, 0.0 }
  0xcd   :  { %v501_v4 = vsel %vm500_vm8, %v497_v57, %v499_v32  ;;  %v502_v5 = vsel %vm500_vm8, %v499_v32, %v497_v57  ;;  %1269 = vrot.lane.b32.xlu0 %v1937_v0, %s1880_s9  ;;  %v597_v35 = vstv %s2356_s7  ;;  %vm578_vm8 = vcmp.lt.s32.totalorder %v2023_v10, 30  ;;  %s2513_s7 = sld [smem:[#allocation6 + $0x47]] }
  0xce   :  { %v485_v6 = vadd.f32 %v483_v48, %v459_v60  ;;  %v486_v8 = vadd.f32 %v484_v2, %v460_v62  ;;  %v503_v11 = vmul.f32 %v502_v5, %v2233_v47  ;;  %v504_v13 = vmul.f32 %v501_v4, %v2233_v47  ;;  %1271 = vrot.lane.b32.xlu1 %v1946_v7, %s1880_s9  ;;  %s2521_s9 = sld [smem:[#allocation6 + $0x49]] }
  0xcf   :  { %v523_v16 = vpop.permute.xlu0 %522  ;;  %v621_v39 = vstv %s2360_s8  ;;  %v623_v43 = vstv %s2379_s10  ;;  %v596_v31 = vmul.f32 %v2028_v14, %v595_v33  ;;  %v598_v12 = vmul.f32 %v2032_v15, %v597_v35  ;;  %s2519_s8 = sld [smem:[#allocation6 + $0x18]]  ;;  %s2529_s10 = sld [smem:[#allocation6 + $0x17]] }
  0xd0   :  { %v509_v61 = vsel %vm2370_vm11, %v503_v11, 0.0  ;;  %v510_v20 = vsel %vm224_vm1, %v504_v13, 0.0  ;;  %v525_v21 = vpop.permute.xlu1 %524  ;;  %v622_v53 = vmul.f32 %v2028_v14, %v621_v39  ;;  %v624_v54 = vmul.f32 %v2032_v15, %v623_v43 }
  0xd1   :  { %v511_v18 = vadd.f32 %v509_v61, %v485_v6  ;;  %v512_v22 = vadd.f32 %v510_v20, %v486_v8  ;;  %v527_v47 = vsel %vm526_vm5, %v523_v16, %v525_v21  ;;  %v528_v24 = vsel %vm526_vm5, %v525_v21, %v523_v16  ;;  %1295 = vrot.lane.b32.xlu0 %v1937_v0, %s1881_s11  ;;  %vm2409_vm5 = vmand %vm175_vm3, %vm3599_vm2 }
  0xd2   :  { %v529_v26 = vmul.f32 %v528_v24, %v2309_v25  ;;  %v530_v27 = vmul.f32 %v527_v47, %v2309_v25  ;;  %1297 = vrot.lane.b32.xlu1 %v1946_v7, %s1881_s11  ;;  %vm3629_vm9 = vcmp.lt.s32.totalorder %v2052_v23, 14  ;;  %v599_v62 = vadd.f32 %v598_v12, %v596_v31  ;;  %s2531_s11 = sld [smem:[#allocation6 + $0x48]] }
  0xd3   :  { %v549_v29 = vpop.permute.xlu0 %548  ;;  %vm565_vm10 = vmand %vm175_vm3, %vm3629_vm9  ;;  %vm604_vm12 = vcmp.lt.s32.totalorder %v2023_v10, 29  ;;  %vm3630_vm7 = vcmp.lt.s32.totalorder %v2089_v38, 14  ;;  %v625_v2 = vadd.f32 %v624_v54, %v622_v53  ;;  %vm3631_vm11 = vcmp.lt.s32.totalorder %v2052_v23, 13 }
  0xd4   :  { %v535_v36 = vsel %vm175_vm3, %v529_v26, 0.0  ;;  %v538_v37 = vadd.f32 %v530_v27, %v512_v22  ;;  %v551_v34 = vpop.permute.xlu1 %550  ;;  %v647_v25 = vstv %s1638_s18  ;;  %v673_v31 = vstv %s2479_s21  ;;  %s2565_s18 = sld [smem:[#allocation6 + $0x1c]]  ;;  %s2577_s21 = sld [smem:[#allocation6 + $0x4e]] }
  0xd5   :  { %v537_v40 = vadd.f32 %v535_v36, %v511_v18  ;;  %v553_v41 = vsel %vm552_vm13, %v549_v29, %v551_v34  ;;  %v554_v42 = vsel %vm552_vm13, %v551_v34, %v549_v29  ;;  %1321 = vrot.lane.b32.xlu0 %v1937_v0, %s1882_s12  ;;  %vm591_vm13 = vmand %vm175_vm3, %vm3631_vm11  ;;  %vm3632_vm3 = vcmp.ge.s32.totalorder %v2052_v23, 3 }
  0xd6   :  { %v555_v45 = vmul.f32 %v554_v42, %v547_v28  ;;  %v556_v46 = vmul.f32 %v553_v41, %v547_v28  ;;  %1323 = vrot.lane.b32.xlu1 %v1946_v7, %s1882_s12  ;;  %v649_v41 = vstv %s1639_s19  ;;  %v648_v43 = vmul.f32 %v2028_v14, %v647_v25  ;;  %s2539_s12 = sld [smem:[#allocation6 + $0x19]]  ;;  %s2567_s19 = sld [smem:[#allocation6 + $0x4d]] }
  0xd7   :  { %v575_v49 = vpop.permute.xlu0 %574  ;;  %v675_v12 = vstv %s2481_s23  ;;  %v674_v53 = vmul.f32 %v2028_v14, %v673_v31  ;;  %s2585_s23 = sld [smem:[#allocation6 + $0x1e]]  ;;  %vm734_vm11 = vcmp.lt.s32.totalorder %v2023_v10, 15 }
  0xd8   :  { %v561_v50 = vsel %vm2409_vm5, %v555_v45, 0.0  ;;  %v562_v51 = vsel %vm3600_vm6, %v556_v46, 0.0  ;;  %v577_v52 = vpop.permute.xlu1 %576  ;;  %vm630_vm5 = vcmp.lt.s32.totalorder %v2023_v10, 19  ;;  %v650_v45 = vmul.f32 %v2032_v15, %v649_v41 }
  0xd9   :  { %v563_v55 = vadd.f32 %v561_v50, %v537_v40  ;;  %v564_v56 = vadd.f32 %v562_v51, %v538_v37  ;;  %v579_v57 = vsel %vm578_vm8, %v575_v49, %v577_v52  ;;  %v580_v58 = vsel %vm578_vm8, %v577_v52, %v575_v49  ;;  %1347 = vrot.lane.b32.xlu0 %v1937_v0, %s1883_s13 }
  0xda   :  { %v581_v59 = vmul.f32 %v580_v58, %v573_v30  ;;  %v582_v60 = vmul.f32 %v579_v57, %v573_v30  ;;  %1349 = vrot.lane.b32.xlu1 %v1946_v7, %s1883_s13  ;;  %vm181_vm8 = vcmp.ge.s32.totalorder %v2023_v10, 16  ;;  %v699_v50 = vstv %s2485_s24  ;;  %s2541_s13 = sld [smem:[#allocation6 + $0x4a]]  ;;  %s2587_s24 = sld [smem:[#allocation6 + $0x4f]] }
  0xdb   :  { %v601_v32 = vpop.permute.xlu0 %600  ;;  %vm617_vm9 = vmand %vm181_vm8, %vm3632_vm3  ;;  %v701_v51 = vstv %s2487_s25  ;;  %v2533_v52 = vadd.f32 %v650_v45, %v648_v43  ;;  %v676_v54 = vmul.f32 %v2032_v15, %v675_v12  ;;  %v725_v58 = vstv %s2490_s0  ;;  %s2593_s25 = sld [smem:[#allocation6 + $0x1f]]  ;;  %s2602_s0 = sld [smem:[#allocation6 + $0x20]] }
  0xdc   :  { %v587_v63 = vsel %vm565_vm10, %v581_v59, 0.0  ;;  %v588_v1 = vsel %vm3630_vm7, %v582_v60, 0.0  ;;  %v603_v48 = vpop.permute.xlu1 %602  ;;  %v702_v57 = vmul.f32 %v2032_v15, %v701_v51  ;;  %v727_v59 = vstv %s2492_s27  ;;  %s2604_s27 = sld [smem:[#allocation6 + $0x51]] }
  0xdd   :  { %v589_v3 = vadd.f32 %v587_v63, %v563_v55  ;;  %v590_v4 = vadd.f32 %v588_v1, %v564_v56  ;;  %v605_v5 = vsel %vm604_vm12, %v601_v32, %v603_v48  ;;  %v606_v6 = vsel %vm604_vm12, %v603_v48, %v601_v32  ;;  %1373 = vrot.lane.b32.xlu0 %v1937_v0, %s1884_s14 }
  0xde   :  { %v607_v8 = vmul.f32 %v606_v6, %v599_v62  ;;  %v608_v11 = vmul.f32 %v605_v5, %v599_v62  ;;  %1375 = vrot.lane.b32.xlu1 %v1946_v7, %s1884_s14  ;;  %v700_v56 = vmul.f32 %v2028_v14, %v699_v50  ;;  %s2549_s14 = sld [smem:[#allocation6 + $0x1a]]  ;;  %v751_v62 = vstv %s2495_s28  ;;  %s2631_s28 = sld [smem:[#allocation6 + $0x21]] }
  0xdf   :  { %v627_v13 = vpop.permute.xlu0 %626  ;;  %v753_v32 = vstv %s2497_s29  ;;  %v777_v63 = vstv %s2503_s30  ;;  %v779_v1 = vstv %s2505_s3  ;;  %v803_v48 = vstv %s2507_s4  ;;  %s2639_s29 = sld [smem:[#allocation6 + $0x52]]  ;;  %s2650_s3 = sld [smem:[#allocation6 + $0x53]] }
  0xe0   :  { %v613_v16 = vsel %vm591_vm13, %v607_v8, 0.0  ;;  %v614_v17 = vsel %vm3601_vm0, %v608_v11, 0.0  ;;  %v629_v44 = vpop.permute.xlu1 %628  ;;  %v726_v5 = vmul.f32 %v2028_v14, %v725_v58  ;;  %v728_v6 = vmul.f32 %v2032_v15, %v727_v59  ;;  %s2641_s30 = sld [smem:[#allocation6 + $0x22]]  ;;  %s2656_s4 = sld [smem:[#allocation6 + $0x23]] }
  0xe1   :  { %v615_v61 = vadd.f32 %v613_v16, %v589_v3  ;;  %v616_v20 = vadd.f32 %v614_v17, %v590_v4  ;;  %v631_v21 = vsel %vm630_vm5, %v627_v13, %v629_v44  ;;  %v632_v18 = vsel %vm630_vm5, %v629_v44, %v627_v13  ;;  %1399 = vrot.lane.b32.xlu0 %v1937_v0, %s1885_s15 }
  0xe2   :  { %v633_v22 = vmul.f32 %v632_v18, %v625_v2  ;;  %v634_v47 = vmul.f32 %v631_v21, %v625_v2  ;;  %1401 = vrot.lane.b32.xlu1 %v1946_v7, %s1885_s15  ;;  %s2551_s15 = sld [smem:[#allocation6 + $0x4b]]  ;;  %v805_v2 = vstv %s2509_s5  ;;  %v829_v3 = vstv %s2511_s6  ;;  %s2658_s5 = sld [smem:[#allocation6 + $0x54]] }
  0xe3   :  { %v2453_v24 = vpop.permute.xlu0 %652  ;;  %v831_v4 = vstv %s2513_s7  ;;  %v881_v11 = vstv %s2519_s8  ;;  %v883_v13 = vstv %s2521_s9  ;;  %v752_v16 = vmul.f32 %v2028_v14, %v751_v62  ;;  %s2665_s6 = sld [smem:[#allocation6 + $0x24]]  ;;  %s2667_s7 = sld [smem:[#allocation6 + $0x55]] }
  0xe4   :  { %v639_v26 = vsel %vm617_vm9, %v633_v22, 0.0  ;;  %v640_v27 = vsel %vm3592_vm4, %v634_v47, 0.0  ;;  %v2457_v28 = vpop.permute.xlu1 %654  ;;  %v754_v17 = vmul.f32 %v2032_v15, %v753_v32  ;;  %v778_v44 = vmul.f32 %v2028_v14, %v777_v63  ;;  %s2675_s8 = sld [smem:[#allocation6 + $0x25]]  ;;  %s2677_s9 = sld [smem:[#allocation6 + $0x56]] }
  0xe5   :  { %v2459_v29 = vadd.f32 %v639_v26, %v615_v61  ;;  %v2461_v30 = vadd.f32 %v640_v27, %v616_v20  ;;  %1425 = vrot.lane.b32.xlu0 %v1937_v0, %s1886_s16  ;;  %v780_v61 = vmul.f32 %v2032_v15, %v779_v1  ;;  %v804_v21 = vmul.f32 %v2028_v14, %v803_v48 }
  0xe6   :  { %1427 = vrot.lane.b32.xlu1 %v1946_v7, %s1886_s16  ;;  %s2557_s16 = sld [smem:[#allocation6 + $0x1b]]  ;;  %v806_v18 = vmul.f32 %v2032_v15, %v805_v2  ;;  %v830_v22 = vmul.f32 %v2028_v14, %v829_v3  ;;  %v832_v47 = vmul.f32 %v2032_v15, %v831_v4  ;;  %v2597_v26 = vadd.f32 %v676_v54, %v674_v53 }
  0xe7   :  { %v2465_v33 = vpop.permute.xlu0 %678  ;;  %v855_v27 = vstv %s2529_s10  ;;  %v882_v25 = vmul.f32 %v2028_v14, %v881_v11  ;;  %v884_v41 = vmul.f32 %v2032_v15, %v883_v13  ;;  %v2606_v43 = vadd.f32 %v702_v57, %v700_v56  ;;  %s2686_s10 = sld [smem:[#allocation6 + $0x26]] }
  0xe8   :  { %v2467_v35 = vpop.permute.xlu1 %680  ;;  %v857_v45 = vstv %s2531_s11  ;;  %v900_v12 = vstv %s2539_s12  ;;  %v902_v50 = vstv %s2541_s13  ;;  %v2613_v51 = vadd.f32 %v728_v6, %v726_v5  ;;  %s2688_s11 = sld [smem:[#allocation6 + $0x57]]  ;;  %s2731_s13 = sld [smem:[#allocation6 + $0x58]] }
  0xe9   :  { %1451 = vrot.lane.b32.xlu0 %v1937_v0, %s1887_s17  ;;  %v2615_v53 = vadd.f32 %v754_v17, %v752_v16  ;;  %v926_v58 = vstv %s2549_s14  ;;  %v928_v59 = vstv %s2551_s15  ;;  %v2621_v62 = vadd.f32 %v780_v61, %v778_v44  ;;  %s2724_s12 = sld [smem:[#allocation6 + $0x27]]  ;;  %s2738_s14 = sld [smem:[#allocation6 + $0x28]] }
  0xea   :  { %1453 = vrot.lane.b32.xlu1 %v1946_v7, %s1887_s17  ;;  %s2559_s17 = sld [smem:[#allocation6 + $0x4c]]  ;;  %v2623_v32 = vadd.f32 %v806_v18, %v804_v21  ;;  %v2625_v56 = vadd.f32 %v832_v47, %v830_v22  ;;  %v856_v57 = vmul.f32 %v2028_v14, %v855_v27  ;;  %v858_v63 = vmul.f32 %v2032_v15, %v857_v45  ;;  %s2766_s15 = sld [smem:[#allocation6 + $0x59]] }
  0xeb   :  { %v2471_v36 = vpop.permute.xlu0 %704  ;;  %v885_v1 = vadd.f32 %v884_v41, %v882_v25  ;;  %v901_v48 = vmul.f32 %v2028_v14, %v900_v12  ;;  %v903_v2 = vmul.f32 %v2032_v15, %v902_v50  ;;  %v927_v4 = vmul.f32 %v2028_v14, %v926_v58 }
  0xec   :  { %v2473_v37 = vpop.permute.xlu1 %706  ;;  %v929_v5 = vmul.f32 %v2032_v15, %v928_v59  ;;  %v952_v6 = vstv %s2557_s16  ;;  %vm656_vm10 = vcmp.lt.s32.totalorder %v2023_v10, 18  ;;  %v978_v16 = vstv %s2565_s18  ;;  %s2802_s16 = sld [smem:[#allocation6 + $0x29]]  ;;  %s2896_s18 = sld [smem:[#allocation6 + $0x2a]] }
  0xed   :  { %1477 = vrot.lane.b32.xlu0 %v1937_v0, %s1888_s20  ;;  %v980_v17 = vstv %s2567_s19  ;;  %v1006_v61 = vstv %s2577_s21  ;;  %v1030_v21 = vstv %s2585_s23  ;;  %vm682_vm12 = vcmp.lt.s32.totalorder %v2023_v10, 17  ;;  %s2909_s19 = sld [smem:[#allocation6 + $0x5b]]  ;;  %s2935_s21 = sld [smem:[#allocation6 + $0x5c]] }
  0xee   :  { %1479 = vrot.lane.b32.xlu1 %v1946_v7, %s1888_s20  ;;  %s2575_s20 = sld [smem:[#allocation6 + $0x1d]]  ;;  %v1032_v18 = vstv %s2587_s24  ;;  %v1056_v22 = vstv %s2593_s25  ;;  %v953_v27 = vmul.f32 %v2028_v14, %v952_v6  ;;  %v1082_v41 = vstv %s2602_s0  ;;  %s2974_s23 = sld [smem:[#allocation6 + $0x2c]] }
  0xef   :  { %v2477_v34 = vpop.permute.xlu0 %730  ;;  %v1084_v45 = vstv %s2604_s27  ;;  %v979_v50 = vmul.f32 %v2028_v14, %v978_v16  ;;  %v981_v58 = vmul.f32 %v2032_v15, %v980_v17  ;;  %v1007_v9 = vmul.f32 %v2032_v15, %v1006_v61  ;;  %s2986_s24 = sld [smem:[#allocation6 + $0x5d]]  ;;  %s3061_s0 = sld [smem:[#allocation6 + $0x2e]] }
  0xf0   :  { %v2483_v39 = vpop.permute.xlu1 %732  ;;  %v954_v11 = vstv %s2559_s17  ;;  %vm708_vm7 = vcmp.lt.s32.totalorder %v2023_v10, 16  ;;  %v1033_v19 = vmul.f32 %v2032_v15, %v1032_v18  ;;  %v1057_v16 = vmul.f32 %v2028_v14, %v1056_v22  ;;  %s2849_s17 = sld [smem:[#allocation6 + $0x5a]]  ;;  %s3011_s25 = sld [smem:[#allocation6 + $0x2d]] }
  0xf1   :  { %1503 = vrot.lane.b32.xlu0 %v1937_v0, %s1889_s26  ;;  %v955_v25 = vmul.f32 %v2032_v15, %v954_v11  ;;  %v1031_v11 = vmul.f32 %v2028_v14, %v1030_v21  ;;  %v2692_v61 = vadd.f32 %v903_v2, %v901_v48  ;;  %v1085_v21 = vmul.f32 %v2032_v15, %v1084_v45  ;;  %s3084_s27 = sld [smem:[#allocation6 + $0x5f]] }
  0xf2   :  { %1505 = vrot.lane.b32.xlu1 %v1946_v7, %s1889_s26  ;;  %s2595_s26 = sld [smem:[#allocation6 + $0x50]]  ;;  %v2698_v18 = vmul.f32 %v885_v1, %v1937_v0  ;;  %v2701_v22 = vmul.f32 %v885_v1, %v1946_v7  ;;  %v2710_v2 = vadd.f32 %v981_v58, %v979_v50  ;;  %v1134_v45 = vstv %s2641_s30 }
  0xf3   :  { %v2499_v40 = vpop.permute.xlu0 %756  ;;  %vm760_vm13 = vcmp.lt.s32.totalorder %v2023_v10, 14  ;;  %v2719_v1 = vadd.f32 %v1033_v19, %v1031_v11  ;;  %v1160_v50 = vstv %s2656_s4  ;;  %v1162_v58 = vstv %s2658_s5  ;;  %s3330_s30 = sld [smem:[#allocation6 + $0x30]]  ;;  %s1891_s4 = smov [#allocation7]  }
  0xf4   :  { %v2501_v42 = vpop.permute.xlu1 %758  ;;  %v1004_v44 = vstv %s2575_s20  ;;  %3634 = vst [vmem:[#allocation14_spill] sm:$0xff] %v2701_v22  ;;  %3636 = vst [vmem:[#allocation16_spill] sm:$0xff] %v2710_v2  ;;  %vm786_vm5 = vcmp.lt.s32.totalorder %v2023_v10, 13  ;;  %v1135_v19 = vmul.f32 %v2028_v14, %v1134_v45  ;;  %v1188_v11 = vstv %s2667_s7  ;;  %s2924_s20 = sld [smem:[#allocation6 + $0x2b]]  ;;  %s1594_s5 = sshll.u32 %s1891_s4, 4  ;;  %s1595_s5 = int_to_ptr.vmem [resolvable:$true] %s1594_s5 }
  0xf5   :  { %v1005_v59 = vmul.f32 %v2028_v14, %v1004_v44  ;;  %v2690_v44 = vadd.f32 %v858_v63, %v856_v57  ;;  %v1108_v57 = vstv %s2631_s28  ;;  %v2706_v63 = vadd.f32 %v955_v25, %v953_v27  ;;  %3638 = vst [vmem:[#allocation18_spill] sm:$0xff] %v2719_v1  ;;  %s3247_s28 = sld [smem:[#allocation6 + $0x2f]]  ;;  %p1814_p0 = scmp.lt.s32.totalorder %s1595_s5, %s1595_s5 }
  0xf6   :  { %v1109_v25 = vmul.f32 %v2028_v14, %v1108_v57  ;;  %v1214_v57 = vstv %s2677_s9  ;;  %vm812_vm3 = vcmp.lt.s32.totalorder %v2023_v10, 3  ;;  %v1161_v45 = vmul.f32 %v2028_v14, %v1160_v50 }
  0xf7   :  { %v2517_v46 = vpop.permute.xlu0 %782  ;;  %3635 = vst [vmem:[#allocation15_spill] sm:$0xff] %v2706_v63  ;;  %v2717_v7 = vadd.f32 %v1007_v9, %v1005_v59  ;;  %v1186_v59 = vstv %s2665_s6  ;;  %v1240_v1 = vstv %s2688_s11  ;;  %v1189_v2 = vmul.f32 %v2032_v15, %v1188_v11  ;;  %s1809_s6 = scalar_lea.vmem %s1595_s5, 256 }
  0xf8   :  { %v2525_v49 = vpop.permute.xlu1 %784  ;;  %v1058_v47 = vstv %s2595_s26  ;;  %v1187_v22 = vmul.f32 %v2028_v14, %v1186_v59  ;;  %vm838_vm9 = vcmp.lt.s32.totalorder %v2023_v10, 2  ;;  %v683_v11 = vsel %vm682_vm12, %v2465_v33, %v2467_v35  ;;  %s3020_s26 = sld [smem:[#allocation6 + $0x5e]]  ;;  %p1810_p13 = scmp.ne.s32.totalorder %s1595_s5, %s1809_s6 }
  0xf9   :  { %v1059_v17 = vmul.f32 %v2032_v15, %v1058_v47  ;;  %v2703_v47 = vadd.f32 %v929_v5, %v927_v4  ;;  %3637 = vst [vmem:[#allocation17_spill] sm:$0xff] %v2717_v7  ;;  %v1136_v5 = vstv %s2650_s3  ;;  %v657_v7 = vsel %vm656_vm10, %v2453_v24, %v2457_v28  ;;  %s3392_s3 = sld [smem:[#allocation6 + $0x61]]  ;;  %p1815_p1 = scmp.lt.s32.totalorder %s1809_s6, %s1809_s6 }
  0xfa   :  { %v1264_v63 = vstv %s2724_s12 }
  0xfb   :  { %v2537_v55 = vpop.permute.xlu0 %808  ;;  %v2721_v4 = vadd.f32 %v1059_v17, %v1057_v16  ;;  %v1137_v17 = vmul.f32 %v2032_v15, %v1136_v5  ;;  %v684_v5 = vsel %vm682_vm12, %v2467_v35, %v2465_v33  ;;  %vm2808_vm12 = vmand %vm181_vm8, %vm223_vm14  ;;  %p1816_p2 = por %p1815_p1, %p1814_p0 }
  0xfc   :  { %v2547_v60 = vpop.permute.xlu1 %810 }
  0xfd   :  { %3639 = vst [vmem:[#allocation19_spill] sm:$0xff] %v2721_v4  ;;  %v1163_v4 = vmul.f32 %v2032_v15, %v1162_v58  ;;  %v2799_v35 = vadd.f32 %v1137_v17, %v1135_v19  ;;  %v1266_v19 = vstv %s2731_s13  ;;  %p1817_p3 = pnand %p1816_p2, %p1810_p13 }
  0xff   :  { %v2571_v8 = vpop.permute.xlu0 %834  ;;  %3648 = vst [vmem:[#allocation25_spill] sm:$0xff] %v2799_v35 }
 0x100   :  { %v2583_v20 = vpop.permute.xlu1 %836 }
 0x103   :  { %v2609_v31 = vpop.permute.xlu0 %860 }
 0x104   :  { %v2617_v54 = vpop.permute.xlu1 %862 }
 0x107   :  { %v2633_v3 = vpop.permute.xlu0 %905 }
 0x108   :  { %v2644_v13 = vpop.permute.xlu1 %907 }
 0x10b   :  { %v2669_v12 = vpop.permute.xlu0 %931 }
 0x10c   :  { %3633 = vst [vmem:[#allocation13_spill] sm:$0xff] %v2669_v12  ;;  %v2680_v6 = vpop.permute.xlu1 %933  ;;  %v1083_v12 = vmul.f32 %v2028_v14, %v1082_v41  ;;  %v1110_v41 = vstv %s2639_s29  ;;  %s3320_s29 = sld [smem:[#allocation6 + $0x60]] }
 0x10d   :  { %v1111_v9 = vmul.f32 %v2032_v15, %v1110_v41 }
 0x10e   :  { %v2726_v27 = vadd.f32 %v1085_v21, %v1083_v12  ;;  %v658_v12 = vsel %vm656_vm10, %v2457_v28, %v2453_v24  ;;  %v1212_v21 = vstv %s2675_s8  ;;  %v1215_v28 = vmul.f32 %v2032_v15, %v1214_v57 }
 0x10f   :  { %v2708_v48 = vpop.permute.xlu0 %957  ;;  %v659_v50 = vmul.f32 %v658_v12, %v2533_v52  ;;  %v2770_v58 = vadd.f32 %v1111_v9, %v1109_v25  ;;  %v1213_v24 = vmul.f32 %v2028_v14, %v1212_v21  ;;  %vm3643_vm10 = vcmp.ge.s32.totalorder %v2052_v23, 2 }
 0x110   :  { %v2715_v0 = vpop.permute.xlu1 %959  ;;  %3640 = vst [vmem:[#allocation20_spill] sm:$0xff] %v2726_v27  ;;  %v1238_v27 = vstv %s2686_s10  ;;  %vm2778_vm4 = vmand %vm181_vm8, %vm3643_vm10  ;;  %v710_v25 = vsel %vm708_vm7, %v2473_v37, %v2471_v36  ;;  %v1241_v21 = vmul.f32 %v2032_v15, %v1240_v1  ;;  %v660_v57 = vmul.f32 %v657_v7, %v2533_v52 }
 0x111   :  { %3642 = vst [vmem:[#allocation22_spill] sm:$0xff] %v2770_v58  ;;  %v1239_v12 = vmul.f32 %v2028_v14, %v1238_v27  ;;  %v685_v58 = vmul.f32 %v684_v5, %v2597_v26  ;;  %vm864_vm10 = vcmp.lt.s32.totalorder %v2023_v10, 1  ;;  %v736_v52 = vsel %vm734_vm11, %v2483_v39, %v2477_v34 }
 0x112   :  { %v2816_v7 = vadd.f32 %v1163_v4, %v1161_v45  ;;  %v2818_v27 = vadd.f32 %v1189_v2, %v1187_v22  ;;  %v665_v17 = vsel %vm2778_vm4, %v659_v50, 0.0  ;;  %v686_v5 = vmul.f32 %v683_v11, %v2597_v26  ;;  %vm2856_vm4 = vmand %vm181_vm8, %vm3599_vm2 }
 0x113   :  { %v2744_v16 = vpop.permute.xlu0 %983  ;;  %v711_v35 = vmul.f32 %v710_v25, %v2606_v43  ;;  %v2832_v4 = vadd.f32 %v1215_v28, %v1213_v24  ;;  %v2834_v22 = vadd.f32 %v1241_v21, %v1239_v12  ;;  %v2837_v2 = vmul.f32 %v2028_v14, %v1264_v63 }
 0x114   :  { %3641 = vst [vmem:[#allocation21_spill] sm:$0xff] %v2744_v16  ;;  %v2750_v41 = vpop.permute.xlu1 %985  ;;  %v666_v26 = vsel %vm218_vm15, %v660_v57, 0.0  ;;  %v691_v45 = vsel %vm2808_vm12, %v685_v58, 0.0  ;;  %v737_v50 = vmul.f32 %v736_v52, %v2613_v51  ;;  %v2847_v11 = vmul.f32 %v2032_v15, %v1266_v19 }
 0x115   :  { %v667_v24 = vadd.f32 %v665_v17, %v2459_v29  ;;  %v788_v58 = vsel %vm786_vm5, %v2525_v49, %v2517_v46  ;;  %v1292_v25 = vstv %s2766_s15  ;;  %v692_v29 = vsel %vm224_vm1, %v686_v5, 0.0 }
 0x116   :  { %v717_v12 = vsel %vm181_vm8, %v711_v35, 0.0  ;;  %v735_v21 = vsel %vm734_vm11, %v2477_v34, %v2483_v39  ;;  %v668_v1 = vadd.f32 %v666_v26, %v2461_v30  ;;  %vm3653_vm12 = vcmp.lt.s32.totalorder %v2052_v23, 14 }
 0x117   :  { %v2790_v9 = vpop.permute.xlu0 %1009  ;;  %v693_v52 = vadd.f32 %v691_v45, %v667_v24  ;;  %vm2886_vm2 = vmand %vm181_vm8, %vm3653_vm12  ;;  %v814_v34 = vsel %vm812_vm3, %v2547_v60, %v2537_v55  ;;  %v789_v39 = vmul.f32 %v788_v58, %v2621_v62  ;;  %v1316_v19 = vstv %s2802_s16 }
 0x118   :  { %3646 = vst [vmem:[#allocation23_spill] sm:$0xff] %v2790_v9  ;;  %v2797_v33 = vpop.permute.xlu1 %1011  ;;  %v1290_v9 = vstv %s2738_s14  ;;  %v694_v17 = vadd.f32 %v692_v29, %v668_v1  ;;  %v738_v26 = vmul.f32 %v735_v21, %v2613_v51  ;;  %vm3656_vm11 = vcmp.lt.s32.totalorder %v2052_v23, 13 }
 0x119   :  { %3647 = vst [vmem:[#allocation24_spill] sm:$0xff] %v2797_v33  ;;  %v762_v33 = vsel %vm760_vm13, %v2501_v42, %v2499_v40  ;;  %v2865_v28 = vmul.f32 %v2028_v14, %v1290_v9  ;;  %v709_v9 = vsel %vm708_vm7, %v2471_v36, %v2473_v37  ;;  %v743_v36 = vsel %vm2856_vm4, %v737_v50, 0.0  ;;  %vm2916_vm4 = vmand %vm181_vm8, %vm3656_vm11 }
 0x11a   :  { %v763_v57 = vmul.f32 %v762_v33, %v2615_v53  ;;  %v761_v37 = vsel %vm760_vm13, %v2499_v40, %v2501_v42  ;;  %vm909_vm7 = vcmp.lt.s32.totalorder %v2023_v10, 127  ;;  %v719_v5 = vadd.f32 %v717_v12, %v693_v52 }
 0x11b   :  { %v2830_v16 = vpop.permute.xlu0 %1035  ;;  %v840_v40 = vsel %vm838_vm9, %v2583_v20, %v2571_v8  ;;  %v712_v42 = vmul.f32 %v709_v9, %v2606_v43  ;;  %v787_v50 = vsel %vm786_vm5, %v2517_v46, %v2525_v49  ;;  %v815_v24 = vmul.f32 %v814_v34, %v2623_v32 }
 0x11c   :  { %v2844_v59 = vpop.permute.xlu1 %1037  ;;  %v769_v51 = vsel %vm2886_vm2, %v763_v57, 0.0  ;;  %vm935_vm8 = vcmp.lt.s32.totalorder %v2023_v10, 126  ;;  %v745_v63 = vadd.f32 %v743_v36, %v719_v5  ;;  %v764_v58 = vmul.f32 %v761_v37, %v2615_v53 }
 0x11d   :  { %v866_v43 = vsel %vm864_vm10, %v2617_v54, %v2609_v31  ;;  %v1293_v12 = vmul.f32 %v2032_v15, %v1292_v25  ;;  %v795_v46 = vsel %vm2916_vm4, %v789_v39, 0.0  ;;  %v813_v49 = vsel %vm812_vm3, %v2537_v55, %v2547_v60 }
 0x11e   :  { %v841_v21 = vmul.f32 %v840_v40, %v2625_v56  ;;  %vm961_vm2 = vcmp.lt.s32.totalorder %v2023_v10, 125  ;;  %v1318_v57 = vstv %s2849_s17  ;;  %v744_v1 = vsel %vm3600_vm6, %v738_v26, 0.0 }
 0x11f   :  { %v2894_v30 = vpop.permute.xlu0 %1061  ;;  %v771_v25 = vadd.f32 %v769_v51, %v745_v63  ;;  %v790_v52 = vmul.f32 %v787_v50, %v2621_v62  ;;  %v1317_v9 = vmul.f32 %v2028_v14, %v1316_v19  ;;  %v720_v35 = vadd.f32 %v712_v42, %v694_v17 }
 0x120   :  { %v2906_v33 = vpop.permute.xlu1 %1063  ;;  %vm3659_vm13 = vcmp.ge.s32.totalorder %v2052_v23, 3  ;;  %v839_v60 = vsel %vm838_vm9, %v2571_v8, %v2583_v20  ;;  %v867_v34 = vmul.f32 %v866_v43, %v2690_v44  ;;  %vm987_vm5 = vcmp.lt.s32.totalorder %v2023_v10, 115 }
 0x121   :  { %v821_v55 = vsel %vm3659_vm13, %v815_v24, 0.0  ;;  %vm3660_vm3 = vcmp.lt.s32.totalorder %v2089_v38, 14  ;;  %v797_v62 = vadd.f32 %v795_v46, %v771_v25  ;;  %v816_v37 = vmul.f32 %v813_v49, %v2623_v32 }
 0x122   :  { %v770_v36 = vsel %vm3660_vm3, %v764_v58, 0.0  ;;  %v1342_v19 = vstv %s2896_s18  ;;  %v746_v17 = vadd.f32 %v744_v1, %v720_v35  ;;  %vm3661_vm9 = vcmp.ge.s32.totalorder %v2052_v23, 2 }
 0x123   :  { %v2942_v29 = vpop.permute.xlu0 %1087  ;;  %v847_v8 = vsel %vm3661_vm9, %v841_v21, 0.0  ;;  %v865_v20 = vsel %vm864_vm10, %v2609_v31, %v2617_v54  ;;  %vm1013_vm12 = vcmp.lt.s32.totalorder %v2023_v10, 114  ;;  %v1344_v32 = vstv %s2909_s19 }
 0x124   :  { %v2953_v53 = vpop.permute.xlu1 %1089  ;;  %v796_v26 = vsel %vm3601_vm0, %v790_v52, 0.0  ;;  %v823_v45 = vadd.f32 %v821_v55, %v797_v62  ;;  %v842_v40 = vmul.f32 %v839_v60, %v2625_v56  ;;  %v1368_v42 = vstv %s2924_s20  ;;  %v3663_v52 = vld [vmem:[#allocation13_spill] sm:$0xff] }
 0x125   :  { %v772_v51 = vadd.f32 %v770_v36, %v746_v17  ;;  %v873_v50 = vsel %vm223_vm14, %v867_v34, 0.0  ;;  %vm1039_vm10 = vcmp.lt.s32.totalorder %v2023_v10, 113  ;;  %v1319_v31 = vmul.f32 %v2032_v15, %v1318_v57  ;;  %v3664_v17 = vld [vmem:[#allocation12_spill] sm:$0xff] }
 0x126   :  { %v1370_v54 = vstv %s2935_s21  ;;  %vm3662_vm11 = vcmp.ge.s32.totalorder %v2089_v38, 3  ;;  %v849_v63 = vadd.f32 %v847_v8, %v823_v45  ;;  %v868_v58 = vmul.f32 %v865_v20, %v2690_v44 }
 0x127   :  { %v2971_v39 = vpop.permute.xlu0 %1113  ;;  %v822_v24 = vsel %vm3662_vm11, %v816_v37, 0.0  ;;  %v910_v56 = vsel %vm909_vm7, %v2633_v3, %v2644_v13  ;;  %v798_v46 = vadd.f32 %v796_v26, %v772_v51  ;;  %v1343_v21 = vmul.f32 %v2028_v14, %v1342_v19 }
 0x128   :  { %v2983_v5 = vpop.permute.xlu1 %1115  ;;  %v1345_v57 = vmul.f32 %v2032_v15, %v1344_v32  ;;  %v1369_v1 = vmul.f32 %v2028_v14, %v1368_v42  ;;  %v848_v44 = vsel %vm218_vm15, %v842_v40, 0.0  ;;  %v875_v25 = vadd.f32 %v873_v50, %v849_v63  ;;  %v3665_v40 = vld [vmem:[#allocation21_spill] sm:$0xff]  ;;  %v3667_v50 = vld [vmem:[#allocation15_spill] sm:$0xff] }
 0x129   :  { %v936_v35 = vsel %vm935_vm8, %v3663_v52, %v2680_v6  ;;  %v1371_v55 = vmul.f32 %v2032_v15, %v1370_v54  ;;  %v824_v60 = vadd.f32 %v822_v24, %v798_v46  ;;  %v912_v34 = vmul.f32 %v910_v56, %v2692_v61  ;;  %v3668_v24 = vld [vmem:[#allocation24_spill] sm:$0xff]  ;;  %v3669_v63 = vld [vmem:[#allocation23_spill] sm:$0xff] }
 0x12a   :  { %v3025_v36 = vadd.f32 %v2847_v11, %v2837_v2  ;;  %v3028_v62 = vadd.f32 %v1293_v12, %v2865_v28  ;;  %v874_v37 = vsel %vm224_vm1, %v868_v58, 0.0  ;;  %v962_v19 = vsel %vm961_vm2, %v2708_v48, %v2715_v0 }
 0x12b   :  { %v3004_v43 = vpop.permute.xlu0 %1139  ;;  %vm196_vm4 = vcmp.lt.s32.totalorder %v3664_v17, 240  ;;  %v3039_v20 = vadd.f32 %v1319_v31, %v1317_v9  ;;  %v1394_v32 = vstv %s2974_s23  ;;  %v850_v2 = vadd.f32 %v848_v44, %v824_v60 }
 0x12c   :  { %v3006_v49 = vpop.permute.xlu1 %1141  ;;  %v911_v11 = vsel %vm909_vm7, %v2644_v13, %v2633_v3  ;;  %v938_v28 = vmul.f32 %v936_v35, %v2703_v47  ;;  %vm1091_vm13 = vcmp.lt.s32.totalorder %v2023_v10, 111  ;;  %v1396_v26 = vstv %s2986_s24 }
 0x12d   :  { %v894_v45 = vadd.f32 %v2698_v18, %v875_v25  ;;  %v988_v9 = vsel %vm987_vm5, %v3665_v40, %v2750_v41  ;;  %vm1065_vm3 = vcmp.lt.s32.totalorder %v2023_v10, 112  ;;  %v3057_v42 = vadd.f32 %v1345_v57, %v1343_v21  ;;  %v3671_v57 = vld [vmem:[#allocation16_spill] sm:$0xff] }
 0x12e   :  { %v3059_v51 = vadd.f32 %v1371_v55, %v1369_v1  ;;  %v876_v3 = vadd.f32 %v874_v37, %v850_v2  ;;  %vm3666_vm7 = vcmp.lt.s32.totalorder %v2052_v23, 15  ;;  %v937_v18 = vsel %vm935_vm8, %v2680_v6, %v3663_v52 }
 0x12f   :  { %v3037_v8 = vpop.permute.xlu0 %1165  ;;  %v918_v13 = vsel %vm3666_vm7, %v912_v34, 0.0  ;;  %v964_v31 = vmul.f32 %v962_v19, %v3667_v50  ;;  %vm1117_vm9 = vcmp.lt.s32.totalorder %v2023_v10, 110  ;;  %v913_v54 = vmul.f32 %v911_v11, %v2692_v61  ;;  %v3672_v34 = vld [vmem:[#allocation14_spill] sm:$0xff]  ;;  %v3674_v19 = vld [vmem:[#allocation17_spill] sm:$0xff] }
 0x130   :  { %v3048_v12 = vpop.permute.xlu1 %1167  ;;  %v1014_v58 = vsel %vm1013_vm12, %v3669_v63, %v3668_v24  ;;  %v3079_v46 = vmul.f32 %v2028_v14, %v1394_v32  ;;  %v3082_v21 = vmul.f32 %v2032_v15, %v1396_v26  ;;  %vm3670_vm8 = vcmp.lt.s32.totalorder %v2052_v23, 14 }
 0x131   :  { %v944_v6 = vsel %vm3670_vm8, %v938_v28, 0.0  ;;  %v963_v61 = vsel %vm961_vm2, %v2715_v0, %v2708_v48  ;;  %v990_v1 = vmul.f32 %v988_v9, %v3671_v57  ;;  %vm1143_vm11 = vcmp.lt.s32.totalorder %v2023_v10, 109 }
 0x132   :  { %v1420_v25 = vstv %s3011_s25  ;;  %v920_v52 = vadd.f32 %v918_v13, %v894_v45  ;;  %v939_v35 = vmul.f32 %v937_v18, %v2703_v47  ;;  %v1040_v55 = vsel %vm1039_vm10, %v2830_v16, %v2844_v59  ;;  %v3676_v45 = vld [vmem:[#allocation18_spill] sm:$0xff] }
 0x133   :  { %v3076_v56 = vpop.permute.xlu0 %1191  ;;  %v1422_v60 = vstv %s3020_s26  ;;  %v895_v37 = vadd.f32 %v3672_v34, %v876_v3  ;;  %vm3673_vm2 = vcmp.lt.s32.totalorder %v2052_v23, 13  ;;  %v989_v0 = vsel %vm987_vm5, %v2750_v41, %v3665_v40 }
 0x134   :  { %v3094_v44 = vpop.permute.xlu1 %1193  ;;  %v970_v48 = vsel %vm3673_vm2, %v964_v31, 0.0  ;;  %v1016_v32 = vmul.f32 %v1014_v58, %v3674_v19  ;;  %vm1169_vm7 = vcmp.lt.s32.totalorder %v2023_v10, 99  ;;  %v919_v47 = vsel %vm3600_vm6, %v913_v54, 0.0 }
 0x135   :  { %v946_v2 = vadd.f32 %v944_v6, %v920_v52  ;;  %v965_v11 = vmul.f32 %v963_v61, %v3667_v50  ;;  %v1015_v28 = vsel %vm1013_vm12, %v3668_v24, %v3669_v63  ;;  %vm3675_vm5 = vcmp.ge.s32.totalorder %v2052_v23, 3 }
 0x136   :  { %v996_v41 = vsel %vm3675_vm5, %v990_v1, 0.0  ;;  %v1042_v40 = vmul.f32 %v1040_v55, %v3676_v45  ;;  %v3128_v3 = vmul.f32 %v2028_v14, %v1420_v25  ;;  %v3131_v13 = vmul.f32 %v2032_v15, %v1422_v60 }
 0x137   :  { %v3119_v26 = vpop.permute.xlu0 %1217  ;;  %vm3677_vm2 = vcmp.lt.s32.totalorder %v2089_v38, 14  ;;  %v972_v50 = vadd.f32 %v970_v48, %v946_v2  ;;  %v991_v31 = vmul.f32 %v989_v0, %v3671_v57  ;;  %v1446_v54 = vstv %s3061_s0 }
 0x138   :  { %v3125_v9 = vpop.permute.xlu1 %1219  ;;  %v945_v18 = vsel %vm3677_vm2, %v939_v35, 0.0  ;;  %v921_v24 = vadd.f32 %v919_v47, %v895_v37  ;;  %vm3678_vm12 = vcmp.ge.s32.totalorder %v2089_v38, 3  ;;  %v1017_v58 = vmul.f32 %v1015_v28, %v3674_v19 }
 0x139   :  { %vm3141_vm5 = vmand %vm196_vm4, %vm3678_vm12  ;;  %vm3681_vm8 = vcmp.ge.s32.totalorder %v2052_v23, 2  ;;  %v1041_v61 = vsel %vm1039_vm10, %v2844_v59, %v2830_v16  ;;  %vm1221_vm2 = vcmp.lt.s32.totalorder %v2023_v10, 97  ;;  %v971_v57 = vsel %vm3601_vm0, %v965_v11, 0.0  ;;  %v3686_v11 = vld [vmem:[#allocation20_spill] sm:$0xff] }
 0x13a   :  { %v1022_v6 = vsel %vm3681_vm8, %v1016_v32, 0.0  ;;  %v998_v1 = vadd.f32 %v996_v41, %v972_v50  ;;  %vm3159_vm12 = vmand %vm196_vm4, %vm218_vm15  ;;  %v1092_v52 = vsel %vm1091_vm13, %v2942_v29, %v2953_v53  ;;  %v1448_v59 = vstv %s3084_s27 }
 0x13b   :  { %v3167_v16 = vpop.permute.xlu0 %1243  ;;  %v947_v35 = vadd.f32 %v945_v18, %v921_v24  ;;  %v1048_v55 = vsel %vm223_vm14, %v1042_v40, 0.0  ;;  %v1066_v60 = vsel %vm1065_vm3, %v2894_v30, %v2906_v33  ;;  %v1067_v34 = vsel %vm1065_vm3, %v2906_v33, %v2894_v30  ;;  %vm3196_vm3 = vmand %vm196_vm4, %vm224_vm1 }
 0x13c   :  { %v3180_v37 = vpop.permute.xlu1 %1245  ;;  %v997_v48 = vsel %vm3141_vm5, %v991_v31, 0.0  ;;  %v1024_v0 = vadd.f32 %v1022_v6, %v998_v1  ;;  %v1043_v19 = vmul.f32 %v1041_v61, %v3676_v45  ;;  %v1118_v32 = vsel %vm1117_vm9, %v2971_v39, %v2983_v5  ;;  %v3687_v45 = vld [vmem:[#allocation19_spill] sm:$0xff] }
 0x13d   :  { %vm202_vm10 = vcmp.lt.s32.totalorder %v3664_v17, 224  ;;  %v973_v47 = vadd.f32 %v971_v57, %v947_v35  ;;  %v1023_v2 = vsel %vm3159_vm12, %v1017_v58, 0.0  ;;  %v1093_v33 = vsel %vm1091_vm13, %v2953_v53, %v2942_v29  ;;  %v3688_v53 = vld [vmem:[#allocation22_spill] sm:$0xff]  ;;  %v3692_v35 = vld [vmem:[#allocation25_spill] sm:$0xff] }
 0x13e   :  { %v1094_v28 = vmul.f32 %v1092_v52, %v3686_v11  ;;  %v1050_v41 = vadd.f32 %v1048_v55, %v1024_v0  ;;  %v1068_v40 = vmul.f32 %v1066_v60, %v3687_v45  ;;  %v1069_v18 = vmul.f32 %v1067_v34, %v3687_v45 }
 0x13f   :  { %v1144_v50 = vsel %vm1143_vm11, %v3004_v43, %v3006_v49  ;;  %v3211_v31 = vpop.permute.xlu0 %1269  ;;  %v999_v24 = vadd.f32 %v997_v48, %v973_v47  ;;  %v1119_v29 = vsel %vm1117_vm9, %v2983_v5, %v2971_v39  ;;  %v1120_v63 = vmul.f32 %v1118_v32, %v3688_v53  ;;  %vm3235_vm9 = vmand %vm196_vm4, %vm3600_vm6 }
 0x140   :  { %vm1247_vm13 = vcmp.lt.s32.totalorder %v2023_v10, 96  ;;  %v3219_v58 = vpop.permute.xlu1 %1271  ;;  %vm1273_vm8 = vcmp.lt.s32.totalorder %v2023_v10, 95  ;;  %v1447_v6 = vmul.f32 %v2028_v14, %v1446_v54  ;;  %v1049_v61 = vsel %vm3196_vm3, %v1043_v19, 0.0 }
 0x141   :  { %v1095_v57 = vmul.f32 %v1093_v33, %v3686_v11  ;;  %v1170_v39 = vsel %vm1169_vm7, %v3037_v8, %v3048_v12  ;;  %v1449_v5 = vmul.f32 %v2032_v15, %v1448_v59  ;;  %v1025_v1 = vadd.f32 %v1023_v2, %v999_v24 }
 0x142   :  { %vm3691_vm5 = vcmp.lt.s32.totalorder %v2052_v23, 15  ;;  %v1145_v52 = vsel %vm1143_vm11, %v3006_v49, %v3004_v43  ;;  %v1146_v55 = vmul.f32 %v1144_v50, %v3692_v35  ;;  %vm1299_vm12 = vcmp.lt.s32.totalorder %v2023_v10, 94 }
 0x143   :  { %v1100_v54 = vsel %vm3691_vm5, %v1094_v28, 0.0  ;;  %v1075_v59 = vsel %vm196_vm4, %v1069_v18, 0.0  ;;  %v1076_v60 = vadd.f32 %v1068_v40, %v1050_v41  ;;  %v1121_v34 = vmul.f32 %v1119_v29, %v3688_v53  ;;  %v3256_v0 = vpop.permute.xlu0 %1295 }
 0x144   :  { %vm3693_vm3 = vcmp.lt.s32.totalorder %v2023_v10, 98  ;;  %v1051_v43 = vadd.f32 %v1049_v61, %v1025_v1  ;;  %vm3694_vm11 = vcmp.lt.s32.totalorder %v2089_v38, 14  ;;  %vm3697_vm6 = vcmp.lt.s32.totalorder %v2052_v23, 14  ;;  %v1298_v2 = vpop.permute.xlu1 %1297 }
 0x145   :  { %v1196_v48 = vsel %vm3693_vm3, %v3076_v56, %v3094_v44  ;;  %vm3262_vm5 = vmand %vm196_vm4, %vm3694_vm11  ;;  %v1126_v19 = vsel %vm3697_vm6, %v1120_v63, 0.0  ;;  %v1171_v32 = vsel %vm1169_vm7, %v3048_v12, %v3037_v8  ;;  %v1172_v47 = vmul.f32 %v1170_v39, %v2816_v7 }
 0x146   :  { %vm1325_vm3 = vcmp.lt.s32.totalorder %v2023_v10, 93  ;;  %v1101_v30 = vsel %vm3235_vm9, %v1095_v57, 0.0  ;;  %v1102_v33 = vadd.f32 %v1100_v54, %v1076_v60  ;;  %v1147_v11 = vmul.f32 %v1145_v52, %v3692_v35  ;;  %vm3285_vm6 = vmand %vm196_vm4, %vm3601_vm0 }
 0x147   :  { %v1222_v28 = vsel %vm1221_vm2, %v3119_v26, %v3125_v9  ;;  %v1077_v41 = vadd.f32 %v1075_v59, %v1051_v43  ;;  %vm3700_vm7 = vcmp.lt.s32.totalorder %v2052_v23, 13  ;;  %v1198_v45 = vmul.f32 %v1196_v48, %v2818_v27  ;;  %v1322_v53 = vpop.permute.xlu0 %1321 }
 0x148   :  { %v1152_v12 = vsel %vm3700_vm7, %v1146_v55, 0.0  ;;  %vm1351_vm9 = vcmp.lt.s32.totalorder %v2023_v10, 83  ;;  %v3295_v40 = vadd.f32 %v3082_v21, %v3079_v46  ;;  %v1127_v18 = vsel %vm3262_vm5, %v1121_v34, 0.0  ;;  %v1324_v61 = vpop.permute.xlu1 %1323 }
 0x149   :  { %v1128_v50 = vadd.f32 %v1126_v19, %v1102_v33  ;;  %v1173_v24 = vmul.f32 %v1171_v32, %v2816_v7  ;;  %vm3701_vm4 = vcmp.lt.s32.totalorder %v2023_v10, 98  ;;  %v1103_v63 = vadd.f32 %v1101_v30, %v1077_v41 }
 0x14a   :  { %v1197_v29 = vsel %vm3701_vm4, %v3094_v44, %v3076_v56  ;;  %vm3702_vm11 = vcmp.ge.s32.totalorder %v2089_v38, 3  ;;  %vm3705_vm5 = vcmp.ge.s32.totalorder %v2052_v23, 3  ;;  %v1224_v7 = vmul.f32 %v1222_v28, %v2832_v4 }
 0x14b   :  { %vm3308_vm7 = vmand %vm202_vm10, %vm3702_vm11  ;;  %v1178_v21 = vsel %vm3705_vm5, %v1172_v47, 0.0  ;;  %vm1377_vm0 = vcmp.lt.s32.totalorder %v2023_v10, 82  ;;  %v3318_v56 = vadd.f32 %v3131_v13, %v3128_v3  ;;  %v1153_v44 = vsel %vm3285_vm6, %v1147_v11, 0.0 }
 0x14c   :  { %v1154_v57 = vadd.f32 %v1152_v12, %v1128_v50  ;;  %v1223_v39 = vsel %vm1221_vm2, %v3125_v9, %v3119_v26  ;;  %v3328_v1 = vadd.f32 %v1449_v5, %v1447_v6  ;;  %v1129_v25 = vadd.f32 %v1127_v18, %v1103_v63  ;;  %vm3343_vm2 = vmand %vm202_vm10, %vm218_vm15  ;;  %v1348_v6 = vpop.permute.xlu0 %1347  ;;  %v1350_v34 = vpop.permute.xlu1 %1349 }
 0x14d   :  { %v1199_v54 = vmul.f32 %v1197_v29, %v2818_v27  ;;  %vm3706_vm4 = vcmp.ge.s32.totalorder %v2052_v23, 2  ;;  %vm1403_vm11 = vcmp.lt.s32.totalorder %v2023_v10, 81  ;;  %v1472_v13 = vstv %s3247_s28 }
 0x14e   :  { %v1204_v3 = vsel %vm3706_vm4, %v1198_v45, 0.0  ;;  %v1179_v52 = vsel %vm3308_vm7, %v1173_v24, 0.0  ;;  %v1180_v35 = vadd.f32 %v1178_v21, %v1154_v57  ;;  %v1249_v27 = vsel %vm1247_vm13, %v3180_v37, %v3167_v16  ;;  %vm3367_vm7 = vmand %vm202_vm10, %vm224_vm1 }
 0x14f   :  { %v1274_v9 = vsel %vm1273_vm8, %v3211_v31, %v3219_v58  ;;  %v1155_v5 = vadd.f32 %v1153_v44, %v1129_v25  ;;  %v1225_v55 = vmul.f32 %v1223_v39, %v2832_v4  ;;  %v1230_v59 = vsel %vm223_vm14, %v1224_v7, 0.0 }
 0x150   :  { %v1248_v60 = vsel %vm1247_vm13, %v3167_v16, %v3180_v37  ;;  %vm208_vm6 = vcmp.lt.s32.totalorder %v3664_v17, 208  ;;  %v1206_v48 = vadd.f32 %v1204_v3, %v1180_v35  ;;  %v1275_v4 = vsel %vm1273_vm8, %v3219_v58, %v3211_v31  ;;  %v1374_v11 = vpop.permute.xlu0 %1373  ;;  %v1376_v12 = vpop.permute.xlu1 %1375 }
 0x151   :  { %v1300_v16 = vsel %vm1299_vm12, %v3256_v0, %v1298_v2  ;;  %v3379_v37 = vmul.f32 %v2028_v14, %v1472_v13  ;;  %v1181_v49 = vadd.f32 %v1179_v52, %v1155_v5  ;;  %v1205_v19 = vsel %vm3343_vm2, %v1199_v54, 0.0 }
 0x152   :  { %v1251_v32 = vmul.f32 %v1249_v27, %v2834_v22  ;;  %v1276_v47 = vmul.f32 %v1274_v9, %v3025_v36  ;;  %vm1429_vm13 = vcmp.lt.s32.totalorder %v2023_v10, 80  ;;  %v1232_v31 = vadd.f32 %v1230_v59, %v1206_v48 }
 0x153   :  { %v1250_v58 = vmul.f32 %v1248_v60, %v2834_v22  ;;  %v1301_v30 = vsel %vm1299_vm12, %v1298_v2, %v3256_v0  ;;  %v1326_v33 = vsel %vm1325_vm3, %v1322_v53, %v1324_v61  ;;  %v1231_v28 = vsel %vm3367_vm7, %v1225_v55, 0.0 }
 0x154   :  { %v1277_v41 = vmul.f32 %v1275_v4, %v3025_v36  ;;  %v1302_v8 = vmul.f32 %v1300_v16, %v3028_v62  ;;  %v1474_v45 = vstv %s3320_s29  ;;  %v1207_v22 = vadd.f32 %v1205_v19, %v1181_v49  ;;  %v1402_v54 = vpop.permute.xlu1 %1401 }
 0x155   :  { %vm3711_vm8 = vcmp.lt.s32.totalorder %v2089_v38, 15  ;;  %v1327_v2 = vsel %vm1325_vm3, %v1324_v61, %v1322_v53  ;;  %v1352_v18 = vsel %vm1351_vm9, %v1348_v6, %v1350_v34  ;;  %v1498_v36 = vstv %s3330_s30  ;;  %v1400_v61 = vpop.permute.xlu0 %1399 }
 0x156   :  { %vm3403_vm12 = vmand %vm202_vm10, %vm3711_vm8  ;;  %v1257_v50 = vsel %vm202_vm10, %v1251_v32, 0.0  ;;  %vm3714_vm5 = vcmp.lt.s32.totalorder %v2052_v23, 15  ;;  %v1303_v29 = vmul.f32 %v1301_v30, %v3028_v62  ;;  %v1328_v63 = vmul.f32 %v1326_v33, %v3039_v20 }
 0x157   :  { %v1282_v24 = vsel %vm3714_vm5, %v1276_v47, 0.0  ;;  %vm1455_vm4 = vcmp.lt.s32.totalorder %v2023_v10, 79  ;;  %v1233_v46 = vadd.f32 %v1231_v28, %v1207_v22  ;;  %v1258_v21 = vadd.f32 %v1250_v58, %v1232_v31 }
 0x158   :  { %vm3715_vm3 = vcmp.lt.s32.totalorder %v2089_v38, 14  ;;  %v1353_v7 = vsel %vm1351_vm9, %v1350_v34, %v1348_v6  ;;  %v1378_v62 = vsel %vm1377_vm0, %v1374_v11, %v1376_v12  ;;  %v1283_v44 = vsel %vm3403_vm12, %v1277_v41, 0.0  ;;  %v1428_v49 = vpop.permute.xlu1 %1427 }
 0x159   :  { %vm3423_vm2 = vmand %vm202_vm10, %vm3715_vm3  ;;  %vm3718_vm7 = vcmp.lt.s32.totalorder %v2052_v23, 14  ;;  %v1329_v39 = vmul.f32 %v1327_v2, %v3039_v20  ;;  %v1354_v25 = vmul.f32 %v1352_v18, %v3057_v42  ;;  %v1259_v3 = vadd.f32 %v1257_v50, %v1233_v46  ;;  %v1426_v34 = vpop.permute.xlu0 %1425 }
 0x15a   :  { %v1308_v57 = vsel %vm3718_vm7, %v1302_v8, 0.0  ;;  %v1284_v13 = vadd.f32 %v1282_v24, %v1258_v21  ;;  %vm3719_vm9 = vcmp.lt.s32.totalorder %v2089_v38, 13  ;;  %v1379_v35 = vsel %vm1377_vm0, %v1376_v12, %v1374_v11 }
 0x15b   :  { %vm3441_vm8 = vmand %vm202_vm10, %vm3719_vm9  ;;  %v1404_v20 = vsel %vm1403_vm11, %v1400_v61, %v1402_v54  ;;  %v1309_v26 = vsel %vm3423_vm2, %v1303_v29, 0.0  ;;  %vm3722_vm12 = vcmp.lt.s32.totalorder %v2052_v23, 13  ;;  %v1355_v9 = vmul.f32 %v1353_v7, %v3057_v42 }
 0x15c   :  { %v1334_v27 = vsel %vm3722_vm12, %v1328_v63, 0.0  ;;  %v1380_v6 = vmul.f32 %v1378_v62, %v3059_v51  ;;  %v1285_v5 = vadd.f32 %v1283_v44, %v1259_v3  ;;  %v1310_v55 = vadd.f32 %v1308_v57, %v1284_v13  ;;  %v1454_v18 = vpop.permute.xlu1 %1453 }
 0x15d   :  { %vm3723_vm10 = vcmp.ge.s32.totalorder %v2089_v38, 3  ;;  %v1405_v60 = vsel %vm1403_vm11, %v1402_v54, %v1400_v61  ;;  %v1500_v48 = vstv %s3392_s3  ;;  %v1335_v42 = vsel %vm3441_vm8, %v1329_v39, 0.0  ;;  %vm3476_vm11 = vmand %vm208_vm6, %vm218_vm15  ;;  %v1452_v8 = vpop.permute.xlu0 %1451 }
 0x15e   :  { %vm3459_vm0 = vmand %vm208_vm6, %vm3723_vm10  ;;  %vm3726_vm5 = vcmp.ge.s32.totalorder %v2052_v23, 3  ;;  %v1381_v4 = vmul.f32 %v1379_v35, %v3059_v51  ;;  %v1406_v16 = vmul.f32 %v1404_v20, %v3295_v40  ;;  %v1311_v19 = vadd.f32 %v1309_v26, %v1285_v5 }
 0x15f   :  { %v1360_v43 = vsel %vm3726_vm5, %v1354_v25, 0.0  ;;  %v1336_v32 = vadd.f32 %v1334_v27, %v1310_v55  ;;  %v1431_v31 = vsel %vm1429_vm13, %v1428_v49, %v1426_v34  ;;  %v1475_v58 = vmul.f32 %v2032_v15, %v1474_v45  ;;  %vm3493_vm15 = vmand %vm208_vm6, %vm224_vm1 }
 0x160   :  { %v1361_v51 = vsel %vm3459_vm0, %v1355_v9, 0.0  ;;  %vm3729_vm3 = vcmp.ge.s32.totalorder %v2052_v23, 2  ;;  %v1407_v33 = vmul.f32 %v1405_v60, %v3295_v40  ;;  %vm1481_vm2 = vcmp.lt.s32.totalorder %v2023_v10, 78  ;;  %v1480_v57 = vpop.permute.xlu1 %1479 }
 0x161   :  { %v1386_v30 = vsel %vm3729_vm3, %v1380_v6, 0.0  ;;  %v1337_v11 = vadd.f32 %v1335_v42, %v1311_v19  ;;  %v1362_v28 = vadd.f32 %v1360_v43, %v1336_v32  ;;  %v1499_v12 = vmul.f32 %v2028_v14, %v1498_v36  ;;  %v1478_v61 = vpop.permute.xlu0 %1477 }
 0x162   :  { %v1501_v45 = vmul.f32 %v2032_v15, %v1500_v48  ;;  %v1387_v40 = vsel %vm3476_vm11, %v1381_v4, 0.0  ;;  %v1412_v22 = vsel %vm223_vm14, %v1406_v16, 0.0  ;;  %v1430_v0 = vsel %vm1429_vm13, %v1426_v34, %v1428_v49 }
 0x163   :  { %v1433_v2 = vmul.f32 %v1431_v31, %v3318_v56  ;;  %v1363_v50 = vadd.f32 %v1361_v51, %v1337_v11  ;;  %v1388_v24 = vadd.f32 %v1386_v30, %v1362_v28  ;;  %v1456_v29 = vsel %vm1455_vm4, %v1452_v8, %v1454_v18 }
 0x164   :  { %v1457_v14 = vsel %vm1455_vm4, %v1454_v18, %v1452_v8  ;;  %v1413_v15 = vsel %vm3493_vm15, %v1407_v33, 0.0  ;;  %v1458_v36 = vmul.f32 %v1456_v29, %v3328_v1  ;;  %v1476_v46 = vadd.f32 %v1475_v58, %v3379_v37  ;;  %v1506_v6 = vpop.permute.xlu1 %1505  ;;  %v3742_v8 = vld [vmem:[#allocation11_spill] sm:$0xff] }
 0x165   :  { %v1459_v63 = vmul.f32 %v1457_v14, %v3328_v1  ;;  %v1389_v21 = vadd.f32 %v1387_v40, %v1363_v50  ;;  %v1414_v53 = vadd.f32 %v1412_v22, %v1388_v24  ;;  %v1432_v7 = vmul.f32 %v1430_v0, %v3318_v56  ;;  %v1504_v26 = vpop.permute.xlu0 %1503 }
 0x166   :  { %vm3732_vm14 = vcmp.lt.s32.totalorder %v2089_v38, 15  ;;  %v1439_v44 = vsel %vm208_vm6, %v1433_v2, 0.0  ;;  %vm1507_vm13 = vcmp.lt.s32.totalorder %v2023_v10, 77  ;;  %vm3735_vm4 = vcmp.lt.s32.totalorder %v2089_v38, 14 }
 0x167   :  { %vm3520_vm1 = vmand %vm208_vm6, %vm3732_vm14  ;;  %v1415_v1 = vadd.f32 %v1413_v15, %v1389_v21  ;;  %v1482_v37 = vsel %vm1481_vm2, %v1478_v61, %v1480_v57  ;;  %v1483_v39 = vsel %vm1481_vm2, %v1480_v57, %v1478_v61  ;;  %v1502_v25 = vadd.f32 %v1501_v45, %v1499_v12  ;;  %v1773_v21 = vld [vmem:[#allocation2] sm:$0xff] }
 0x168   :  { %vm3531_vm7 = vmand %vm208_vm6, %vm3735_vm4  ;;  %vm3738_vm9 = vcmp.lt.s32.totalorder %v2052_v23, 15  ;;  %v1465_v3 = vsel %vm3520_vm1, %v1459_v63, 0.0  ;;  %v1484_v13 = vmul.f32 %v1482_v37, %v1476_v46  ;;  %v1485_v52 = vmul.f32 %v1483_v39, %v1476_v46 }
 0x169   :  { %v1464_v54 = vsel %vm3738_vm9, %v1458_v36, 0.0  ;;  %v1440_v35 = vadd.f32 %v1432_v7, %v1414_v53  ;;  %v1441_v20 = vadd.f32 %v1439_v44, %v1415_v1  ;;  %vm3739_vm8 = vcmp.lt.s32.totalorder %v2052_v23, 14  ;;  %v1774_v7 = vld [vmem:[#allocation2 + $0x8] sm:$0xff] }
 0x16a   :  { %v1490_v27 = vsel %vm3739_vm8, %v1484_v13, 0.0  ;;  %v1491_v9 = vsel %vm3531_vm7, %v1485_v52, 0.0  ;;  %vm3740_vm12 = vcmp.lt.s32.totalorder %v2089_v38, 13  ;;  %v1508_v59 = vsel %vm1507_vm13, %v1504_v26, %v1506_v6 }
 0x16b   :  { %v1466_v5 = vadd.f32 %v1464_v54, %v1440_v35  ;;  %v1467_v55 = vadd.f32 %v1465_v3, %v1441_v20  ;;  %vm1495_vm10 = vmand %vm208_vm6, %vm3740_vm12  ;;  %v1509_v60 = vsel %vm1507_vm13, %v1506_v6, %v1504_v26  ;;  %v1510_v34 = vmul.f32 %v1508_v59, %v1502_v25 }
 0x16c   :  { %v1511_v48 = vmul.f32 %v1509_v60, %v1502_v25  ;;  %vm3741_vm0 = vcmp.lt.s32.totalorder %v2052_v23, 13  ;;  %v1890_v11 = vmov 1966171168   ;;  %v1567_v0 = vsub.s32 0, %v3742_v8 }
 0x16d   :  { %v1492_v42 = vadd.f32 %v1490_v27, %v1466_v5  ;;  %v1493_v43 = vadd.f32 %v1491_v9, %v1467_v55  ;;  %v1516_v4 = vsel %vm3741_vm0, %v1510_v34, 0.0  ;;  %v1544_v23 = vunpack.c.l.s4 %v1890_v11 }
 0x16e   :  { %v1517_v16 = vsel %vm1495_vm10, %v1511_v48, 0.0  ;;  %v1571_v2 = vsub.s32 1, %v3742_v8 }
 0x16f   :  { %v1518_v49 = vadd.f32 %v1516_v4, %v1492_v42  ;;  %v1519_v19 = vadd.f32 %v1517_v16, %v1493_v43  ;;  %v1545_v28 = vunpack.c.0.s8 %v1544_v23 }
 0x171   :  { %v1522_v38 = vrot.slane %v1518_v49, 2  ;;  %v1523_v32 = vrot.slane %v1519_v19, 2  ;;  %v1548_v12 = vsub.s32 %v1545_v28, %v3742_v8 }
 0x173   :  { %v1526_v17 = vadd.f32 %v1522_v38, %v1518_v49  ;;  %v1527_v47 = vadd.f32 %v1523_v32, %v1519_v19 }
 0x175   :  { %v1706_v31 = vmul.f32 -1.442695, %v1526_v17  ;;  %v1707_v58 = vmul.f32 -1.442695, %v1527_v47 }
 0x177   :  { %1765 = vpow2.f32 %v1706_v31 }
 0x178   :  { %1767 = vpow2.f32 %v1707_v58 }
 0x181   :  { %v1766_v10 = vpop.eup %1765 }
 0x182   :  { %v1768_v51 = vpop.eup %1767  ;;  %v1534_v30 = vadd.f32 1.0, %v1766_v10 }
 0x183   :  { %v1535_v33 = vadd.f32 1.0, %v1768_v51 }
 0x184   :  { %1769 = vrcp.f32 %v1534_v30 }
 0x185   :  { %1771 = vrcp.f32 %v1535_v33 }
 0x18e   :  { %v1770_v41 = vpop.eup %1769 }
 0x18f   :  { %v1772_v45 = vpop.eup %1771 }
 0x190   :  { %v1542_v40 = vcombine.low %v1770_v41, %v1772_v45 }
 0x192   :  { %v1549_v22 = vrot.slane %v1542_v40, %v1548_v12 }
 0x194   :  { %v1550_v18 = vcombine.high %v1549_v22, %v1549_v22  ;;  %v1557_v50 = vrot.slane %v1549_v22, %v1548_v12 }
 0x196   :  { %v1564_v24 = vrot.slane %v1550_v18, %v1548_v12  ;;  %v1568_v29 = vrot.slane %v1557_v50, %v1567_v0  ;;  %v1572_v14 = vrot.slane %v1557_v50, %v1571_v2 }
 0x198   :  { %v1576_v15 = vrot.slane %v1564_v24, %v1567_v0  ;;  %v1580_v36 = vrot.slane %v1564_v24, %v1571_v2  ;;  %v1581_v63 = vcombine.low %v1568_v29, %v1572_v14 }
 0x19a   :  { %v1582_v46 = vcombine.low %v1576_v15, %v1580_v36  ;;  %v1585_v53 = vmul.f32 %v1773_v21, %v1581_v63 }
 0x19c   :  { %v1586_v62 = vmul.f32 %v1774_v7, %v1582_v46  ;;  %1587 = vst [vmem:[#allocation7] sm:$0xff] %v1585_v53 }
 0x19e   :  { %1588 = vst [vmem:[#allocation7 + $0x8] sm:$0xff] %v1586_v62 }
 0x19f   :  { %1820 = shalt.err (!%p1817_p3)
}
 0x1a0   :  { %s1821_s9 = scalar_lea.hbm %s3577_s2, 256 }
 0x1a1   :  { %p1822_p4 = scmp.ne.s32.totalorder %s3577_s2, %s1821_s9  ;;  %p1825_p5 = scmp.lt.u32.totalorder %s1821_s9, %s3577_s2 }
 0x1a3   :  { %p1827_p6 = pnand %p1825_p5, %p1822_p4 }
 0x1a5   :  { %1830 = shalt.err (!%p1827_p6)
}
 0x1a6   :  { %1600 = dma.vmem_to_hbm [thread:$0]  %s1595_s5, 256, %s3577_s2, [#allocation4], %s1838_s1, %s1838_s1, %s1839_s22  }
 0x1a7   :  { %1835 = dma.done.wait [#allocation4], 256  }
 0x1a8   :  { %1836 = vsyncadd [#allocation4], 4294967040 }
 0x1a9   :  { %1604 = vsyncpa [#allocation3], 1 }
 0x1aa   :  { %1605 = vsyncpa [#allocation4], 1 }
 0x1ab   :  { %1606 = vsyncpa [#allocation5], 1 }

</bundles_post_ra>
